<compile_context>
chip_gen: v5e
topology: v5e:2x2
jax: 0.10.0
libtpu: 0.0.40
codegen_flags: <defaults>
</compile_context>

<pallas_src>
import jax
import jax.numpy as jnp
from jax.experimental import pallas as pl
from jax.experimental.pallas import tpu as pltpu


# ----------------------------------------------------------------------------
# Single fused kernel: conv1 -> conv2 -> flatten -> linear1/2 -> dueling heads
# ----------------------------------------------------------------------------
def dqn_fused_kernel(
    x_ref,        # (H*B, W*Cin)     input, rows (h, b), lanes (w, cin)
    band1_ref,    # (3, W*Cin, W*C1) banded conv1 weights (one block per ky)
    b1_ref,       # (1, W*C1)        conv1 bias tiled over w
    band2_ref,    # (3, W*C1, W*C2)
    b2_ref,       # (1, W*C2)
    w1r_ref,      # (H, W*C2, 256)   linear1 weight, per-h row blocks
    lb1_ref,      # (1, 256)
    w2_ref,       # (256, 256)
    lb2_ref,      # (1, 256)
    wh1_ref,      # (256, 256)       [value1 | advantage1] fused
    bh1_ref,      # (1, 256)
    wh2_ref,      # (256, 1+A)       block-diag [value2 ; advantage2] fused
    bh2_ref,      # (1, 1+A)
    q_ref,        # (B, A)           output
    p1_ref,       # scratch ((H+2)*B, W*Cin)   H-padded conv1 input
    p2_ref,       # scratch ((H+2)*B, W*C1)    H-padded conv2 input
):
    HB = x_ref.shape[0]
    H = w1r_ref.shape[0]
    B = HB // H

    # ---- conv1: SAME 3x3 as 3 banded matmuls (W padding is inside the band,
    #      H padding via the zeroed pad rows of the scratch) ----
    wcin = x_ref.shape[1]
    p1_ref[0:B, :] = jnp.zeros((B, wcin), jnp.float32)
    p1_ref[HB + B:HB + 2 * B, :] = jnp.zeros((B, wcin), jnp.float32)
    p1_ref[B:B + HB, :] = x_ref[...]
    y = jnp.dot(p1_ref[0:HB, :], band1_ref[0],
                preferred_element_type=jnp.float32)
    for ky in range(1, 3):
        y += jnp.dot(p1_ref[ky * B:ky * B + HB, :], band1_ref[ky],
                     preferred_element_type=jnp.float32)
    y = jnp.maximum(y + b1_ref[...], 0.0)

    # ---- conv2 (same scheme) ----
    wc1 = band1_ref.shape[2]
    p2_ref[0:B, :] = jnp.zeros((B, wc1), jnp.float32)
    p2_ref[HB + B:HB + 2 * B, :] = jnp.zeros((B, wc1), jnp.float32)
    p2_ref[B:B + HB, :] = y
    z = jnp.dot(p2_ref[0:HB, :], band2_ref[0],
                preferred_element_type=jnp.float32)
    for ky in range(1, 3):
        z += jnp.dot(p2_ref[ky * B:ky * B + HB, :], band2_ref[ky],
                     preferred_element_type=jnp.float32)
    z = jnp.maximum(z + b2_ref[...], 0.0)

    # ---- flatten + linear1: contract the H row-groups against the matching
    #      row-blocks of linear1's weight (no reshape/relayout needed) ----
    h = jnp.dot(z[0:B, :], w1r_ref[0], preferred_element_type=jnp.float32)
    for hh in range(1, H):
        h += jnp.dot(z[hh * B:(hh + 1) * B, :], w1r_ref[hh],
                     preferred_element_type=jnp.float32)
    h = jnp.maximum(h + lb1_ref[...], 0.0)

    # ---- linear2 ----
    h = jnp.maximum(
        jnp.dot(h, w2_ref[...], preferred_element_type=jnp.float32) + lb2_ref[...],
        0.0)

    # ---- dueling heads: both layers fused into single matmuls.
    #      layer-1: [v1 | a1] concat (256,256); layer-2: block-diag (256,1+A).
    hd = jnp.maximum(
        jnp.dot(h, wh1_ref[...], preferred_element_type=jnp.float32) + bh1_ref[...],
        0.0)
    qa = jnp.dot(hd, wh2_ref[...],
                 preferred_element_type=jnp.float32) + bh2_ref[...]
    v = qa[:, 0:1]
    a = qa[:, 1:]
    q_ref[...] = v + (a - jnp.mean(a, axis=1, keepdims=True))


# ----------------------------------------------------------------------------
# One-time host-side weight re-layout (outside the hot path)
# ----------------------------------------------------------------------------
def prepare_params(p, H, W):
    C1 = p["conv1_b"].shape[0]
    C2 = p["conv2_b"].shape[0]
    A = p["a2_w"].shape[1]

    def band(w_hwio):
        # (3, 3, Cin, Cout) -> (3, W*Cin, W*Cout) block-banded weight so the
        # conv along W (with SAME zero padding) is one matmul per ky.
        KH, KW, Cin, Cout = w_hwio.shape
        b = jnp.zeros((KH, W * Cin, W * Cout), jnp.float32)
        for w in range(W):
            for kx in range(KW):
                wp = w + kx - 1                      # input column feeding output w
                if 0 <= wp < W:                      # outside -> zero pad, stays 0
                    b = b.at[:, wp * Cin:(wp + 1) * Cin,
                             w * Cout:(w + 1) * Cout].set(w_hwio[:, kx])
        return b

    # Fused dueling-head layer 2: block-diagonal so one matmul computes
    # [value | advantages].
    nvh = p["v2_w"].shape[0]
    wh2 = jnp.zeros((2 * nvh, 1 + A), jnp.float32)
    wh2 = wh2.at[:nvh, 0:1].set(p["v2_w"])
    wh2 = wh2.at[nvh:, 1:].set(p["a2_w"])

    return dict(
        band1=band(p["conv1_w"]),
        b1t=jnp.tile(p["conv1_b"], W).reshape(1, W * C1),
        band2=band(p["conv2_w"]),
        b2t=jnp.tile(p["conv2_b"], W).reshape(1, W * C2),
        # lin1_w rows are already in (h, w, c) flatten order (see init_params);
        # split into per-h blocks consumed by the in-kernel flatten+linear1.
        w1r=p["lin1_w"].reshape(H, W * C2, p["lin1_w"].shape[1]),
        lb1=p["lin1_b"].reshape(1, -1),
        w2=p["lin2_w"], lb2=p["lin2_b"].reshape(1, -1),
        wh1=jnp.concatenate([p["v1_w"], p["a1_w"]], axis=1),
        bh1=jnp.concatenate([p["v1_b"], p["a1_b"]]).reshape(1, -1),
        wh2=wh2,
        bh2=jnp.concatenate([p["v2_b"], p["a2_b"]]).reshape(1, -1),
    )


# ----------------------------------------------------------------------------
# Forward wrapper: one tiny layout op + one fused pallas_call (no grid)
# ----------------------------------------------------------------------------
def dqn_forward(x_nchw, kp):
    B, Cin, H, W = x_nchw.shape
    A = kp["wh2"].shape[1] - 1
    C1 = kp["b1t"].shape[1] // W
    # NCHW -> rows (h, b), lanes (w, cin).  Single small XLA op; everything
    # else (padding, flatten, transposes) happens inside the kernel / weights.
    x_k = jnp.transpose(x_nchw, (2, 0, 3, 1)).reshape(H * B, W * Cin)
    args = (x_k, kp["band1"], kp["b1t"], kp["band2"], kp["b2t"],
            kp["w1r"], kp["lb1"], kp["w2"], kp["lb2"],
            kp["wh1"], kp["bh1"], kp["wh2"], kp["bh2"])
    return pl.pallas_call(
        dqn_fused_kernel,
        out_shape=jax.ShapeDtypeStruct((B, A), jnp.float32),
        in_specs=[pl.BlockSpec(memory_space=pltpu.MemorySpace.VMEM)] * len(args),
        out_specs=pl.BlockSpec(memory_space=pltpu.MemorySpace.VMEM),
        scratch_shapes=[
            pltpu.VMEM(((H + 2) * B, W * Cin), jnp.float32),
            pltpu.VMEM(((H + 2) * B, W * C1), jnp.float32),
        ],
    )(*args)


# ----------------------------------------------------------------------------
# Deterministic synthetic parameters (mimics module __init__ shapes).
# Conv weights stored HWIO, linear weights stored (in, out) = PyTorch W.T.
# ----------------------------------------------------------------------------
def init_params(key, layers, n_actions, n, m):
    ks = jax.random.split(key, 16)
    f = 32 * n * m

    def kaiming(k, shape, fan_in):
        return jax.random.normal(k, shape, jnp.float32) * jnp.sqrt(2.0 / fan_in)

    def unif(k, shape, fan_in):
        bound = 1.0 / jnp.sqrt(fan_in)
        return jax.random.uniform(k, shape, jnp.float32, -bound, bound)

    return dict(
        conv1_w=kaiming(ks[0], (3, 3, layers, 16), layers * 9),
        conv1_b=unif(ks[1], (16,), layers * 9),
        conv2_w=kaiming(ks[2], (3, 3, 16, 32), 16 * 9),
        conv2_b=unif(ks[3], (32,), 16 * 9),
        # lin1_w rows are in (h, w, c) flatten order.  A real PyTorch
        # checkpoint (columns in (c, h, w) order) would be converted once:
        #   lin1_w = W_pt.T.reshape(32, n, m, 256).transpose(1, 2, 0, 3).reshape(f, 256)
        lin1_w=kaiming(ks[4], (f, 256), f),
        lin1_b=unif(ks[5], (256,), f),
        lin2_w=unif(ks[6], (256, 256), 256),
        lin2_b=unif(ks[7], (256,), 256),
        v1_w=kaiming(ks[8], (256, 128), 256),
        v1_b=unif(ks[9], (128,), 256),
        v2_w=unif(ks[10], (128, 1), 128),
        v2_b=unif(ks[11], (1,), 128),
        a1_w=kaiming(ks[12], (256, 128), 256),
        a1_b=unif(ks[13], (128,), 256),
        a2_w=unif(ks[14], (128, n_actions), 128),
        a2_b=unif(ks[15], (n_actions,), 128),
    )


# Pure-JAX reference of the same forward pass (for correctness check).
def ref_forward(x_nchw, p):
    y = jax.lax.conv_general_dilated(
        jnp.transpose(x_nchw, (0, 2, 3, 1)), p["conv1_w"], (1, 1), "SAME",
        dimension_numbers=("NHWC", "HWIO", "NHWC"))
    y = jax.nn.relu(y + p["conv1_b"])
    y = jax.lax.conv_general_dilated(
        y, p["conv2_w"], (1, 1), "SAME",
        dimension_numbers=("NHWC", "HWIO", "NHWC"))
    y = jax.nn.relu(y + p["conv2_b"])
    B = y.shape[0]
    feat = y.reshape(B, -1)                  # (h, w, c) flatten, matches lin1_w rows
    h = jax.nn.relu(feat @ p["lin1_w"] + p["lin1_b"])
    h = jax.nn.relu(h @ p["lin2_w"] + p["lin2_b"])
    v = jax.nn.relu(h @ p["v1_w"] + p["v1_b"]) @ p["v2_w"] + p["v2_b"]
    a = jax.nn.relu(h @ p["a1_w"] + p["a1_b"]) @ p["a2_w"] + p["a2_b"]
    return v + (a - a.mean(axis=1, keepdims=True))


if __name__ == "__main__":
    # Small shapes consistent with the module: batch=2, layers=4, n=m=8, 6 actions.
    B, LAYERS, N, M, N_ACTIONS = 2, 4, 8, 8, 6
    key = jax.random.PRNGKey(0)
    k_x, k_p = jax.random.split(key)
    x = jax.random.normal(k_x, (B, LAYERS, N, M), jnp.float32)   # NCHW like PyTorch
    params = init_params(k_p, LAYERS, N_ACTIONS, N, M)
    kparams = prepare_params(params, N, M)       # one-time weight re-layout

    q = jax.block_until_ready(jax.jit(dqn_forward)(x, kparams))
    q_ref = jax.block_until_ready(ref_forward(x, params))

    assert q.shape == (B, N_ACTIONS)
    assert jnp.allclose(q, q_ref, atol=5e-3, rtol=5e-3), (q, q_ref)
    print("KERNEL_OK")
</pallas_src>

<mosaic_0001>
module attributes {stable_mosaic.version = 11 : i64} {
  func.func @dqn_fused_kernel(%arg0: memref<16x32xf32, #tpu.memory_space<vmem>>, %arg1: memref<3x32x128xf32, #tpu.memory_space<vmem>>, %arg2: memref<1x128xf32, #tpu.memory_space<vmem>>, %arg3: memref<3x128x256xf32, #tpu.memory_space<vmem>>, %arg4: memref<1x256xf32, #tpu.memory_space<vmem>>, %arg5: memref<8x256x256xf32, #tpu.memory_space<vmem>>, %arg6: memref<1x256xf32, #tpu.memory_space<vmem>>, %arg7: memref<256x256xf32, #tpu.memory_space<vmem>>, %arg8: memref<1x256xf32, #tpu.memory_space<vmem>>, %arg9: memref<256x256xf32, #tpu.memory_space<vmem>>, %arg10: memref<1x256xf32, #tpu.memory_space<vmem>>, %arg11: memref<256x7xf32, #tpu.memory_space<vmem>>, %arg12: memref<1x7xf32, #tpu.memory_space<vmem>>, %arg13: memref<2x6xf32, #tpu.memory_space<vmem>>, %arg14: memref<20x32xf32, #tpu.memory_space<vmem>>, %arg15: memref<20x128xf32, #tpu.memory_space<vmem>>) attributes {dimension_semantics = [], scalar_prefetch = 0 : i64, scratch_operands = 2 : i64, tpu.core_type = #tpu.core_type<tc>} {
    %cst = arith.constant 0.000000e+00 : f32
    %0 = vector.broadcast %cst : f32 to vector<2x32xf32>
    %c0 = arith.constant 0 : index
    %c0_0 = arith.constant 0 : index
    %1 = vector.load %arg14[%c0, %c0_0] : memref<20x32xf32, #tpu.memory_space<vmem>>, vector<2x32xf32>
    tpu.vector_store %arg14[%c0, %c0_0], %0 {strides = array<i32>} : memref<20x32xf32, #tpu.memory_space<vmem>>, vector<2x32xf32>,
    %cst_1 = arith.constant 0.000000e+00 : f32
    %2 = vector.broadcast %cst_1 : f32 to vector<2x32xf32>
    %c18 = arith.constant 18 : index
    %c0_2 = arith.constant 0 : index
    %3 = vector.load %arg14[%c18, %c0_2] : memref<20x32xf32, #tpu.memory_space<vmem>>, vector<2x32xf32>
    tpu.vector_store %arg14[%c18, %c0_2], %2 {strides = array<i32>} : memref<20x32xf32, #tpu.memory_space<vmem>>, vector<2x32xf32>,
    %c0_3 = arith.constant 0 : index
    %c0_4 = arith.constant 0 : index
    %4 = vector.load %arg0[%c0_3, %c0_4] : memref<16x32xf32, #tpu.memory_space<vmem>>, vector<16x32xf32>
    %c2 = arith.constant 2 : index
    %c0_5 = arith.constant 0 : index
    %5 = vector.load %arg14[%c2, %c0_5] : memref<20x32xf32, #tpu.memory_space<vmem>>, vector<16x32xf32>
    tpu.vector_store %arg14[%c2, %c0_5], %4 {strides = array<i32>} : memref<20x32xf32, #tpu.memory_space<vmem>>, vector<16x32xf32>,
    %c0_6 = arith.constant 0 : index
    %c0_7 = arith.constant 0 : index
    %6 = vector.load %arg14[%c0_6, %c0_7] : memref<20x32xf32, #tpu.memory_space<vmem>>, vector<16x32xf32>
    %c0_8 = arith.constant 0 : index
    %c0_9 = arith.constant 0 : index
    %c0_10 = arith.constant 0 : index
    %7 = vector.load %arg1[%c0_8, %c0_9, %c0_10] : memref<3x32x128xf32, #tpu.memory_space<vmem>>, vector<1x32x128xf32>
    %8 = vector.shape_cast %7 : vector<1x32x128xf32> to vector<32x128xf32>
    %cst_11 = arith.constant dense<0.000000e+00> : vector<16x128xf32>
    %9 = tpu.matmul %6, %8, %cst_11 {dimension_numbers = #tpu.dot_dimension_numbers<[1], [0], [0], [1], [0, 0, 1, 1], [], []>} : vector<16x32xf32>, vector<32x128xf32>, vector<16x128xf32> -> vector<16x128xf32>
    %c2_12 = arith.constant 2 : index
    %c0_13 = arith.constant 0 : index
    %10 = vector.load %arg14[%c2_12, %c0_13] : memref<20x32xf32, #tpu.memory_space<vmem>>, vector<16x32xf32>
    %c1 = arith.constant 1 : index
    %c0_14 = arith.constant 0 : index
    %c0_15 = arith.constant 0 : index
    %11 = vector.load %arg1[%c1, %c0_14, %c0_15] : memref<3x32x128xf32, #tpu.memory_space<vmem>>, vector<1x32x128xf32>
    %12 = vector.shape_cast %11 : vector<1x32x128xf32> to vector<32x128xf32>
    %cst_16 = arith.constant dense<0.000000e+00> : vector<16x128xf32>
    %13 = tpu.matmul %10, %12, %cst_16 {dimension_numbers = #tpu.dot_dimension_numbers<[1], [0], [0], [1], [0, 0, 1, 1], [], []>} : vector<16x32xf32>, vector<32x128xf32>, vector<16x128xf32> -> vector<16x128xf32>
    %14 = arith.addf %9, %13 : vector<16x128xf32>
    %c4 = arith.constant 4 : index
    %c0_17 = arith.constant 0 : index
    %15 = vector.load %arg14[%c4, %c0_17] : memref<20x32xf32, #tpu.memory_space<vmem>>, vector<16x32xf32>
    %c2_18 = arith.constant 2 : index
    %c0_19 = arith.constant 0 : index
    %c0_20 = arith.constant 0 : index
    %16 = vector.load %arg1[%c2_18, %c0_19, %c0_20] : memref<3x32x128xf32, #tpu.memory_space<vmem>>, vector<1x32x128xf32>
    %17 = vector.shape_cast %16 : vector<1x32x128xf32> to vector<32x128xf32>
    %cst_21 = arith.constant dense<0.000000e+00> : vector<16x128xf32>
    %18 = tpu.matmul %15, %17, %cst_21 {dimension_numbers = #tpu.dot_dimension_numbers<[1], [0], [0], [1], [0, 0, 1, 1], [], []>} : vector<16x32xf32>, vector<32x128xf32>, vector<16x128xf32> -> vector<16x128xf32>
    %19 = arith.addf %14, %18 : vector<16x128xf32>
    %c0_22 = arith.constant 0 : index
    %c0_23 = arith.constant 0 : index
    %20 = vector.load %arg2[%c0_22, %c0_23] : memref<1x128xf32, #tpu.memory_space<vmem>>, vector<1x128xf32>
    %21 = vector.broadcast %20 : vector<1x128xf32> to vector<16x128xf32>
    %22 = arith.addf %19, %21 : vector<16x128xf32>
    %cst_24 = arith.constant 0.000000e+00 : f32
    %23 = vector.broadcast %cst_24 : f32 to vector<16x128xf32>
    %24 = arith.maximumf %22, %23 : vector<16x128xf32>
    %cst_25 = arith.constant 0.000000e+00 : f32
    %25 = vector.broadcast %cst_25 : f32 to vector<2x128xf32>
    %c0_26 = arith.constant 0 : index
    %c0_27 = arith.constant 0 : index
    %26 = vector.load %arg15[%c0_26, %c0_27] : memref<20x128xf32, #tpu.memory_space<vmem>>, vector<2x128xf32>
    tpu.vector_store %arg15[%c0_26, %c0_27], %25 {strides = array<i32>} : memref<20x128xf32, #tpu.memory_space<vmem>>, vector<2x128xf32>,
    %cst_28 = arith.constant 0.000000e+00 : f32
    %27 = vector.broadcast %cst_28 : f32 to vector<2x128xf32>
    %c18_29 = arith.constant 18 : index
    %c0_30 = arith.constant 0 : index
    %28 = vector.load %arg15[%c18_29, %c0_30] : memref<20x128xf32, #tpu.memory_space<vmem>>, vector<2x128xf32>
    tpu.vector_store %arg15[%c18_29, %c0_30], %27 {strides = array<i32>} : memref<20x128xf32, #tpu.memory_space<vmem>>, vector<2x128xf32>,
    %c2_31 = arith.constant 2 : index
    %c0_32 = arith.constant 0 : index
    %29 = vector.load %arg15[%c2_31, %c0_32] : memref<20x128xf32, #tpu.memory_space<vmem>>, vector<16x128xf32>
    tpu.vector_store %arg15[%c2_31, %c0_32], %24 {strides = array<i32>} : memref<20x128xf32, #tpu.memory_space<vmem>>, vector<16x128xf32>,
    %c0_33 = arith.constant 0 : index
    %c0_34 = arith.constant 0 : index
    %30 = vector.load %arg15[%c0_33, %c0_34] : memref<20x128xf32, #tpu.memory_space<vmem>>, vector<16x128xf32>
    %c0_35 = arith.constant 0 : index
    %c0_36 = arith.constant 0 : index
    %c0_37 = arith.constant 0 : index
    %31 = vector.load %arg3[%c0_35, %c0_36, %c0_37] : memref<3x128x256xf32, #tpu.memory_space<vmem>>, vector<1x128x256xf32>
    %32 = vector.shape_cast %31 : vector<1x128x256xf32> to vector<128x256xf32>
    %cst_38 = arith.constant dense<0.000000e+00> : vector<16x256xf32>
    %33 = tpu.matmul %30, %32, %cst_38 {dimension_numbers = #tpu.dot_dimension_numbers<[1], [0], [0], [1], [0, 0, 1, 1], [], []>} : vector<16x128xf32>, vector<128x256xf32>, vector<16x256xf32> -> vector<16x256xf32>
    %c2_39 = arith.constant 2 : index
    %c0_40 = arith.constant 0 : index
    %34 = vector.load %arg15[%c2_39, %c0_40] : memref<20x128xf32, #tpu.memory_space<vmem>>, vector<16x128xf32>
    %c1_41 = arith.constant 1 : index
    %c0_42 = arith.constant 0 : index
    %c0_43 = arith.constant 0 : index
    %35 = vector.load %arg3[%c1_41, %c0_42, %c0_43] : memref<3x128x256xf32, #tpu.memory_space<vmem>>, vector<1x128x256xf32>
    %36 = vector.shape_cast %35 : vector<1x128x256xf32> to vector<128x256xf32>
    %cst_44 = arith.constant dense<0.000000e+00> : vector<16x256xf32>
    %37 = tpu.matmul %34, %36, %cst_44 {dimension_numbers = #tpu.dot_dimension_numbers<[1], [0], [0], [1], [0, 0, 1, 1], [], []>} : vector<16x128xf32>, vector<128x256xf32>, vector<16x256xf32> -> vector<16x256xf32>
    %38 = arith.addf %33, %37 : vector<16x256xf32>
    %c4_45 = arith.constant 4 : index
    %c0_46 = arith.constant 0 : index
    %39 = vector.load %arg15[%c4_45, %c0_46] : memref<20x128xf32, #tpu.memory_space<vmem>>, vector<16x128xf32>
    %c2_47 = arith.constant 2 : index
    %c0_48 = arith.constant 0 : index
    %c0_49 = arith.constant 0 : index
    %40 = vector.load %arg3[%c2_47, %c0_48, %c0_49] : memref<3x128x256xf32, #tpu.memory_space<vmem>>, vector<1x128x256xf32>
    %41 = vector.shape_cast %40 : vector<1x128x256xf32> to vector<128x256xf32>
    %cst_50 = arith.constant dense<0.000000e+00> : vector<16x256xf32>
    %42 = tpu.matmul %39, %41, %cst_50 {dimension_numbers = #tpu.dot_dimension_numbers<[1], [0], [0], [1], [0, 0, 1, 1], [], []>} : vector<16x128xf32>, vector<128x256xf32>, vector<16x256xf32> -> vector<16x256xf32>
    %43 = arith.addf %38, %42 : vector<16x256xf32>
    %c0_51 = arith.constant 0 : index
    %c0_52 = arith.constant 0 : index
    %44 = vector.load %arg4[%c0_51, %c0_52] : memref<1x256xf32, #tpu.memory_space<vmem>>, vector<1x256xf32>
    %45 = vector.broadcast %44 : vector<1x256xf32> to vector<16x256xf32>
    %46 = arith.addf %43, %45 : vector<16x256xf32>
    %cst_53 = arith.constant 0.000000e+00 : f32
    %47 = vector.broadcast %cst_53 : f32 to vector<16x256xf32>
    %48 = arith.maximumf %46, %47 : vector<16x256xf32>
    %49 = vector.extract_strided_slice %48 {offsets = [0, 0], sizes = [2, 256], strides = [1, 1]} : vector<16x256xf32> to vector<2x256xf32>
    %c0_54 = arith.constant 0 : index
    %c0_55 = arith.constant 0 : index
    %c0_56 = arith.constant 0 : index
    %50 = vector.load %arg5[%c0_54, %c0_55, %c0_56] : memref<8x256x256xf32, #tpu.memory_space<vmem>>, vector<1x256x256xf32>
    %51 = vector.shape_cast %50 : vector<1x256x256xf32> to vector<256x256xf32>
    %cst_57 = arith.constant dense<0.000000e+00> : vector<2x256xf32>
    %52 = tpu.matmul %49, %51, %cst_57 {dimension_numbers = #tpu.dot_dimension_numbers<[1], [0], [0], [1], [0, 0, 1, 1], [], []>} : vector<2x256xf32>, vector<256x256xf32>, vector<2x256xf32> -> vector<2x256xf32>
    %53 = vector.extract_strided_slice %48 {offsets = [2, 0], sizes = [2, 256], strides = [1, 1]} : vector<16x256xf32> to vector<2x256xf32>
    %c1_58 = arith.constant 1 : index
    %c0_59 = arith.constant 0 : index
    %c0_60 = arith.constant 0 : index
    %54 = vector.load %arg5[%c1_58, %c0_59, %c0_60] : memref<8x256x256xf32, #tpu.memory_space<vmem>>, vector<1x256x256xf32>
    %55 = vector.shape_cast %54 : vector<1x256x256xf32> to vector<256x256xf32>
    %cst_61 = arith.constant dense<0.000000e+00> : vector<2x256xf32>
    %56 = tpu.matmul %53, %55, %cst_61 {dimension_numbers = #tpu.dot_dimension_numbers<[1], [0], [0], [1], [0, 0, 1, 1], [], []>} : vector<2x256xf32>, vector<256x256xf32>, vector<2x256xf32> -> vector<2x256xf32>
    %57 = arith.addf %52, %56 : vector<2x256xf32>
    %58 = vector.extract_strided_slice %48 {offsets = [4, 0], sizes = [2, 256], strides = [1, 1]} : vector<16x256xf32> to vector<2x256xf32>
    %c2_62 = arith.constant 2 : index
    %c0_63 = arith.constant 0 : index
    %c0_64 = arith.constant 0 : index
    %59 = vector.load %arg5[%c2_62, %c0_63, %c0_64] : memref<8x256x256xf32, #tpu.memory_space<vmem>>, vector<1x256x256xf32>
    %60 = vector.shape_cast %59 : vector<1x256x256xf32> to vector<256x256xf32>
    %cst_65 = arith.constant dense<0.000000e+00> : vector<2x256xf32>
    %61 = tpu.matmul %58, %60, %cst_65 {dimension_numbers = #tpu.dot_dimension_numbers<[1], [0], [0], [1], [0, 0, 1, 1], [], []>} : vector<2x256xf32>, vector<256x256xf32>, vector<2x256xf32> -> vector<2x256xf32>
    %62 = arith.addf %57, %61 : vector<2x256xf32>
    %63 = vector.extract_strided_slice %48 {offsets = [6, 0], sizes = [2, 256], strides = [1, 1]} : vector<16x256xf32> to vector<2x256xf32>
    %c3 = arith.constant 3 : index
    %c0_66 = arith.constant 0 : index
    %c0_67 = arith.constant 0 : index
    %64 = vector.load %arg5[%c3, %c0_66, %c0_67] : memref<8x256x256xf32, #tpu.memory_space<vmem>>, vector<1x256x256xf32>
    %65 = vector.shape_cast %64 : vector<1x256x256xf32> to vector<256x256xf32>
    %cst_68 = arith.constant dense<0.000000e+00> : vector<2x256xf32>
    %66 = tpu.matmul %63, %65, %cst_68 {dimension_numbers = #tpu.dot_dimension_numbers<[1], [0], [0], [1], [0, 0, 1, 1], [], []>} : vector<2x256xf32>, vector<256x256xf32>, vector<2x256xf32> -> vector<2x256xf32>
    %67 = arith.addf %62, %66 : vector<2x256xf32>
    %68 = vector.extract_strided_slice %48 {offsets = [8, 0], sizes = [2, 256], strides = [1, 1]} : vector<16x256xf32> to vector<2x256xf32>
    %c4_69 = arith.constant 4 : index
    %c0_70 = arith.constant 0 : index
    %c0_71 = arith.constant 0 : index
    %69 = vector.load %arg5[%c4_69, %c0_70, %c0_71] : memref<8x256x256xf32, #tpu.memory_space<vmem>>, vector<1x256x256xf32>
    %70 = vector.shape_cast %69 : vector<1x256x256xf32> to vector<256x256xf32>
    %cst_72 = arith.constant dense<0.000000e+00> : vector<2x256xf32>
    %71 = tpu.matmul %68, %70, %cst_72 {dimension_numbers = #tpu.dot_dimension_numbers<[1], [0], [0], [1], [0, 0, 1, 1], [], []>} : vector<2x256xf32>, vector<256x256xf32>, vector<2x256xf32> -> vector<2x256xf32>
    %72 = arith.addf %67, %71 : vector<2x256xf32>
    %73 = vector.extract_strided_slice %48 {offsets = [10, 0], sizes = [2, 256], strides = [1, 1]} : vector<16x256xf32> to vector<2x256xf32>
    %c5 = arith.constant 5 : index
    %c0_73 = arith.constant 0 : index
    %c0_74 = arith.constant 0 : index
    %74 = vector.load %arg5[%c5, %c0_73, %c0_74] : memref<8x256x256xf32, #tpu.memory_space<vmem>>, vector<1x256x256xf32>
    %75 = vector.shape_cast %74 : vector<1x256x256xf32> to vector<256x256xf32>
    %cst_75 = arith.constant dense<0.000000e+00> : vector<2x256xf32>
    %76 = tpu.matmul %73, %75, %cst_75 {dimension_numbers = #tpu.dot_dimension_numbers<[1], [0], [0], [1], [0, 0, 1, 1], [], []>} : vector<2x256xf32>, vector<256x256xf32>, vector<2x256xf32> -> vector<2x256xf32>
    %77 = arith.addf %72, %76 : vector<2x256xf32>
    %78 = vector.extract_strided_slice %48 {offsets = [12, 0], sizes = [2, 256], strides = [1, 1]} : vector<16x256xf32> to vector<2x256xf32>
    %c6 = arith.constant 6 : index
    %c0_76 = arith.constant 0 : index
    %c0_77 = arith.constant 0 : index
    %79 = vector.load %arg5[%c6, %c0_76, %c0_77] : memref<8x256x256xf32, #tpu.memory_space<vmem>>, vector<1x256x256xf32>
    %80 = vector.shape_cast %79 : vector<1x256x256xf32> to vector<256x256xf32>
    %cst_78 = arith.constant dense<0.000000e+00> : vector<2x256xf32>
    %81 = tpu.matmul %78, %80, %cst_78 {dimension_numbers = #tpu.dot_dimension_numbers<[1], [0], [0], [1], [0, 0, 1, 1], [], []>} : vector<2x256xf32>, vector<256x256xf32>, vector<2x256xf32> -> vector<2x256xf32>
    %82 = arith.addf %77, %81 : vector<2x256xf32>
    %83 = vector.extract_strided_slice %48 {offsets = [14, 0], sizes = [2, 256], strides = [1, 1]} : vector<16x256xf32> to vector<2x256xf32>
    %c7 = arith.constant 7 : index
    %c0_79 = arith.constant 0 : index
    %c0_80 = arith.constant 0 : index
    %84 = vector.load %arg5[%c7, %c0_79, %c0_80] : memref<8x256x256xf32, #tpu.memory_space<vmem>>, vector<1x256x256xf32>
    %85 = vector.shape_cast %84 : vector<1x256x256xf32> to vector<256x256xf32>
    %cst_81 = arith.constant dense<0.000000e+00> : vector<2x256xf32>
    %86 = tpu.matmul %83, %85, %cst_81 {dimension_numbers = #tpu.dot_dimension_numbers<[1], [0], [0], [1], [0, 0, 1, 1], [], []>} : vector<2x256xf32>, vector<256x256xf32>, vector<2x256xf32> -> vector<2x256xf32>
    %87 = arith.addf %82, %86 : vector<2x256xf32>
    %c0_82 = arith.constant 0 : index
    %c0_83 = arith.constant 0 : index
    %88 = vector.load %arg6[%c0_82, %c0_83] : memref<1x256xf32, #tpu.memory_space<vmem>>, vector<1x256xf32>
    %89 = vector.broadcast %88 : vector<1x256xf32> to vector<2x256xf32>
    %90 = arith.addf %87, %89 : vector<2x256xf32>
    %cst_84 = arith.constant 0.000000e+00 : f32
    %91 = vector.broadcast %cst_84 : f32 to vector<2x256xf32>
    %92 = arith.maximumf %90, %91 : vector<2x256xf32>
    %c0_85 = arith.constant 0 : index
    %c0_86 = arith.constant 0 : index
    %93 = vector.load %arg7[%c0_85, %c0_86] : memref<256x256xf32, #tpu.memory_space<vmem>>, vector<256x256xf32>
    %cst_87 = arith.constant dense<0.000000e+00> : vector<2x256xf32>
    %94 = tpu.matmul %92, %93, %cst_87 {dimension_numbers = #tpu.dot_dimension_numbers<[1], [0], [0], [1], [0, 0, 1, 1], [], []>} : vector<2x256xf32>, vector<256x256xf32>, vector<2x256xf32> -> vector<2x256xf32>
    %c0_88 = arith.constant 0 : index
    %c0_89 = arith.constant 0 : index
    %95 = vector.load %arg8[%c0_88, %c0_89] : memref<1x256xf32, #tpu.memory_space<vmem>>, vector<1x256xf32>
    %96 = vector.broadcast %95 : vector<1x256xf32> to vector<2x256xf32>
    %97 = arith.addf %94, %96 : vector<2x256xf32>
    %cst_90 = arith.constant 0.000000e+00 : f32
    %98 = vector.broadcast %cst_90 : f32 to vector<2x256xf32>
    %99 = arith.maximumf %97, %98 : vector<2x256xf32>
    %c0_91 = arith.constant 0 : index
    %c0_92 = arith.constant 0 : index
    %100 = vector.load %arg9[%c0_91, %c0_92] : memref<256x256xf32, #tpu.memory_space<vmem>>, vector<256x256xf32>
    %cst_93 = arith.constant dense<0.000000e+00> : vector<2x256xf32>
    %101 = tpu.matmul %99, %100, %cst_93 {dimension_numbers = #tpu.dot_dimension_numbers<[1], [0], [0], [1], [0, 0, 1, 1], [], []>} : vector<2x256xf32>, vector<256x256xf32>, vector<2x256xf32> -> vector<2x256xf32>
    %c0_94 = arith.constant 0 : index
    %c0_95 = arith.constant 0 : index
    %102 = vector.load %arg10[%c0_94, %c0_95] : memref<1x256xf32, #tpu.memory_space<vmem>>, vector<1x256xf32>
    %103 = vector.broadcast %102 : vector<1x256xf32> to vector<2x256xf32>
    %104 = arith.addf %101, %103 : vector<2x256xf32>
    %cst_96 = arith.constant 0.000000e+00 : f32
    %105 = vector.broadcast %cst_96 : f32 to vector<2x256xf32>
    %106 = arith.maximumf %104, %105 : vector<2x256xf32>
    %c0_97 = arith.constant 0 : index
    %c0_98 = arith.constant 0 : index
    %107 = vector.load %arg11[%c0_97, %c0_98] : memref<256x7xf32, #tpu.memory_space<vmem>>, vector<256x7xf32>
    %cst_99 = arith.constant dense<0.000000e+00> : vector<2x7xf32>
    %108 = tpu.matmul %106, %107, %cst_99 {dimension_numbers = #tpu.dot_dimension_numbers<[1], [0], [0], [1], [0, 0, 1, 1], [], []>} : vector<2x256xf32>, vector<256x7xf32>, vector<2x7xf32> -> vector<2x7xf32>
    %c0_100 = arith.constant 0 : index
    %c0_101 = arith.constant 0 : index
    %109 = vector.load %arg12[%c0_100, %c0_101] : memref<1x7xf32, #tpu.memory_space<vmem>>, vector<1x7xf32>
    %110 = vector.broadcast %109 : vector<1x7xf32> to vector<2x7xf32>
    %111 = arith.addf %108, %110 : vector<2x7xf32>
    %112 = vector.extract_strided_slice %111 {offsets = [0, 0], sizes = [2, 1], strides = [1, 1]} : vector<2x7xf32> to vector<2x1xf32>
    %113 = vector.extract_strided_slice %111 {offsets = [0, 1], sizes = [2, 6], strides = [1, 1]} : vector<2x7xf32> to vector<2x6xf32>
    %cst_102 = arith.constant dense<0.000000e+00> : vector<2xf32>
    %114 = vector.multi_reduction <add>, %113, %cst_102 [1] : vector<2x6xf32> to vector<2xf32>
    %115 = vector.shape_cast %114 : vector<2xf32> to vector<2x1xf32>
    %cst_103 = arith.constant 6.000000e+00 : f32
    %116 = vector.broadcast %cst_103 : f32 to vector<2x1xf32>
    %117 = arith.divf %115, %116 : vector<2x1xf32>
    %118 = vector.broadcast %117 : vector<2x1xf32> to vector<2x6xf32>
    %119 = arith.subf %113, %118 : vector<2x6xf32>
    %120 = vector.broadcast %112 : vector<2x1xf32> to vector<2x6xf32>
    %121 = arith.addf %120, %119 : vector<2x6xf32>
    %c0_104 = arith.constant 0 : index
    %c0_105 = arith.constant 0 : index
    %122 = vector.load %arg13[%c0_104, %c0_105] : memref<2x6xf32, #tpu.memory_space<vmem>>, vector<2x6xf32>
    tpu.vector_store %arg13[%c0_104, %c0_105], %121 {strides = array<i32>} : memref<2x6xf32, #tpu.memory_space<vmem>>, vector<2x6xf32>,
    return
  }
}

</mosaic_0001>

<bundles_post_ra>
// kernel: dqn_forward.1
= control target key start
LH: loop header
LB: loop body
LE: loop exit
PB: predicated region body
PF: predicated region fallthrough
CT: control target
= control target key end

     0   :  { %18 = vsyncpa [#allocation5], 0  ;;  %s2897_s0 = inlined_call_operand.vmem [shape: f32[16,32], index: 0, kind: input, shape index: {}]   ;;  %s2898_s1 = inlined_call_operand.hbm [shape: f32[3,32,128], index: 1, kind: input, shape index: {}]   ;;  %s2899_s2 = inlined_call_operand.hbm [shape: f32[1,128], index: 2, kind: input, shape index: {}]   ;;  %s2900_s3 = inlined_call_operand.hbm [shape: f32[3,128,256], index: 3, kind: input, shape index: {}]   ;;  %s2901_s4 = inlined_call_operand.hbm [shape: f32[1,256], index: 4, kind: input, shape index: {}]   ;;  %s2902_s5 = inlined_call_operand.hbm [shape: f32[8,256,256], index: 5, kind: input, shape index: {}]   ;;  %s2903_s6 = inlined_call_operand.hbm [shape: f32[1,256], index: 6, kind: input, shape index: {}]   ;;  %s2904_s7 = inlined_call_operand.hbm [shape: f32[256,256], index: 7, kind: input, shape index: {}]   ;;  %s2905_s8 = inlined_call_operand.hbm [shape: f32[1,256], index: 8, kind: input, shape index: {}]   ;;  %s2906_s9 = inlined_call_operand.hbm [shape: f32[256,256], index: 9, kind: input, shape index: {}]   ;;  %s2907_s10 = inlined_call_operand.hbm [shape: f32[1,256], index: 10, kind: input, shape index: {}]   ;;  %s2908_s11 = inlined_call_operand.vmem [shape: f32[256,7], index: 11, kind: input, shape index: {}]   ;;  %s2909_s12 = inlined_call_operand.hbm [shape: f32[1,7], index: 12, kind: input, shape index: {}]   ;;  %s2910_s13 = inlined_call_operand.hbm [shape: f32[2,6], index: 13, kind: output, shape index: {}]  }
   0x1   :  { %19 = vsyncpa [#allocation8], 0 }
   0x2   :  { %20 = vsyncpa [#allocation11], 0 }
   0x3   :  { %21 = vsyncpa [#allocation14], 0 }
   0x4   :  { %22 = vsyncpa [#allocation17], 0 }
   0x5   :  { %23 = vsyncpa [#allocation20], 0  ;;  %s45_s27 = sshll.u32 %s2899_s2, 4  ;;  %s46_s27 = int_to_ptr.hbm [resolvable:$true] %s45_s27 }
   0x6   :  { %24 = vsyncpa [#allocation6], 0  ;;  %s2565_s28 = smov [#allocation7]   ;;  %s69_s15 = sshll.u32 %s2901_s4, 4  ;;  %s70_s15 = int_to_ptr.hbm [resolvable:$true] %s69_s15 }
   0x7   :  { %s47_s29 = sshll.u32 %s2565_s28, 4  ;;  %s2566_s16 = smov [#allocation10]   ;;  %s48_s29 = int_to_ptr.vmem [resolvable:$true] %s47_s29 }
   0x8   :  { %50 = dma.hbm_to_vmem [thread:$0]  %s46_s27, 16, %s48_s29, [#allocation8]  }
   0x9   :  { %s71_s17 = sshll.u32 %s2566_s16, 4  ;;  %s93_s20 = sshll.u32 %s2903_s6, 4  ;;  %s72_s17 = int_to_ptr.vmem [resolvable:$true] %s71_s17  ;;  %s94_s20 = int_to_ptr.hbm [resolvable:$true] %s93_s20 }
   0xa   :  { %74 = dma.hbm_to_vmem [thread:$0]  %s70_s15, 32, %s72_s17, [#allocation11]  }
   0xb   :  { %s117_s22 = sshll.u32 %s2905_s8, 4  ;;  %s2567_s23 = smov [#allocation13]   ;;  %s118_s22 = int_to_ptr.hbm [resolvable:$true] %s117_s22 }
   0xc   :  { %s95_s24 = sshll.u32 %s2567_s23, 4  ;;  %s2568_s4 = smov [#allocation16]   ;;  %s96_s24 = int_to_ptr.vmem [resolvable:$true] %s95_s24 }
   0xd   :  { %98 = dma.hbm_to_vmem [thread:$0]  %s94_s20, 32, %s96_s24, [#allocation14]  }
   0xe   :  { %s119_s25 = sshll.u32 %s2568_s4, 4  ;;  %s141_s28 = sshll.u32 %s2907_s10, 4  ;;  %s120_s25 = int_to_ptr.vmem [resolvable:$true] %s119_s25  ;;  %s142_s28 = int_to_ptr.hbm [resolvable:$true] %s141_s28 }
   0xf   :  { %122 = dma.hbm_to_vmem [thread:$0]  %s118_s22, 32, %s120_s25, [#allocation17]  }
  0x10   :  { %s31_s30 = sshll.u32 %s2898_s1, 4  ;;  %s2569_s14 = smov [#allocation19]   ;;  %s32_s30 = int_to_ptr.hbm [resolvable:$true] %s31_s30 }
  0x11   :  { %s143_s8 = sshll.u32 %s2569_s14, 4  ;;  %s2570_s15 = smov [#allocation4]   ;;  %s144_s8 = int_to_ptr.vmem [resolvable:$true] %s143_s8 }
  0x12   :  { %146 = dma.hbm_to_vmem [thread:$0]  %s142_s28, 32, %s144_s8, [#allocation20]  }
  0x13   :  { %s33_s16 = sshll.u32 %s2570_s15, 4  ;;  %s2571_s17 = smov 128   ;;  %s34_s16 = int_to_ptr.vmem [resolvable:$true] %s33_s16 }
  0x14   :  { %s2572_s18 = smov 8   ;;  %s55_s20 = sshll.u32 %s2900_s3, 4  ;;  %s56_s20 = int_to_ptr.hbm [resolvable:$true] %s55_s20 }
  0x15   :  { %39 = dma.hbm_to_vmem [thread:$0]  %s32_s30, 1536, %s34_s16, [#allocation5], %s2571_s17, %s2571_s17, %s2572_s18  }
  0x16   :  { %s2573_s2 = smov [#allocation9]   ;;  %s79_s23 = sshll.u32 %s2902_s5, 4  ;;  %s80_s23 = int_to_ptr.hbm [resolvable:$true] %s79_s23 }
  0x17   :  { %s57_s21 = sshll.u32 %s2573_s2, 4  ;;  %s2574_s24 = smov 256   ;;  %s58_s21 = int_to_ptr.vmem [resolvable:$true] %s57_s21 }
  0x18   :  { %s2575_s4 = smov 16   ;;  %s2576_s25 = smov [#allocation12]  }
  0x19   :  { %63 = dma.hbm_to_vmem [thread:$0]  %s56_s20, 12288, %s58_s21, [#allocation8], %s2574_s24, %s2574_s24, %s2575_s4  }
  0x1a   :  { %s81_s26 = sshll.u32 %s2576_s25, 4  ;;  %s103_s6 = sshll.u32 %s2904_s7, 4  ;;  %s82_s26 = int_to_ptr.vmem [resolvable:$true] %s81_s26  ;;  %s104_s6 = int_to_ptr.hbm [resolvable:$true] %s103_s6 }
  0x1b   :  { %87 = dma.hbm_to_vmem [thread:$0]  %s80_s23, 65536, %s82_s26, [#allocation11], %s2574_s24, %s2574_s24, %s2575_s4  }
  0x1c   :  { %s127_s30 = sshll.u32 %s2906_s9, 4  ;;  %s2577_s14 = smov [#allocation15]   ;;  %s128_s30 = int_to_ptr.hbm [resolvable:$true] %s127_s30 }
  0x1d   :  { %s105_s8 = sshll.u32 %s2577_s14, 4  ;;  %s2578_s5 = smov [#allocation18]   ;;  %s106_s8 = int_to_ptr.vmem [resolvable:$true] %s105_s8 }
  0x1e   :  { %111 = dma.hbm_to_vmem [thread:$0]  %s104_s6, 8192, %s106_s8, [#allocation14], %s2574_s24, %s2574_s24, %s2575_s4  }
  0x1f   :  { %s129_s15 = sshll.u32 %s2578_s5, 4  ;;  %s154_s18 = sshll.u32 %s2909_s12, 4  ;;  %s130_s15 = int_to_ptr.vmem [resolvable:$true] %s129_s15  ;;  %s155_s18 = int_to_ptr.hbm [resolvable:$true] %s154_s18 }
  0x20   :  { %135 = dma.hbm_to_vmem [thread:$0]  %s128_s30, 8192, %s130_s15, [#allocation17], %s2574_s24, %s2574_s24, %s2575_s4  }
  0x21   :  { %s2579_s7 = smov [#allocation21]  }
  0x22   :  { %s156_s19 = sshll.u32 %s2579_s7, 4  ;;  %s157_s19 = int_to_ptr.vmem [resolvable:$true] %s156_s19 }
  0x23   :  { %159 = dma.hbm_to_vmem [thread:$0]  %s155_s18, 16, %s157_s19, [#allocation20]  }
  0x24   :  { %2551 = dma.done.wait [#allocation5], 1536  }
  0x25   :  { %2552 = vsyncadd [#allocation5], 4294965760 }
  0x26   :  { %2553 = dma.done.wait [#allocation8], 12304  }
  0x27   :  { %2554 = vsyncadd [#allocation8], 4294954992 }
  0x28   :  { %2555 = dma.done.wait [#allocation11], 65568  }
  0x29   :  { %2556 = vsyncadd [#allocation11], 4294901728 }
  0x2a   :  { %2557 = dma.done.wait [#allocation14], 8224  }
  0x2b   :  { %2558 = vsyncadd [#allocation14], 4294959072 }
  0x2c   :  { %2559 = dma.done.wait [#allocation17], 8224  }
  0x2d   :  { %2560 = vsyncadd [#allocation17], 4294959072 }
  0x2e   :  { %2561 = dma.done.wait [#allocation20], 48  }
  0x2f   :  { %2562 = vsyncadd [#allocation20], 4294967248  ;;  %vm204_vm0 = vcmask 254976   ;;  %v2580_v0 = vmov 0.0   ;;  %v289_v1 = vld [vmem:[#allocation4 + $0x58] sm:$0xff]  ;;  %v288_v2 = vld [vmem:[#allocation4 + $0x50] sm:$0xff] }
  0x30   :  { %205 = vst.msk [vmem:[#allocation2] sm:$0x3] %vm204_vm0, %v2580_v0  ;;  %v224_v3 = vld [vmem:[#allocation4 + $0x38] sm:$0xff]  ;;  %vm209_vm1 = vcmask 261120   ;;  %308 = vmatpush.msra.mxu2 %v289_v1  ;;  %v223_v5 = vld [vmem:[#allocation4 + $0x30] sm:$0xff]  ;;  %v287_v6 = vld [vmem:[#allocation4 + $0x48] sm:$0xff] }
  0x31   :  { %206 = vst.msk [vmem:[#allocation2 + $0x12] sm:$0x3] %vm204_vm0, %v2580_v0  ;;  %243 = vmatpush.msra.mxu0 %v224_v3  ;;  %v217_v4 = vld [vmem:[#allocation4 + $0x18] sm:$0xff]  ;;  %v216_v7 = vld [vmem:[#allocation4 + $0x10] sm:$0xff]  ;;  %v222_v10 = vld [vmem:[#allocation4 + $0x28] sm:$0xff]  ;;  %vm2186_vm2 = vcmask 41984  }
  0x32   :  { %329 = vst [vmem:[#allocation3] sm:$0x3] %v2580_v0  ;;  %272 = vmatpush.msra.mxu1 %v217_v4  ;;  %v207_v8 = vld [vmem:[%s2897_s0] sm:$0xff]  ;;  %309 = vmatpush.msra.mxu2 %v288_v2  ;;  %v208_v9 = vld [vmem:[%s2897_s0 + $0x8] sm:$0xff]  ;;  %v215_v11 = vld [vmem:[#allocation4 + $0x8] sm:$0xff]  ;;  %s2584_s24 = smov [#allocation22]  }
  0x33   :  { %330 = vst [vmem:[#allocation3 + $0x12] sm:$0x3] %v2580_v0  ;;  %244 = vmatpush.msra.mxu0 %v223_v5  ;;  %v286_v12 = vld [vmem:[#allocation4 + $0x40] sm:$0xff]  ;;  %v400_v14 = vld [vmem:[#allocation9 + $0x1f0] sm:$0xff]  ;;  %v399_v18 = vld [vmem:[#allocation9 + $0x1e8] sm:$0xff]  ;;  %s2214_s4 = sshll.u32 %s2584_s24, 4  ;;  %s2215_s4 = int_to_ptr.vmem [resolvable:$true] %s2214_s4 }
  0x34   :  { %210 = vst.msk [vmem:[#allocation2 + $0x2] sm:$0xff] %vm209_vm1, %v207_v8  ;;  %273 = vmatpush.msra.mxu1 %v216_v7  ;;  %v221_v13 = vld [vmem:[#allocation4 + $0x20] sm:$0xff]  ;;  %310 = vmatpush.msra.mxu2 %v287_v6  ;;  %v396_v19 = vld [vmem:[#allocation9 + $0x1d0] sm:$0xff]  ;;  %v395_v26 = vld [vmem:[#allocation9 + $0x1c8] sm:$0xff]  ;;  %s2216_s27 = sshll.u32 %s2910_s13, 4  ;;  %s2217_s27 = int_to_ptr.hbm [resolvable:$true] %s2216_s27 }
  0x35   :  { %211 = vst.msk [vmem:[#allocation2 + $0xa] sm:$0xff] %vm209_vm1, %v208_v9  ;;  %245 = vmatpush.msra.mxu0 %v222_v10  ;;  %v214_v15 = vld [vmem:[#allocation4] sm:$0xff]  ;;  %402 = vmatpush.msra.mxu3 %v400_v14  ;;  %v365_v23 = vld [vmem:[#allocation9 + $0xf0] sm:$0xff]  ;;  %v364_v30 = vld [vmem:[#allocation9 + $0xe8] sm:$0xff] }
  0x36   :  { %v401_v16 = vld [vmem:[#allocation9 + $0x1f8] sm:$0xff]  ;;  %274 = vmatpush.msra.mxu1 %v215_v11  ;;  %v398_v17 = vld [vmem:[#allocation9 + $0x1e0] sm:$0xff]  ;;  %311 = vmatpush.msra.mxu2 %v286_v12  ;;  %v392_v28 = vld [vmem:[#allocation9 + $0x1b0] sm:$0xff] }
  0x37   :  { %246 = vmatpush.msra.mxu0 %v221_v13  ;;  %403 = vmatpush.msra.mxu3 %v398_v17  ;;  %v397_v20 = vld [vmem:[#allocation9 + $0x1d8] sm:$0xff]  ;;  %v394_v25 = vld [vmem:[#allocation9 + $0x1c0] sm:$0xff]  ;;  %v361_v32 = vld [vmem:[#allocation9 + $0xd0] sm:$0xff] }
  0x38   :  { %275 = vmatpush.msra.mxu1 %v214_v15  ;;  %v366_v27 = vld [vmem:[#allocation9 + $0xf8] sm:$0xff]  ;;  %v363_v29 = vld [vmem:[#allocation9 + $0xe0] sm:$0xff]  ;;  %v391_v38 = vld [vmem:[#allocation9 + $0x1a8] sm:$0xff] }
  0x39   :  { %425 = vmatpush.msrb.mxu0 %v401_v16  ;;  %404 = vmatpush.msra.mxu3 %v396_v19  ;;  %v393_v31 = vld [vmem:[#allocation9 + $0x1b8] sm:$0xff]  ;;  %v390_v33 = vld [vmem:[#allocation9 + $0x1a0] sm:$0xff]  ;;  %v388_v39 = vld [vmem:[#allocation9 + $0x190] sm:$0xff] }
  0x3a   :  { %448 = vmatpush.msrb.mxu1 %v365_v23  ;;  %471 = vmatpush.msrb.mxu2 %v366_v27  ;;  %v362_v34 = vld [vmem:[#allocation9 + $0xd8] sm:$0xff]  ;;  %v359_v40 = vld [vmem:[#allocation9 + $0xc0] sm:$0xff]  ;;  %v360_v42 = vld [vmem:[#allocation9 + $0xc8] sm:$0xff] }
  0x3b   :  { %v218_v21 = vld [vmem:[#allocation2 + $0x2] sm:$0xff]  ;;  %426 = vmatpush.msrb.mxu0 %v399_v18  ;;  %405 = vmatpush.msra.mxu3 %v394_v25  ;;  %v389_v41 = vld [vmem:[#allocation9 + $0x198] sm:$0xff]  ;;  %v386_v43 = vld [vmem:[#allocation9 + $0x180] sm:$0xff] }
  0x3c   :  { %v212_v22 = vld [vmem:[#allocation2] sm:$0xff]  ;;  %2231 = vmatmul.msk.f32.vlgmr.msra.gmra.mxu0 %vm209_vm1, %v218_v21  ;;  %449 = vmatpush.msrb.mxu1 %v363_v29  ;;  %v219_v35 = vld [vmem:[#allocation2 + $0xa] sm:$0xff]  ;;  %v355_v48 = vld [vmem:[#allocation9 + $0xa0] sm:$0xff] }
  0x3d   :  { %v283_v24 = vld [vmem:[#allocation2 + $0x4] sm:$0xff]  ;;  %2233 = vmatmul.msk.f32.vlgmr.msra.gmra.mxu1 %vm209_vm1, %v212_v22  ;;  %427 = vmatpush.msrb.mxu0 %v397_v20  ;;  %v284_v37 = vld [vmem:[#allocation2 + $0xc] sm:$0xff]  ;;  %v387_v44 = vld [vmem:[#allocation9 + $0x188] sm:$0xff] }
  0x3e   :  { %2235 = vmatmul.msk.f32.vlgmr.msra.gmra.mxu2 %vm209_vm1, %v283_v24  ;;  %v213_v36 = vld [vmem:[#allocation2 + $0x8] sm:$0xff]  ;;  %406 = vmatpush.msra.mxu3 %v392_v28  ;;  %v356_v50 = vld [vmem:[#allocation9 + $0xa8] sm:$0xff]  ;;  %v382_v51 = vld [vmem:[#allocation9 + $0x160] sm:$0xff] }
  0x3f   :  { %428 = vmatpush.msrb.mxu0 %v395_v26  ;;  %472 = vmatpush.msrb.mxu2 %v364_v30  ;;  %v357_v45 = vld [vmem:[#allocation9 + $0xb0] sm:$0xff]  ;;  %v358_v46 = vld [vmem:[#allocation9 + $0xb8] sm:$0xff]  ;;  %v383_v53 = vld [vmem:[#allocation9 + $0x168] sm:$0xff] }
  0x40   :  { %450 = vmatpush.msrb.mxu1 %v361_v32  ;;  %407 = vmatpush.msra.mxu3 %v390_v33  ;;  %v384_v47 = vld [vmem:[#allocation9 + $0x170] sm:$0xff]  ;;  %v385_v49 = vld [vmem:[#allocation9 + $0x178] sm:$0xff]  ;;  %v378_v57 = vld [vmem:[#allocation9 + $0x140] sm:$0xff] }
  0x41   :  { %429 = vmatpush.msrb.mxu0 %v393_v31  ;;  %473 = vmatpush.msrb.mxu2 %v362_v34  ;;  %v353_v52 = vld [vmem:[#allocation9 + $0x90] sm:$0xff]  ;;  %v354_v54 = vld [vmem:[#allocation9 + $0x98] sm:$0xff]  ;;  %v379_v58 = vld [vmem:[#allocation9 + $0x148] sm:$0xff] }
  0x42   :  { %408 = vmatpush.msra.mxu3 %v388_v39  ;;  %451 = vmatpush.msrb.mxu1 %v359_v40  ;;  %v380_v55 = vld [vmem:[#allocation9 + $0x150] sm:$0xff]  ;;  %v381_v56 = vld [vmem:[#allocation9 + $0x158] sm:$0xff]  ;;  %v374_v61 = vld [vmem:[#allocation9 + $0x120] sm:$0xff] }
  0x43   :  { %430 = vmatpush.msrb.mxu0 %v391_v38  ;;  %474 = vmatpush.msrb.mxu2 %v360_v42  ;;  %v376_v59 = vld [vmem:[#allocation9 + $0x130] sm:$0xff]  ;;  %v377_v60 = vld [vmem:[#allocation9 + $0x138] sm:$0xff]  ;;  %v375_v62 = vld [vmem:[#allocation9 + $0x128] sm:$0xff] }
  0x44   :  { %2232 = vmatmul.msk.f32.gmra.mxu0 %vm209_vm1, %v219_v35  ;;  %409 = vmatpush.msra.mxu3 %v386_v43  ;;  %v372_v63 = vld [vmem:[#allocation9 + $0x110] sm:$0xff]  ;;  %v373_v0 = vld [vmem:[#allocation9 + $0x118] sm:$0xff]  ;;  %v370_v1 = vld [vmem:[#allocation9 + $0x100] sm:$0xff] }
  0x45   :  { %2234 = vmatmul.msk.f32.gmra.mxu1 %vm209_vm1, %v213_v36  ;;  %431 = vmatpush.msrb.mxu0 %v389_v41  ;;  %v371_v2 = vld [vmem:[#allocation9 + $0x108] sm:$0xff]  ;;  %v527_v3 = vld [vmem:[#allocation9 + $0x2f0] sm:$0xff]  ;;  %v528_v4 = vld [vmem:[#allocation9 + $0x2f8] sm:$0xff] }
  0x46   :  { %2236 = vmatmul.msk.f32.gmra.mxu2 %vm209_vm1, %v284_v37  ;;  %452 = vmatpush.msrb.mxu1 %v357_v45  ;;  %v525_v5 = vld [vmem:[#allocation9 + $0x2e0] sm:$0xff]  ;;  %v526_v6 = vld [vmem:[#allocation9 + $0x2e8] sm:$0xff]  ;;  %v523_v9 = vld [vmem:[#allocation9 + $0x2d0] sm:$0xff] }
  0x47   :  { %432 = vmatpush.msrb.mxu0 %v387_v44  ;;  %475 = vmatpush.msrb.mxu2 %v358_v46  ;;  %v351_v7 = vld [vmem:[#allocation9 + $0x80] sm:$0xff]  ;;  %v352_v8 = vld [vmem:[#allocation9 + $0x88] sm:$0xff]  ;;  %v524_v10 = vld [vmem:[#allocation9 + $0x2d8] sm:$0xff] }
  0x48   :  { %410 = vmatpush.msra.mxu3 %v384_v47  ;;  %453 = vmatpush.msrb.mxu1 %v355_v48  ;;  %v521_v11 = vld [vmem:[#allocation9 + $0x2c0] sm:$0xff]  ;;  %v522_v12 = vld [vmem:[#allocation9 + $0x2c8] sm:$0xff]  ;;  %v349_v13 = vld [vmem:[#allocation9 + $0x70] sm:$0xff] }
  0x49   :  { %433 = vmatpush.msrb.mxu0 %v385_v49  ;;  %476 = vmatpush.msrb.mxu2 %v356_v50  ;;  %v350_v14 = vld [vmem:[#allocation9 + $0x78] sm:$0xff]  ;;  %v519_v15 = vld [vmem:[#allocation9 + $0x2b0] sm:$0xff]  ;;  %v347_v17 = vld [vmem:[#allocation9 + $0x60] sm:$0xff] }
  0x4a   :  { %411 = vmatpush.msra.mxu3 %v382_v51  ;;  %454 = vmatpush.msrb.mxu1 %v353_v52  ;;  %v520_v16 = vld [vmem:[#allocation9 + $0x2b8] sm:$0xff]  ;;  %v348_v18 = vld [vmem:[#allocation9 + $0x68] sm:$0xff]  ;;  %v517_v19 = vld [vmem:[#allocation9 + $0x2a0] sm:$0xff] }
  0x4b   :  { %434 = vmatpush.msrb.mxu0 %v383_v53  ;;  %477 = vmatpush.msrb.mxu2 %v354_v54  ;;  %v518_v20 = vld [vmem:[#allocation9 + $0x2a8] sm:$0xff]  ;;  %v345_v21 = vld [vmem:[#allocation9 + $0x50] sm:$0xff]  ;;  %v346_v22 = vld [vmem:[#allocation9 + $0x58] sm:$0xff] }
  0x4c   :  { %412 = vmatpush.msra.mxu3 %v380_v55  ;;  %455 = vmatpush.msrb.mxu1 %v351_v7  ;;  %v515_v23 = vld [vmem:[#allocation9 + $0x290] sm:$0xff]  ;;  %v516_v24 = vld [vmem:[#allocation9 + $0x298] sm:$0xff]  ;;  %v343_v25 = vld [vmem:[#allocation9 + $0x40] sm:$0xff] }
  0x4d   :  { %435 = vmatpush.msrb.mxu0 %v381_v56  ;;  %478 = vmatpush.msrb.mxu2 %v352_v8  ;;  %v344_v26 = vld [vmem:[#allocation9 + $0x48] sm:$0xff]  ;;  %v513_v27 = vld [vmem:[#allocation9 + $0x280] sm:$0xff]  ;;  %v341_v29 = vld [vmem:[#allocation9 + $0x30] sm:$0xff] }
  0x4e   :  { %413 = vmatpush.msra.mxu3 %v378_v57  ;;  %456 = vmatpush.msrb.mxu1 %v349_v13  ;;  %v514_v28 = vld [vmem:[#allocation9 + $0x288] sm:$0xff]  ;;  %v342_v30 = vld [vmem:[#allocation9 + $0x38] sm:$0xff]  ;;  %v511_v31 = vld [vmem:[#allocation9 + $0x270] sm:$0xff] }
  0x4f   :  { %436 = vmatpush.msrb.mxu0 %v379_v58  ;;  %479 = vmatpush.msrb.mxu2 %v350_v14  ;;  %v512_v32 = vld [vmem:[#allocation9 + $0x278] sm:$0xff]  ;;  %v339_v33 = vld [vmem:[#allocation9 + $0x20] sm:$0xff]  ;;  %v340_v34 = vld [vmem:[#allocation9 + $0x28] sm:$0xff] }
  0x50   :  { %414 = vmatpush.msra.mxu3 %v376_v59  ;;  %457 = vmatpush.msrb.mxu1 %v347_v17  ;;  %v509_v35 = vld [vmem:[#allocation9 + $0x260] sm:$0xff]  ;;  %v510_v36 = vld [vmem:[#allocation9 + $0x268] sm:$0xff]  ;;  %v337_v37 = vld [vmem:[#allocation9 + $0x10] sm:$0xff] }
  0x51   :  { %437 = vmatpush.msrb.mxu0 %v377_v60  ;;  %480 = vmatpush.msrb.mxu2 %v348_v18  ;;  %v338_v38 = vld [vmem:[#allocation9 + $0x18] sm:$0xff]  ;;  %v507_v39 = vld [vmem:[#allocation9 + $0x250] sm:$0xff]  ;;  %v335_v41 = vld [vmem:[#allocation9] sm:$0xff] }
  0x52   :  { %415 = vmatpush.msra.mxu3 %v374_v61  ;;  %458 = vmatpush.msrb.mxu1 %v345_v21  ;;  %v508_v40 = vld [vmem:[#allocation9 + $0x258] sm:$0xff]  ;;  %v336_v42 = vld [vmem:[#allocation9 + $0x8] sm:$0xff]  ;;  %v505_v43 = vld [vmem:[#allocation9 + $0x240] sm:$0xff] }
  0x53   :  { %438 = vmatpush.msrb.mxu0 %v375_v62  ;;  %481 = vmatpush.msrb.mxu2 %v346_v22  ;;  %v506_v44 = vld [vmem:[#allocation9 + $0x248] sm:$0xff]  ;;  %v503_v45 = vld [vmem:[#allocation9 + $0x230] sm:$0xff]  ;;  %v504_v46 = vld [vmem:[#allocation9 + $0x238] sm:$0xff] }
  0x54   :  { %416 = vmatpush.msra.mxu3 %v372_v63  ;;  %459 = vmatpush.msrb.mxu1 %v343_v25  ;;  %v501_v47 = vld [vmem:[#allocation9 + $0x220] sm:$0xff]  ;;  %v502_v48 = vld [vmem:[#allocation9 + $0x228] sm:$0xff]  ;;  %v499_v49 = vld [vmem:[#allocation9 + $0x210] sm:$0xff] }
  0x55   :  { %439 = vmatpush.msrb.mxu0 %v373_v0  ;;  %482 = vmatpush.msrb.mxu2 %v344_v26  ;;  %v500_v50 = vld [vmem:[#allocation9 + $0x218] sm:$0xff]  ;;  %v497_v51 = vld [vmem:[#allocation9 + $0x200] sm:$0xff]  ;;  %v498_v52 = vld [vmem:[#allocation9 + $0x208] sm:$0xff] }
  0x56   :  { %417 = vmatpush.msra.mxu3 %v370_v1  ;;  %460 = vmatpush.msrb.mxu1 %v341_v29  ;;  %v2259_v56 = vld [vmem:[#allocation7] ss:$0 sm:$0xff]  ;;  %v720_v58 = vld [vmem:[#allocation12 + $0x3f0] sm:$0xff]  ;;  %v718_v59 = vld [vmem:[#allocation12 + $0x3e0] sm:$0xff] }
  0x57   :  { %440 = vmatpush.msrb.mxu0 %v371_v2  ;;  %483 = vmatpush.msrb.mxu2 %v342_v30  ;;  %v716_v63 = vld [vmem:[#allocation12 + $0x3d0] sm:$0xff]  ;;  %v686_v2 = vld [vmem:[#allocation12 + $0x2e0] sm:$0xff]  ;;  %v689_v7 = vld [vmem:[#allocation12 + $0x2f8] sm:$0xff] }
  0x58   :  { %529 = vmatpush.msrb.mxu3 %v527_v3  ;;  %461 = vmatpush.msrb.mxu1 %v339_v33  ;;  %v688_v0 = vld [vmem:[#allocation12 + $0x2f0] sm:$0xff]  ;;  %v682_v13 = vld [vmem:[#allocation12 + $0x2c0] sm:$0xff]  ;;  %v685_v17 = vld [vmem:[#allocation12 + $0x2d8] sm:$0xff] }
  0x59   :  { %552 = vmatpush.msra.mxu0 %v528_v4  ;;  %484 = vmatpush.msrb.mxu2 %v340_v34  ;;  %v684_v8 = vld [vmem:[#allocation12 + $0x2d0] sm:$0xff]  ;;  %v683_v25 = vld [vmem:[#allocation12 + $0x2c8] sm:$0xff]  ;;  %v706_v26 = vld [vmem:[#allocation12 + $0x380] sm:$0xff] }
  0x5a   :  { %530 = vmatpush.msrb.mxu3 %v525_v5  ;;  %462 = vmatpush.msrb.mxu1 %v337_v37  ;;  %v721_v5 = vld [vmem:[#allocation12 + $0x3f8] sm:$0xff]  ;;  %v680_v18 = vld [vmem:[#allocation12 + $0x2b0] sm:$0xff]  ;;  %v679_v33 = vld [vmem:[#allocation12 + $0x2a8] sm:$0xff] }
  0x5b   :  { %553 = vmatpush.msra.mxu0 %v526_v6  ;;  %485 = vmatpush.msrb.mxu2 %v338_v38  ;;  %v714_v6 = vld [vmem:[#allocation12 + $0x3c0] sm:$0xff]  ;;  %v708_v21 = vld [vmem:[#allocation12 + $0x390] sm:$0xff]  ;;  %v681_v29 = vld [vmem:[#allocation12 + $0x2b8] sm:$0xff] }
  0x5c   :  { %531 = vmatpush.msrb.mxu3 %v523_v9  ;;  %463 = vmatpush.msrb.mxu1 %v335_v41  ;;  %v719_v9 = vld [vmem:[#allocation12 + $0x3e8] sm:$0xff]  ;;  %v704_v30 = vld [vmem:[#allocation12 + $0x370] sm:$0xff]  ;;  %v702_v34 = vld [vmem:[#allocation12 + $0x360] sm:$0xff] }
  0x5d   :  { %554 = vmatpush.msra.mxu0 %v524_v10  ;;  %486 = vmatpush.msrb.mxu2 %v336_v42  ;;  %v712_v10 = vld [vmem:[#allocation12 + $0x3b0] sm:$0xff]  ;;  %v705_v42 = vld [vmem:[#allocation12 + $0x378] sm:$0xff] }
  0x5e   :  { %532 = vmatpush.msrb.mxu3 %v521_v11  ;;  %728 = vmatpush.msra.mxu1 %v688_v0  ;;  %v672_v41 = vld [vmem:[#allocation12 + $0x270] sm:$0xff] }
  0x5f   :  { %555 = vmatpush.msra.mxu0 %v522_v12  ;;  %748 = vmatpush.msra.mxu2 %v720_v58  ;;  %v687_v12 = vld [vmem:[#allocation12 + $0x2e8] sm:$0xff]  ;;  %v692_v58 = vld [vmem:[#allocation12 + $0x310] sm:$0xff] }
  0x60   :  { %533 = vmatpush.msrb.mxu3 %v519_v15  ;;  %729 = vmatpush.msra.mxu1 %v686_v2  ;;  %v717_v15 = vld [vmem:[#allocation12 + $0x3d8] sm:$0xff]  ;;  %v655_v0 = vld [vmem:[#allocation12 + $0x1f0] sm:$0xff]  ;;  %v662_v2 = vld [vmem:[#allocation12 + $0x220] sm:$0xff] }
  0x61   :  { %556 = vmatpush.msra.mxu0 %v520_v16  ;;  %749 = vmatpush.msra.mxu2 %v718_v59  ;;  %v710_v16 = vld [vmem:[#allocation12 + $0x3a0] sm:$0xff]  ;;  %v667_v59 = vld [vmem:[#allocation12 + $0x248] sm:$0xff] }
  0x62   :  { %534 = vmatpush.msrb.mxu3 %v517_v19  ;;  %730 = vmatpush.msra.mxu1 %v684_v8  ;;  %v661_v8 = vld [vmem:[#allocation12 + $0x218] sm:$0xff] }
  0x63   :  { %557 = vmatpush.msra.mxu0 %v518_v20  ;;  %750 = vmatpush.msra.mxu2 %v716_v63  ;;  %v715_v20 = vld [vmem:[#allocation12 + $0x3c8] sm:$0xff]  ;;  %v665_v63 = vld [vmem:[#allocation12 + $0x238] sm:$0xff] }
  0x64   :  { %535 = vmatpush.msrb.mxu3 %v515_v23  ;;  %731 = vmatpush.msra.mxu1 %v682_v13  ;;  %v652_v13 = vld [vmem:[#allocation12 + $0x1d8] sm:$0xff] }
  0x65   :  { %558 = vmatpush.msra.mxu0 %v516_v24  ;;  %751 = vmatpush.msra.mxu2 %v714_v6  ;;  %v713_v24 = vld [vmem:[#allocation12 + $0x3b8] sm:$0xff]  ;;  %v660_v6 = vld [vmem:[#allocation12 + $0x210] sm:$0xff] }
  0x66   :  { %536 = vmatpush.msrb.mxu3 %v513_v27  ;;  %732 = vmatpush.msra.mxu1 %v680_v18  ;;  %v678_v27 = vld [vmem:[#allocation12 + $0x2a0] sm:$0xff] }
  0x67   :  { %559 = vmatpush.msra.mxu0 %v514_v28  ;;  %752 = vmatpush.msra.mxu2 %v712_v10  ;;  %v711_v28 = vld [vmem:[#allocation12 + $0x3a8] sm:$0xff]  ;;  %v658_v10 = vld [vmem:[#allocation12 + $0x200] sm:$0xff] }
  0x68   :  { %537 = vmatpush.msrb.mxu3 %v511_v31  ;;  %v676_v31 = vld [vmem:[#allocation12 + $0x290] sm:$0xff]  ;;  %733 = vmatpush.msra.mxu1 %v678_v27  ;;  %v621_v18 = vld [vmem:[#allocation12 + $0xe0] sm:$0xff] }
  0x69   :  { %560 = vmatpush.msra.mxu0 %v512_v32  ;;  %753 = vmatpush.msra.mxu2 %v710_v16  ;;  %v709_v32 = vld [vmem:[#allocation12 + $0x398] sm:$0xff]  ;;  %v643_v27 = vld [vmem:[#allocation12 + $0x190] sm:$0xff] }
  0x6a   :  { %538 = vmatpush.msrb.mxu3 %v509_v35  ;;  %v674_v35 = vld [vmem:[#allocation12 + $0x280] sm:$0xff]  ;;  %734 = vmatpush.msra.mxu1 %v676_v31  ;;  %v624_v16 = vld [vmem:[#allocation12 + $0xf8] sm:$0xff] }
  0x6b   :  { %561 = vmatpush.msra.mxu0 %v510_v36  ;;  %754 = vmatpush.msra.mxu2 %v708_v21  ;;  %v707_v36 = vld [vmem:[#allocation12 + $0x388] sm:$0xff]  ;;  %v648_v21 = vld [vmem:[#allocation12 + $0x1b8] sm:$0xff]  ;;  %v641_v31 = vld [vmem:[#allocation12 + $0x180] sm:$0xff] }
  0x6c   :  { %539 = vmatpush.msrb.mxu3 %v507_v39  ;;  %v677_v39 = vld [vmem:[#allocation12 + $0x298] sm:$0xff]  ;;  %735 = vmatpush.msra.mxu1 %v674_v35  ;;  %v639_v35 = vld [vmem:[#allocation12 + $0x170] sm:$0xff] }
  0x6d   :  { %562 = vmatpush.msra.mxu0 %v508_v40  ;;  %755 = vmatpush.msra.mxu2 %v706_v26  ;;  %v700_v40 = vld [vmem:[#allocation12 + $0x350] sm:$0xff]  ;;  %v617_v26 = vld [vmem:[#allocation12 + $0xc0] sm:$0xff] }
  0x6e   :  { %540 = vmatpush.msrb.mxu3 %v505_v43  ;;  %v675_v43 = vld [vmem:[#allocation12 + $0x288] sm:$0xff]  ;;  %736 = vmatpush.msra.mxu1 %v672_v41 }
  0x6f   :  { %563 = vmatpush.msra.mxu0 %v506_v44  ;;  %756 = vmatpush.msra.mxu2 %v704_v30  ;;  %v698_v44 = vld [vmem:[#allocation12 + $0x340] sm:$0xff]  ;;  %v615_v30 = vld [vmem:[#allocation12 + $0xb0] sm:$0xff]  ;;  %v638_v41 = vld [vmem:[#allocation12 + $0x168] sm:$0xff] }
  0x70   :  { %541 = vmatpush.msrb.mxu3 %v503_v45  ;;  %v670_v45 = vld [vmem:[#allocation12 + $0x260] sm:$0xff] }
  0x71   :  { %564 = vmatpush.msra.mxu0 %v504_v46  ;;  %757 = vmatpush.msra.mxu2 %v702_v34  ;;  %v703_v46 = vld [vmem:[#allocation12 + $0x368] sm:$0xff]  ;;  %v613_v34 = vld [vmem:[#allocation12 + $0xa0] sm:$0xff] }
  0x72   :  { %542 = vmatpush.msrb.mxu3 %v501_v47  ;;  %v673_v47 = vld [vmem:[#allocation12 + $0x278] sm:$0xff]  ;;  %737 = vmatpush.msra.mxu1 %v670_v45 }
  0x73   :  { %565 = vmatpush.msra.mxu0 %v502_v48  ;;  %758 = vmatpush.msra.mxu2 %v700_v40  ;;  %v696_v48 = vld [vmem:[#allocation12 + $0x330] sm:$0xff]  ;;  %v612_v40 = vld [vmem:[#allocation12 + $0x98] sm:$0xff] }
  0x74   :  { %543 = vmatpush.msrb.mxu3 %v499_v49  ;;  %v668_v49 = vld [vmem:[#allocation12 + $0x250] sm:$0xff]  ;;  %v636_v45 = vld [vmem:[#allocation12 + $0x158] sm:$0xff] }
  0x75   :  { %566 = vmatpush.msra.mxu0 %v500_v50  ;;  %v701_v50 = vld [vmem:[#allocation12 + $0x358] sm:$0xff]  ;;  %759 = vmatpush.msra.mxu2 %v698_v44  ;;  %v610_v44 = vld [vmem:[#allocation12 + $0x88] sm:$0xff] }
  0x76   :  { %544 = vmatpush.msrb.mxu3 %v497_v51  ;;  %v671_v51 = vld [vmem:[#allocation12 + $0x268] sm:$0xff]  ;;  %738 = vmatpush.msra.mxu1 %v668_v49 }
  0x77   :  { %567 = vmatpush.msra.mxu0 %v498_v52  ;;  %v699_v52 = vld [vmem:[#allocation12 + $0x348] sm:$0xff]  ;;  %760 = vmatpush.msra.mxu2 %v696_v48  ;;  %v608_v48 = vld [vmem:[#allocation12 + $0x78] sm:$0xff] }
  0x78   :  { %v634_v49 = vld [vmem:[#allocation12 + $0x148] sm:$0xff] }
  0xb9   :  { %v248_v53 = vpop.f32.mrf.mxu0 }
  0xba   :  { %v277_v54 = vpop.f32.mrf.mxu1 }
  0xbb   :  { %v278_v55 = vadd.f32 %v277_v54, %v248_v53  ;;  %v694_v53 = vld [vmem:[#allocation12 + $0x320] sm:$0xff] }
  0xbc   :  { %761 = vmatpush.msra.mxu2 %v694_v53  ;;  %v632_v53 = vld [vmem:[#allocation12 + $0x138] sm:$0xff] }
  0xbe   :  { %762 = vmatpush.msra.mxu2 %v692_v58  ;;  %v601_v58 = vld [vmem:[#allocation12 + $0x40] sm:$0xff] }
  0xc1   :  { %v313_v57 = vpop.f32.mrf.mxu2  ;;  %v251_v61 = vpop.f32.mrf.mxu0 }
  0xc2   :  { %v319_v60 = vadd.f32 %v313_v57, %v278_v55  ;;  %v280_v62 = vpop.f32.mrf.mxu1  ;;  %v669_v55 = vld [vmem:[#allocation12 + $0x258] sm:$0xff] }
  0xc3   :  { %v281_v4 = vadd.f32 %v280_v62, %v251_v61  ;;  %v697_v57 = vld [vmem:[#allocation12 + $0x338] sm:$0xff]  ;;  %v695_v61 = vld [vmem:[#allocation12 + $0x328] sm:$0xff]  ;;  %v690_v62 = vld [vmem:[#allocation12 + $0x300] sm:$0xff] }
  0xc4   :  { %v325_v1 = vadd.f32 %v2259_v56, %v319_v60  ;;  %v664_v60 = vld [vmem:[#allocation12 + $0x230] sm:$0xff]  ;;  %763 = vmatpush.msra.mxu2 %v690_v62 }
  0xc5   :  { %v599_v62 = vld [vmem:[#allocation12 + $0x30] sm:$0xff] }
  0xc6   :  { %v327_v3 = vmax.f32 %v325_v1, 0.0  ;;  %v693_v1 = vld [vmem:[#allocation12 + $0x318] sm:$0xff] }
  0xc8   :  { %331 = vst [vmem:[#allocation3 + $0x2] sm:$0xff] %v327_v3  ;;  %418 = vmatmul.f32.vlgmr.msra.gmra.mxu3 %v327_v3  ;;  %441 = vmatmul.f32.vlgmr.msrb.gmra.mxu0 %v327_v3  ;;  %v663_v3 = vld [vmem:[#allocation12 + $0x228] sm:$0xff] }
  0xc9   :  { %v316_v11 = vpop.f32.mrf.mxu2  ;;  %788 = vmatpush.msrb.mxu0 %v721_v5  ;;  %768 = vmatpush.msra.mxu3 %v689_v7  ;;  %v691_v5 = vld [vmem:[#allocation12 + $0x308] sm:$0xff]  ;;  %v656_v7 = vld [vmem:[#allocation12 + $0x1f8] sm:$0xff] }
  0xca   :  { %v320_v14 = vadd.f32 %v316_v11, %v281_v4  ;;  %v653_v4 = vld [vmem:[#allocation12 + $0x1e0] sm:$0xff]  ;;  %v654_v11 = vld [vmem:[#allocation12 + $0x1e8] sm:$0xff] }
  0xcb   :  { %789 = vmatpush.msrb.mxu0 %v719_v9  ;;  %769 = vmatpush.msra.mxu3 %v687_v12  ;;  %v651_v9 = vld [vmem:[#allocation12 + $0x1d0] sm:$0xff]  ;;  %v659_v12 = vld [vmem:[#allocation12 + $0x208] sm:$0xff] }
  0xcc   :  { %v326_v19 = vadd.f32 %v2259_v56, %v320_v14  ;;  %v666_v56 = vld [vmem:[#allocation12 + $0x240] sm:$0xff]  ;;  %v623_v14 = vld [vmem:[#allocation12 + $0xf0] sm:$0xff] }
  0xcd   :  { %790 = vmatpush.msrb.mxu0 %v717_v15  ;;  %770 = vmatpush.msra.mxu3 %v685_v17  ;;  %v649_v15 = vld [vmem:[#allocation12 + $0x1c0] sm:$0xff]  ;;  %v650_v17 = vld [vmem:[#allocation12 + $0x1c8] sm:$0xff] }
  0xce   :  { %v328_v22 = vmax.f32 %v326_v19, 0.0  ;;  %739 = vmatpush.msra.mxu1 %v666_v56  ;;  %v647_v19 = vld [vmem:[#allocation12 + $0x1b0] sm:$0xff]  ;;  %v604_v56 = vld [vmem:[#allocation12 + $0x58] sm:$0xff] }
  0xcf   :  { %v333_v23 = vld [vmem:[#allocation3] sm:$0xff]  ;;  %791 = vmatpush.msrb.mxu0 %v715_v20  ;;  %771 = vmatpush.msra.mxu3 %v683_v25 }
  0xd0   :  { %332 = vst [vmem:[#allocation3 + $0xa] sm:$0xff] %v328_v22  ;;  %464 = vmatmul.f32.vlgmr.msrb.gmra.mxu1 %v333_v23  ;;  %487 = vmatmul.f32.vlgmr.msrb.gmra.mxu2 %v333_v23  ;;  %v622_v20 = vld [vmem:[#allocation12 + $0xe8] sm:$0xff]  ;;  %v645_v23 = vld [vmem:[#allocation12 + $0x1a0] sm:$0xff] }
  0xd1   :  { %421 = vmatmul.f32.gmra.mxu3 %v328_v22  ;;  %444 = vmatmul.f32.gmra.mxu0 %v328_v22  ;;  %v619_v22 = vld [vmem:[#allocation12 + $0xd0] sm:$0xff]  ;;  %v646_v25 = vld [vmem:[#allocation12 + $0x1a8] sm:$0xff] }
  0xd2   :  { %792 = vmatpush.msrb.mxu0 %v713_v24  ;;  %772 = vmatpush.msra.mxu3 %v681_v29  ;;  %v620_v24 = vld [vmem:[#allocation12 + $0xd8] sm:$0xff] }
  0xd3   :  { %740 = vmatpush.msra.mxu1 %v664_v60  ;;  %828 = vmatpush.msrb.mxu2 %v655_v0  ;;  %v644_v29 = vld [vmem:[#allocation12 + $0x198] sm:$0xff]  ;;  %v602_v60 = vld [vmem:[#allocation12 + $0x48] sm:$0xff] }
  0xd4   :  { %793 = vmatpush.msrb.mxu0 %v711_v28  ;;  %773 = vmatpush.msra.mxu3 %v679_v33  ;;  %v618_v28 = vld [vmem:[#allocation12 + $0xc8] sm:$0xff]  ;;  %v600_v0 = vld [vmem:[#allocation12 + $0x38] sm:$0xff] }
  0xd5   :  { %741 = vmatpush.msra.mxu1 %v662_v2  ;;  %829 = vmatpush.msrb.mxu2 %v653_v4  ;;  %v642_v33 = vld [vmem:[#allocation12 + $0x188] sm:$0xff]  ;;  %v597_v2 = vld [vmem:[#allocation12 + $0x20] sm:$0xff]  ;;  %v595_v4 = vld [vmem:[#allocation12 + $0x10] sm:$0xff] }
  0xd6   :  { %794 = vmatpush.msrb.mxu0 %v709_v32  ;;  %774 = vmatpush.msra.mxu3 %v677_v39  ;;  %v616_v32 = vld [vmem:[#allocation12 + $0xb8] sm:$0xff]  ;;  %v637_v39 = vld [vmem:[#allocation12 + $0x160] sm:$0xff] }
  0xd7   :  { %v334_v37 = vld [vmem:[#allocation3 + $0x8] sm:$0xff]  ;;  %742 = vmatpush.msra.mxu1 %v660_v6  ;;  %830 = vmatpush.msrb.mxu2 %v651_v9  ;;  %v593_v6 = vld [vmem:[#allocation12] sm:$0xff] }
  0xd8   :  { %v494_v38 = vld [vmem:[#allocation3 + $0x4] sm:$0xff]  ;;  %467 = vmatmul.f32.gmra.mxu1 %v334_v37  ;;  %490 = vmatmul.f32.gmra.mxu2 %v334_v37  ;;  %v495_v54 = vld [vmem:[#allocation3 + $0xc] sm:$0xff]  ;;  %v640_v37 = vld [vmem:[#allocation12 + $0x178] sm:$0xff] }
  0xd9   :  { %545 = vmatmul.f32.vlgmr.msrb.gmra.mxu3 %v494_v38  ;;  %568 = vmatmul.f32.vlgmr.msra.gmra.mxu0 %v494_v38  ;;  %v611_v38 = vld [vmem:[#allocation12 + $0x90] sm:$0xff] }
  0xda   :  { %795 = vmatpush.msrb.mxu0 %v707_v36  ;;  %775 = vmatpush.msra.mxu3 %v675_v43  ;;  %v614_v36 = vld [vmem:[#allocation12 + $0xa8] sm:$0xff]  ;;  %v635_v43 = vld [vmem:[#allocation12 + $0x150] sm:$0xff] }
  0xdb   :  { %743 = vmatpush.msra.mxu1 %v658_v10  ;;  %831 = vmatpush.msrb.mxu2 %v649_v15 }
  0xdc   :  { %796 = vmatpush.msrb.mxu0 %v705_v42  ;;  %776 = vmatpush.msra.mxu3 %v673_v47  ;;  %v609_v42 = vld [vmem:[#allocation12 + $0x80] sm:$0xff] }
  0xdd   :  { %808 = vmatpush.msrb.mxu1 %v623_v14  ;;  %832 = vmatpush.msrb.mxu2 %v647_v19  ;;  %v633_v47 = vld [vmem:[#allocation12 + $0x140] sm:$0xff] }
  0xde   :  { %797 = vmatpush.msrb.mxu0 %v703_v46  ;;  %777 = vmatpush.msra.mxu3 %v671_v51  ;;  %v607_v46 = vld [vmem:[#allocation12 + $0x70] sm:$0xff] }
  0xdf   :  { %809 = vmatpush.msrb.mxu1 %v621_v18  ;;  %833 = vmatpush.msrb.mxu2 %v645_v23  ;;  %v631_v51 = vld [vmem:[#allocation12 + $0x130] sm:$0xff] }
  0xe0   :  { %798 = vmatpush.msrb.mxu0 %v701_v50  ;;  %778 = vmatpush.msra.mxu3 %v669_v55  ;;  %v605_v50 = vld [vmem:[#allocation12 + $0x60] sm:$0xff] }
  0xe1   :  { %548 = vmatmul.f32.gmra.mxu3 %v495_v54  ;;  %571 = vmatmul.f32.gmra.mxu0 %v495_v54  ;;  %v603_v54 = vld [vmem:[#allocation12 + $0x50] sm:$0xff]  ;;  %v629_v55 = vld [vmem:[#allocation12 + $0x120] sm:$0xff] }
  0xe2   :  { %799 = vmatpush.msrb.mxu0 %v699_v52  ;;  %779 = vmatpush.msra.mxu3 %v667_v59  ;;  %v606_v52 = vld [vmem:[#allocation12 + $0x68] sm:$0xff]  ;;  %v627_v59 = vld [vmem:[#allocation12 + $0x110] sm:$0xff] }
  0xe3   :  { %810 = vmatpush.msrb.mxu1 %v619_v22  ;;  %834 = vmatpush.msrb.mxu2 %v643_v27 }
  0xe4   :  { %800 = vmatpush.msrb.mxu0 %v697_v57  ;;  %780 = vmatpush.msra.mxu3 %v665_v63  ;;  %v630_v57 = vld [vmem:[#allocation12 + $0x128] sm:$0xff]  ;;  %v625_v63 = vld [vmem:[#allocation12 + $0x100] sm:$0xff] }
  0xe5   :  { %811 = vmatpush.msrb.mxu1 %v617_v26  ;;  %835 = vmatpush.msrb.mxu2 %v641_v31 }
  0xe6   :  { %801 = vmatpush.msrb.mxu0 %v695_v61  ;;  %781 = vmatpush.msra.mxu3 %v663_v3  ;;  %v628_v61 = vld [vmem:[#allocation12 + $0x118] sm:$0xff]  ;;  %v598_v3 = vld [vmem:[#allocation12 + $0x28] sm:$0xff] }
  0xe7   :  { %812 = vmatpush.msrb.mxu1 %v615_v30  ;;  %836 = vmatpush.msrb.mxu2 %v639_v35 }
  0xe8   :  { %802 = vmatpush.msrb.mxu0 %v693_v1  ;;  %782 = vmatpush.msra.mxu3 %v661_v8  ;;  %v626_v1 = vld [vmem:[#allocation12 + $0x108] sm:$0xff] }
  0xe9   :  { %813 = vmatpush.msrb.mxu1 %v613_v34  ;;  %837 = vmatpush.msrb.mxu2 %v637_v39  ;;  %v950_v34 = vld [vmem:[#allocation12 + $0x5e8] sm:$0xff]  ;;  %v948_v39 = vld [vmem:[#allocation12 + $0x5d8] sm:$0xff] }
  0xea   :  { %803 = vmatpush.msrb.mxu0 %v691_v5  ;;  %783 = vmatpush.msra.mxu3 %v659_v12  ;;  %v596_v5 = vld [vmem:[#allocation12 + $0x18] sm:$0xff] }
  0xeb   :  { %814 = vmatpush.msrb.mxu1 %v611_v38  ;;  %838 = vmatpush.msrb.mxu2 %v635_v43  ;;  %v947_v38 = vld [vmem:[#allocation12 + $0x5d0] sm:$0xff]  ;;  %v945_v43 = vld [vmem:[#allocation12 + $0x5c0] sm:$0xff] }
  0xec   :  { %868 = vmatpush.msra.mxu0 %v656_v7  ;;  %848 = vmatpush.msrb.mxu3 %v624_v16  ;;  %v594_v7 = vld [vmem:[#allocation12 + $0x8] sm:$0xff] }
  0xed   :  { %815 = vmatpush.msrb.mxu1 %v609_v42  ;;  %839 = vmatpush.msrb.mxu2 %v633_v47  ;;  %v919_v42 = vld [vmem:[#allocation12 + $0x4f0] sm:$0xff] }
  0xee   :  { %869 = vmatpush.msra.mxu0 %v654_v11  ;;  %849 = vmatpush.msrb.mxu3 %v622_v20  ;;  %v579_v11 = vld [vmem:[#allocation10] sm:$0x3] }
  0xef   :  { %816 = vmatpush.msrb.mxu1 %v607_v46  ;;  %840 = vmatpush.msrb.mxu2 %v631_v51  ;;  %v582_v15 = vperm.slane %v579_v11, 1  ;;  %v581_v23 = vperm.slane %v579_v11, 0  ;;  %v946_v46 = vld [vmem:[#allocation12 + $0x5c8] sm:$0xff] }
  0xf0   :  { %870 = vmatpush.msra.mxu0 %v652_v13  ;;  %850 = vmatpush.msrb.mxu3 %v620_v24  ;;  %v918_v51 = vld [vmem:[#allocation12 + $0x4e8] sm:$0xff] }
  0xf1   :  { %817 = vmatpush.msrb.mxu1 %v605_v50  ;;  %841 = vmatpush.msrb.mxu2 %v629_v55  ;;  %v916_v55 = vld [vmem:[#allocation12 + $0x4d8] sm:$0xff]  ;;  %v906_v11 = vld [vmem:[#allocation12 + $0x488] sm:$0xff] }
  0xf2   :  { %871 = vmatpush.msra.mxu0 %v650_v17  ;;  %851 = vmatpush.msrb.mxu3 %v618_v28  ;;  %v951_v28 = vld [vmem:[#allocation12 + $0x5f0] sm:$0xff] }
  0xf3   :  { %818 = vmatpush.msrb.mxu1 %v603_v54  ;;  %842 = vmatpush.msrb.mxu2 %v627_v59  ;;  %v941_v54 = vld [vmem:[#allocation12 + $0x5a0] sm:$0xff]  ;;  %v914_v59 = vld [vmem:[#allocation12 + $0x4c8] sm:$0xff] }
  0xf4   :  { %872 = vmatpush.msra.mxu0 %v648_v21  ;;  %852 = vmatpush.msrb.mxu3 %v616_v32 }
  0xf5   :  { %819 = vmatpush.msrb.mxu1 %v601_v58  ;;  %843 = vmatpush.msrb.mxu2 %v625_v63  ;;  %v939_v58 = vld [vmem:[#allocation12 + $0x590] sm:$0xff]  ;;  %v912_v63 = vld [vmem:[#allocation12 + $0x4b8] sm:$0xff] }
  0xf6   :  { %873 = vmatpush.msra.mxu0 %v646_v25  ;;  %853 = vmatpush.msrb.mxu3 %v614_v36 }
  0xf7   :  { %820 = vmatpush.msrb.mxu1 %v599_v62  ;;  %v937_v62 = vld [vmem:[#allocation12 + $0x580] sm:$0xff] }
  0xf8   :  { %874 = vmatpush.msra.mxu0 %v644_v29  ;;  %854 = vmatpush.msrb.mxu3 %v612_v40  ;;  %v952_v29 = vld [vmem:[#allocation12 + $0x5f8] sm:$0xff] }
  0xf9   :  { %821 = vmatpush.msrb.mxu1 %v597_v2  ;;  %v935_v2 = vld [vmem:[#allocation12 + $0x570] sm:$0xff] }
  0xfa   :  { %875 = vmatpush.msra.mxu0 %v642_v33  ;;  %855 = vmatpush.msrb.mxu3 %v610_v44  ;;  %v949_v33 = vld [vmem:[#allocation12 + $0x5e0] sm:$0xff] }
  0xfb   :  { %822 = vmatpush.msrb.mxu1 %v595_v4  ;;  %v936_v4 = vld [vmem:[#allocation12 + $0x578] sm:$0xff] }
  0xfc   :  { %876 = vmatpush.msra.mxu0 %v640_v37  ;;  %856 = vmatpush.msrb.mxu3 %v608_v48  ;;  %v917_v48 = vld [vmem:[#allocation12 + $0x4e0] sm:$0xff] }
  0xfd   :  { %823 = vmatpush.msrb.mxu1 %v593_v6  ;;  %v933_v6 = vld [vmem:[#allocation12 + $0x560] sm:$0xff] }
  0xfe   :  { %877 = vmatpush.msra.mxu0 %v638_v41  ;;  %857 = vmatpush.msrb.mxu3 %v606_v52  ;;  %v944_v52 = vld [vmem:[#allocation12 + $0x5b8] sm:$0xff] }
 0x100   :  { %878 = vmatpush.msra.mxu0 %v636_v45  ;;  %858 = vmatpush.msrb.mxu3 %v604_v56  ;;  %v920_v45 = vld [vmem:[#allocation12 + $0x4f8] sm:$0xff]  ;;  %v942_v56 = vld [vmem:[#allocation12 + $0x5a8] sm:$0xff] }
 0x102   :  { %879 = vmatpush.msra.mxu0 %v634_v49  ;;  %859 = vmatpush.msrb.mxu3 %v602_v60  ;;  %v943_v49 = vld [vmem:[#allocation12 + $0x5b0] sm:$0xff]  ;;  %v940_v60 = vld [vmem:[#allocation12 + $0x598] sm:$0xff] }
 0x104   :  { %880 = vmatpush.msra.mxu0 %v632_v53  ;;  %860 = vmatpush.msrb.mxu3 %v600_v0  ;;  %v915_v53 = vld [vmem:[#allocation12 + $0x4d0] sm:$0xff]  ;;  %v938_v0 = vld [vmem:[#allocation12 + $0x588] sm:$0xff] }
 0x106   :  { %881 = vmatpush.msra.mxu0 %v630_v57  ;;  %861 = vmatpush.msrb.mxu3 %v598_v3  ;;  %v913_v57 = vld [vmem:[#allocation12 + $0x4c0] sm:$0xff]  ;;  %v910_v3 = vld [vmem:[#allocation12 + $0x4a8] sm:$0xff] }
 0x108   :  { %882 = vmatpush.msra.mxu0 %v628_v61  ;;  %862 = vmatpush.msrb.mxu3 %v596_v5  ;;  %v911_v61 = vld [vmem:[#allocation12 + $0x4b0] sm:$0xff] }
 0x109   :  { %v907_v5 = vld [vmem:[#allocation12 + $0x490] sm:$0xff] }
 0x10a   :  { %883 = vmatpush.msra.mxu0 %v626_v1  ;;  %863 = vmatpush.msrb.mxu3 %v594_v7  ;;  %v909_v1 = vld [vmem:[#allocation12 + $0x4a0] sm:$0xff]  ;;  %v908_v7 = vld [vmem:[#allocation12 + $0x498] sm:$0xff] }
 0x145   :  { %v442_v8 = vpop.f32.mrf.mxu0 }
 0x14b   :  { %v419_v9 = vpop.f32.mrf.mxu3 }
 0x14d   :  { %v465_v16 = vpop.f32.mrf.mxu1 }
 0x14e   :  { %v445_v10 = vpop.f32.mrf.mxu0  ;;  %v466_v20 = vadd.f32 %v465_v16, %v419_v9  ;;  %v905_v9 = vld [vmem:[#allocation12 + $0x480] sm:$0xff]  ;;  %v930_v16 = vld [vmem:[#allocation12 + $0x548] sm:$0xff] }
 0x153   :  { %v488_v12 = vpop.f32.mrf.mxu2 }
 0x154   :  { %v489_v13 = vadd.f32 %v488_v12, %v442_v8  ;;  %v422_v14 = vpop.f32.mrf.mxu3  ;;  %v934_v8 = vld [vmem:[#allocation12 + $0x568] sm:$0xff]  ;;  %v932_v12 = vld [vmem:[#allocation12 + $0x558] sm:$0xff] }
 0x155   :  { %v468_v35 = vpop.f32.mrf.mxu1 }
 0x156   :  { %v569_v17 = vpop.f32.mrf.mxu0  ;;  %v469_v40 = vadd.f32 %v468_v35, %v422_v14  ;;  %v929_v14 = vld [vmem:[#allocation12 + $0x540] sm:$0xff]  ;;  %v1102_v35 = vld [vmem:[#allocation12 + $0x7f0] sm:$0xff] }
 0x157   :  { %v576_v18 = vadd.f32 %v569_v17, %v489_v13  ;;  %v903_v13 = vld [vmem:[#allocation12 + $0x470] sm:$0xff]  ;;  %v901_v17 = vld [vmem:[#allocation12 + $0x460] sm:$0xff] }
 0x159   :  { %v586_v19 = vadd.f32 %v582_v15, %v576_v18  ;;  %v927_v18 = vld [vmem:[#allocation12 + $0x530] sm:$0xff] }
 0x15b   :  { %v491_v21 = vpop.f32.mrf.mxu2  ;;  %v2702_v22 = vmax.f32 %v586_v19, 0.0  ;;  %v902_v19 = vld [vmem:[#allocation12 + $0x468] sm:$0xff] }
 0x15c   :  { %v492_v24 = vadd.f32 %v491_v21, %v445_v10  ;;  %v546_v25 = vpop.f32.mrf.mxu3  ;;  %v931_v10 = vld [vmem:[#allocation12 + $0x550] sm:$0xff] }
 0x15d   :  { %v575_v26 = vadd.f32 %v546_v25, %v466_v20  ;;  %v725_v27 = vrot.slane %v2702_v22, 2  ;;  %v928_v20 = vld [vmem:[#allocation12 + $0x538] sm:$0xff]  ;;  %v899_v21 = vld [vmem:[#allocation12 + $0x450] sm:$0xff]  ;;  %v926_v25 = vld [vmem:[#allocation12 + $0x528] sm:$0xff] }
 0x15e   :  { %v572_v30 = vpop.f32.mrf.mxu0 }
 0x15f   :  { %v585_v31 = vadd.f32 %v581_v23, %v575_v26  ;;  %v578_v32 = vadd.f32 %v572_v30, %v492_v24  ;;  %764 = vmatmul.f32.vlgmr.msra.gmra.mxu2 %v725_v27  ;;  %804 = vmatmul.f32.vlgmr.msrb.gmra.mxu0 %v725_v27  ;;  %v900_v24 = vld [vmem:[#allocation12 + $0x458] sm:$0xff]  ;;  %v897_v26 = vld [vmem:[#allocation12 + $0x440] sm:$0xff]  ;;  %v923_v27 = vld [vmem:[#allocation12 + $0x510] sm:$0xff] }
 0x160   :  { %977 = vmatpush.msra.mxu2 %v951_v28  ;;  %1017 = vmatpush.msrb.mxu0 %v952_v29  ;;  %v898_v28 = vld [vmem:[#allocation12 + $0x448] sm:$0xff]  ;;  %v924_v29 = vld [vmem:[#allocation12 + $0x518] sm:$0xff]  ;;  %v895_v30 = vld [vmem:[#allocation12 + $0x430] sm:$0xff] }
 0x161   :  { %v2705_v36 = vmax.f32 %v585_v31, 0.0  ;;  %v2707_v37 = vadd.f32 %v582_v15, %v578_v32  ;;  %v904_v15 = vld [vmem:[#allocation12 + $0x478] sm:$0xff]  ;;  %v921_v31 = vld [vmem:[#allocation12 + $0x500] sm:$0xff] }
 0x162   :  { %978 = vmatpush.msra.mxu2 %v949_v33  ;;  %1018 = vmatpush.msrb.mxu0 %v950_v34  ;;  %v896_v32 = vld [vmem:[#allocation12 + $0x438] sm:$0xff]  ;;  %v922_v33 = vld [vmem:[#allocation12 + $0x508] sm:$0xff]  ;;  %v954_v34 = vrot.slane %v2702_v22, 4 }
 0x163   :  { %v724_v41 = vrot.slane %v2705_v36, 2 }
 0x164   :  { %979 = vmatpush.msra.mxu2 %v947_v38  ;;  %1019 = vmatpush.msrb.mxu0 %v948_v39  ;;  %v549_v44 = vpop.f32.mrf.mxu3  ;;  %v1103_v38 = vld [vmem:[#allocation12 + $0x7f8] sm:$0xff]  ;;  %v893_v39 = vld [vmem:[#allocation12 + $0x420] sm:$0xff] }
 0x165   :  { %v577_v47 = vadd.f32 %v549_v44, %v469_v40  ;;  %744 = vmatmul.f32.vlgmr.msra.gmra.mxu1 %v724_v41  ;;  %784 = vmatmul.f32.vlgmr.msra.gmra.mxu3 %v724_v41  ;;  %v894_v40 = vld [vmem:[#allocation12 + $0x428] sm:$0xff]  ;;  %v1100_v41 = vld [vmem:[#allocation12 + $0x7e0] sm:$0xff]  ;;  %v892_v44 = vld [vmem:[#allocation12 + $0x418] sm:$0xff] }
 0x166   :  { %957 = vmatpush.msra.mxu1 %v919_v42  ;;  %980 = vmatpush.msra.mxu2 %v945_v43  ;;  %v1101_v42 = vld [vmem:[#allocation12 + $0x7e8] sm:$0xff]  ;;  %v891_v43 = vld [vmem:[#allocation12 + $0x410] sm:$0xff] }
 0x167   :  { %v2710_v50 = vadd.f32 %v581_v23, %v577_v47  ;;  %997 = vmatpush.msra.mxu3 %v920_v45  ;;  %1020 = vmatpush.msrb.mxu0 %v946_v46  ;;  %v925_v23 = vld [vmem:[#allocation12 + $0x520] sm:$0xff]  ;;  %v1098_v45 = vld [vmem:[#allocation12 + $0x7d0] sm:$0xff]  ;;  %v1099_v46 = vld [vmem:[#allocation12 + $0x7d8] sm:$0xff] }
 0x168   :  { %844 = vmatmul.f32.vlgmr.msrb.gmra.mxu2 %v2702_v22  ;;  %884 = vmatmul.f32.vlgmr.msra.gmra.mxu0 %v2702_v22  ;;  %v889_v47 = vld [vmem:[#allocation12 + $0x400] sm:$0xff] }
 0x169   :  { %958 = vmatpush.msra.mxu1 %v917_v48  ;;  %981 = vmatpush.msra.mxu2 %v943_v49  ;;  %v890_v48 = vld [vmem:[#allocation12 + $0x408] sm:$0xff]  ;;  %v953_v49 = vrot.slane %v2705_v36, 4 }
 0x16a   :  { %998 = vmatpush.msra.mxu3 %v918_v51  ;;  %1021 = vmatpush.msrb.mxu0 %v944_v52  ;;  %v1070_v51 = vld [vmem:[#allocation12 + $0x6f0] sm:$0xff]  ;;  %v1096_v52 = vld [vmem:[#allocation12 + $0x7c0] sm:$0xff] }
 0x16b   :  { %959 = vmatpush.msra.mxu1 %v915_v53  ;;  %982 = vmatpush.msra.mxu2 %v941_v54  ;;  %v1071_v53 = vld [vmem:[#allocation12 + $0x6f8] sm:$0xff]  ;;  %v1097_v54 = vld [vmem:[#allocation12 + $0x7c8] sm:$0xff] }
 0x16c   :  { %999 = vmatpush.msra.mxu3 %v916_v55  ;;  %1022 = vmatpush.msrb.mxu0 %v942_v56  ;;  %v1068_v55 = vld [vmem:[#allocation12 + $0x6e0] sm:$0xff]  ;;  %v1094_v56 = vld [vmem:[#allocation12 + $0x7b0] sm:$0xff] }
 0x16d   :  { %960 = vmatpush.msra.mxu1 %v913_v57  ;;  %983 = vmatpush.msra.mxu2 %v939_v58  ;;  %v1069_v57 = vld [vmem:[#allocation12 + $0x6e8] sm:$0xff]  ;;  %v1095_v58 = vld [vmem:[#allocation12 + $0x7b8] sm:$0xff] }
 0x16e   :  { %1000 = vmatpush.msra.mxu3 %v914_v59  ;;  %1023 = vmatpush.msrb.mxu0 %v940_v60  ;;  %v1066_v59 = vld [vmem:[#allocation12 + $0x6d0] sm:$0xff]  ;;  %v1092_v60 = vld [vmem:[#allocation12 + $0x7a0] sm:$0xff] }
 0x16f   :  { %824 = vmatmul.f32.vlgmr.msrb.gmra.mxu1 %v2705_v36  ;;  %864 = vmatmul.f32.vlgmr.msrb.gmra.mxu3 %v2705_v36 }
 0x170   :  { %961 = vmatpush.msra.mxu1 %v911_v61  ;;  %984 = vmatpush.msra.mxu2 %v937_v62  ;;  %v1067_v61 = vld [vmem:[#allocation12 + $0x6d8] sm:$0xff]  ;;  %v1093_v62 = vld [vmem:[#allocation12 + $0x7a8] sm:$0xff] }
 0x171   :  { %1001 = vmatpush.msra.mxu3 %v912_v63  ;;  %1024 = vmatpush.msrb.mxu0 %v938_v0  ;;  %v1064_v63 = vld [vmem:[#allocation12 + $0x6c0] sm:$0xff]  ;;  %v1090_v0 = vld [vmem:[#allocation12 + $0x790] sm:$0xff] }
 0x172   :  { %962 = vmatpush.msra.mxu1 %v909_v1  ;;  %985 = vmatpush.msra.mxu2 %v935_v2  ;;  %v1065_v1 = vld [vmem:[#allocation12 + $0x6c8] sm:$0xff]  ;;  %v1091_v2 = vld [vmem:[#allocation12 + $0x798] sm:$0xff] }
 0x173   :  { %1002 = vmatpush.msra.mxu3 %v910_v3  ;;  %1025 = vmatpush.msrb.mxu0 %v936_v4  ;;  %v1062_v3 = vld [vmem:[#allocation12 + $0x6b0] sm:$0xff]  ;;  %v1088_v4 = vld [vmem:[#allocation12 + $0x780] sm:$0xff] }
 0x174   :  { %963 = vmatpush.msra.mxu1 %v907_v5  ;;  %986 = vmatpush.msra.mxu2 %v933_v6  ;;  %v1063_v5 = vld [vmem:[#allocation12 + $0x6b8] sm:$0xff]  ;;  %v1089_v6 = vld [vmem:[#allocation12 + $0x788] sm:$0xff] }
 0x175   :  { %1003 = vmatpush.msra.mxu3 %v908_v7  ;;  %1026 = vmatpush.msrb.mxu0 %v934_v8  ;;  %v1060_v7 = vld [vmem:[#allocation12 + $0x6a0] sm:$0xff]  ;;  %v1086_v8 = vld [vmem:[#allocation12 + $0x770] sm:$0xff] }
 0x176   :  { %964 = vmatpush.msra.mxu1 %v905_v9  ;;  %987 = vmatpush.msra.mxu2 %v931_v10  ;;  %v1061_v9 = vld [vmem:[#allocation12 + $0x6a8] sm:$0xff]  ;;  %v1087_v10 = vld [vmem:[#allocation12 + $0x778] sm:$0xff] }
 0x177   :  { %1004 = vmatpush.msra.mxu3 %v906_v11  ;;  %1027 = vmatpush.msrb.mxu0 %v932_v12  ;;  %v1058_v11 = vld [vmem:[#allocation12 + $0x690] sm:$0xff]  ;;  %v1084_v12 = vld [vmem:[#allocation12 + $0x760] sm:$0xff] }
 0x178   :  { %965 = vmatpush.msra.mxu1 %v903_v13  ;;  %988 = vmatpush.msra.mxu2 %v929_v14  ;;  %v1059_v13 = vld [vmem:[#allocation12 + $0x698] sm:$0xff]  ;;  %v1085_v14 = vld [vmem:[#allocation12 + $0x768] sm:$0xff] }
 0x179   :  { %1005 = vmatpush.msra.mxu3 %v904_v15  ;;  %1028 = vmatpush.msrb.mxu0 %v930_v16  ;;  %v1056_v15 = vld [vmem:[#allocation12 + $0x680] sm:$0xff]  ;;  %v1082_v16 = vld [vmem:[#allocation12 + $0x750] sm:$0xff] }
 0x17a   :  { %966 = vmatpush.msra.mxu1 %v901_v17  ;;  %989 = vmatpush.msra.mxu2 %v927_v18  ;;  %v1057_v17 = vld [vmem:[#allocation12 + $0x688] sm:$0xff]  ;;  %v1083_v18 = vld [vmem:[#allocation12 + $0x758] sm:$0xff] }
 0x17b   :  { %1006 = vmatpush.msra.mxu3 %v902_v19  ;;  %1029 = vmatpush.msrb.mxu0 %v928_v20  ;;  %v1054_v19 = vld [vmem:[#allocation12 + $0x670] sm:$0xff]  ;;  %v1080_v20 = vld [vmem:[#allocation12 + $0x740] sm:$0xff] }
 0x17c   :  { %967 = vmatpush.msra.mxu1 %v899_v21  ;;  %990 = vmatpush.msra.mxu2 %v925_v23  ;;  %v1055_v21 = vld [vmem:[#allocation12 + $0x678] sm:$0xff]  ;;  %v1081_v23 = vld [vmem:[#allocation12 + $0x748] sm:$0xff] }
 0x17d   :  { %1007 = vmatpush.msra.mxu3 %v900_v24  ;;  %1030 = vmatpush.msrb.mxu0 %v926_v25  ;;  %v1052_v24 = vld [vmem:[#allocation12 + $0x660] sm:$0xff]  ;;  %v1078_v25 = vld [vmem:[#allocation12 + $0x730] sm:$0xff] }
 0x17e   :  { %968 = vmatpush.msra.mxu1 %v897_v26  ;;  %991 = vmatpush.msra.mxu2 %v923_v27  ;;  %v1053_v26 = vld [vmem:[#allocation12 + $0x668] sm:$0xff]  ;;  %v1079_v27 = vld [vmem:[#allocation12 + $0x738] sm:$0xff] }
 0x17f   :  { %1008 = vmatpush.msra.mxu3 %v898_v28  ;;  %1031 = vmatpush.msrb.mxu0 %v924_v29  ;;  %v1050_v28 = vld [vmem:[#allocation12 + $0x650] sm:$0xff]  ;;  %v1076_v29 = vld [vmem:[#allocation12 + $0x720] sm:$0xff] }
 0x180   :  { %969 = vmatpush.msra.mxu1 %v895_v30  ;;  %992 = vmatpush.msra.mxu2 %v921_v31  ;;  %v1051_v30 = vld [vmem:[#allocation12 + $0x658] sm:$0xff]  ;;  %v1077_v31 = vld [vmem:[#allocation12 + $0x728] sm:$0xff] }
 0x181   :  { %1009 = vmatpush.msra.mxu3 %v896_v32  ;;  %1032 = vmatpush.msrb.mxu0 %v922_v33  ;;  %v1048_v32 = vld [vmem:[#allocation12 + $0x640] sm:$0xff]  ;;  %v1074_v33 = vld [vmem:[#allocation12 + $0x710] sm:$0xff] }
 0x182   :  { %993 = vmatmul.f32.vlgmr.msra.gmra.mxu2 %v954_v34  ;;  %1033 = vmatmul.f32.vlgmr.msrb.gmra.mxu0 %v954_v34  ;;  %v1049_v34 = vld [vmem:[#allocation12 + $0x648] sm:$0xff] }
 0x183   :  { %1128 = vmatpush.msrb.mxu2 %v1102_v35  ;;  %1168 = vmatpush.msra.mxu0 %v1103_v38  ;;  %v1075_v35 = vld [vmem:[#allocation12 + $0x718] sm:$0xff]  ;;  %v1046_v38 = vld [vmem:[#allocation12 + $0x630] sm:$0xff] }
 0x184   :  { %970 = vmatpush.msra.mxu1 %v893_v39  ;;  %1010 = vmatpush.msra.mxu3 %v894_v40  ;;  %v1072_v39 = vld [vmem:[#allocation12 + $0x700] sm:$0xff]  ;;  %v1047_v40 = vld [vmem:[#allocation12 + $0x638] sm:$0xff] }
 0x185   :  { %1129 = vmatpush.msrb.mxu2 %v1100_v41  ;;  %1169 = vmatpush.msra.mxu0 %v1101_v42  ;;  %v1073_v41 = vld [vmem:[#allocation12 + $0x708] sm:$0xff]  ;;  %v1105_v42 = vrot.slane %v2702_v22, 6  ;;  %v1040_v22 = vld [vmem:[#allocation12 + $0x600] sm:$0xff] }
 0x186   :  { %971 = vmatpush.msra.mxu1 %v891_v43  ;;  %1011 = vmatpush.msra.mxu3 %v892_v44  ;;  %v1253_v43 = vld [vmem:[#allocation12 + $0x9f0] sm:$0xff]  ;;  %v1254_v44 = vld [vmem:[#allocation12 + $0x9f8] sm:$0xff] }
 0x187   :  { %1130 = vmatpush.msrb.mxu2 %v1098_v45  ;;  %1170 = vmatpush.msra.mxu0 %v1099_v46  ;;  %v1044_v45 = vld [vmem:[#allocation12 + $0x620] sm:$0xff]  ;;  %v1045_v46 = vld [vmem:[#allocation12 + $0x628] sm:$0xff] }
 0x188   :  { %972 = vmatpush.msra.mxu1 %v889_v47  ;;  %1012 = vmatpush.msra.mxu3 %v890_v48  ;;  %v1251_v47 = vld [vmem:[#allocation12 + $0x9e0] sm:$0xff]  ;;  %v1252_v48 = vld [vmem:[#allocation12 + $0x9e8] sm:$0xff] }
 0x189   :  { %973 = vmatmul.f32.vlgmr.msra.gmra.mxu1 %v953_v49  ;;  %1013 = vmatmul.f32.vlgmr.msra.gmra.mxu3 %v953_v49  ;;  %v1042_v49 = vld [vmem:[#allocation12 + $0x610] sm:$0xff] }
 0x18a   :  { %1108 = vmatpush.msrb.mxu1 %v1070_v51  ;;  %1131 = vmatpush.msrb.mxu2 %v1096_v52  ;;  %v1043_v51 = vld [vmem:[#allocation12 + $0x618] sm:$0xff]  ;;  %v1249_v52 = vld [vmem:[#allocation12 + $0x9d0] sm:$0xff] }
 0x18b   :  { %1148 = vmatpush.msrb.mxu3 %v1071_v53  ;;  %1171 = vmatpush.msra.mxu0 %v1097_v54  ;;  %v1250_v53 = vld [vmem:[#allocation12 + $0x9d8] sm:$0xff]  ;;  %v1041_v54 = vld [vmem:[#allocation12 + $0x608] sm:$0xff] }
 0x18c   :  { %1109 = vmatpush.msrb.mxu1 %v1068_v55  ;;  %1132 = vmatpush.msrb.mxu2 %v1094_v56  ;;  %v1104_v55 = vrot.slane %v2705_v36, 6  ;;  %v1221_v56 = vld [vmem:[#allocation12 + $0x8f0] sm:$0xff]  ;;  %v1218_v36 = vld [vmem:[#allocation12 + $0x8d8] sm:$0xff] }
 0x18d   :  { %1149 = vmatpush.msrb.mxu3 %v1069_v57  ;;  %1172 = vmatpush.msra.mxu0 %v1095_v58  ;;  %v1247_v57 = vld [vmem:[#allocation12 + $0x9c0] sm:$0xff]  ;;  %v1222_v58 = vld [vmem:[#allocation12 + $0x8f8] sm:$0xff] }
 0x18e   :  { %1110 = vmatpush.msrb.mxu1 %v1066_v59  ;;  %1133 = vmatpush.msrb.mxu2 %v1092_v60  ;;  %v1248_v59 = vld [vmem:[#allocation12 + $0x9c8] sm:$0xff]  ;;  %v1219_v60 = vld [vmem:[#allocation12 + $0x8e0] sm:$0xff] }
 0x18f   :  { %1150 = vmatpush.msrb.mxu3 %v1067_v61  ;;  %1173 = vmatpush.msra.mxu0 %v1093_v62  ;;  %v1245_v61 = vld [vmem:[#allocation12 + $0x9b0] sm:$0xff]  ;;  %v1220_v62 = vld [vmem:[#allocation12 + $0x8e8] sm:$0xff] }
 0x190   :  { %1111 = vmatpush.msrb.mxu1 %v1064_v63  ;;  %1134 = vmatpush.msrb.mxu2 %v1090_v0  ;;  %v1246_v63 = vld [vmem:[#allocation12 + $0x9b8] sm:$0xff]  ;;  %v1217_v0 = vld [vmem:[#allocation12 + $0x8d0] sm:$0xff] }
 0x191   :  { %1151 = vmatpush.msrb.mxu3 %v1065_v1  ;;  %1174 = vmatpush.msra.mxu0 %v1091_v2  ;;  %v1243_v1 = vld [vmem:[#allocation12 + $0x9a0] sm:$0xff]  ;;  %v1244_v2 = vld [vmem:[#allocation12 + $0x9a8] sm:$0xff] }
 0x192   :  { %1112 = vmatpush.msrb.mxu1 %v1062_v3  ;;  %1135 = vmatpush.msrb.mxu2 %v1088_v4  ;;  %v1215_v3 = vld [vmem:[#allocation12 + $0x8c0] sm:$0xff]  ;;  %v1241_v4 = vld [vmem:[#allocation12 + $0x990] sm:$0xff] }
 0x193   :  { %1152 = vmatpush.msrb.mxu3 %v1063_v5  ;;  %1175 = vmatpush.msra.mxu0 %v1089_v6  ;;  %v1216_v5 = vld [vmem:[#allocation12 + $0x8c8] sm:$0xff]  ;;  %v1242_v6 = vld [vmem:[#allocation12 + $0x998] sm:$0xff] }
 0x194   :  { %1113 = vmatpush.msrb.mxu1 %v1060_v7  ;;  %1136 = vmatpush.msrb.mxu2 %v1086_v8  ;;  %v1213_v7 = vld [vmem:[#allocation12 + $0x8b0] sm:$0xff]  ;;  %v1239_v8 = vld [vmem:[#allocation12 + $0x980] sm:$0xff] }
 0x195   :  { %1153 = vmatpush.msrb.mxu3 %v1061_v9  ;;  %1176 = vmatpush.msra.mxu0 %v1087_v10  ;;  %v1214_v9 = vld [vmem:[#allocation12 + $0x8b8] sm:$0xff]  ;;  %v1240_v10 = vld [vmem:[#allocation12 + $0x988] sm:$0xff] }
 0x196   :  { %1114 = vmatpush.msrb.mxu1 %v1058_v11  ;;  %1137 = vmatpush.msrb.mxu2 %v1084_v12  ;;  %v1211_v11 = vld [vmem:[#allocation12 + $0x8a0] sm:$0xff]  ;;  %v1237_v12 = vld [vmem:[#allocation12 + $0x970] sm:$0xff] }
 0x197   :  { %1154 = vmatpush.msrb.mxu3 %v1059_v13  ;;  %1177 = vmatpush.msra.mxu0 %v1085_v14  ;;  %v1212_v13 = vld [vmem:[#allocation12 + $0x8a8] sm:$0xff]  ;;  %v1238_v14 = vld [vmem:[#allocation12 + $0x978] sm:$0xff] }
 0x198   :  { %1115 = vmatpush.msrb.mxu1 %v1056_v15  ;;  %1138 = vmatpush.msrb.mxu2 %v1082_v16  ;;  %v1209_v15 = vld [vmem:[#allocation12 + $0x890] sm:$0xff]  ;;  %v1235_v16 = vld [vmem:[#allocation12 + $0x960] sm:$0xff] }
 0x199   :  { %1155 = vmatpush.msrb.mxu3 %v1057_v17  ;;  %1178 = vmatpush.msra.mxu0 %v1083_v18  ;;  %v1210_v17 = vld [vmem:[#allocation12 + $0x898] sm:$0xff]  ;;  %v1236_v18 = vld [vmem:[#allocation12 + $0x968] sm:$0xff] }
 0x19a   :  { %1116 = vmatpush.msrb.mxu1 %v1054_v19  ;;  %1139 = vmatpush.msrb.mxu2 %v1080_v20  ;;  %v1207_v19 = vld [vmem:[#allocation12 + $0x880] sm:$0xff]  ;;  %v1233_v20 = vld [vmem:[#allocation12 + $0x950] sm:$0xff] }
 0x19b   :  { %1156 = vmatpush.msrb.mxu3 %v1055_v21  ;;  %1179 = vmatpush.msra.mxu0 %v1081_v23  ;;  %v1208_v21 = vld [vmem:[#allocation12 + $0x888] sm:$0xff]  ;;  %v1234_v23 = vld [vmem:[#allocation12 + $0x958] sm:$0xff] }
 0x19c   :  { %1117 = vmatpush.msrb.mxu1 %v1052_v24  ;;  %1140 = vmatpush.msrb.mxu2 %v1078_v25  ;;  %v1205_v24 = vld [vmem:[#allocation12 + $0x870] sm:$0xff]  ;;  %v1231_v25 = vld [vmem:[#allocation12 + $0x940] sm:$0xff] }
 0x19d   :  { %1157 = vmatpush.msrb.mxu3 %v1053_v26  ;;  %1180 = vmatpush.msra.mxu0 %v1079_v27  ;;  %v1206_v26 = vld [vmem:[#allocation12 + $0x878] sm:$0xff]  ;;  %v1232_v27 = vld [vmem:[#allocation12 + $0x948] sm:$0xff] }
 0x19e   :  { %1118 = vmatpush.msrb.mxu1 %v1050_v28  ;;  %1141 = vmatpush.msrb.mxu2 %v1076_v29  ;;  %v1203_v28 = vld [vmem:[#allocation12 + $0x860] sm:$0xff]  ;;  %v1229_v29 = vld [vmem:[#allocation12 + $0x930] sm:$0xff] }
 0x19f   :  { %1158 = vmatpush.msrb.mxu3 %v1051_v30  ;;  %1181 = vmatpush.msra.mxu0 %v1077_v31  ;;  %v1204_v30 = vld [vmem:[#allocation12 + $0x868] sm:$0xff]  ;;  %v1230_v31 = vld [vmem:[#allocation12 + $0x938] sm:$0xff] }
 0x1a0   :  { %1119 = vmatpush.msrb.mxu1 %v1048_v32  ;;  %1142 = vmatpush.msrb.mxu2 %v1074_v33  ;;  %v1201_v32 = vld [vmem:[#allocation12 + $0x850] sm:$0xff]  ;;  %v1227_v33 = vld [vmem:[#allocation12 + $0x920] sm:$0xff] }
 0x1a1   :  { %1159 = vmatpush.msrb.mxu3 %v1049_v34  ;;  %1182 = vmatpush.msra.mxu0 %v1075_v35  ;;  %v1202_v34 = vld [vmem:[#allocation12 + $0x858] sm:$0xff]  ;;  %v1228_v35 = vld [vmem:[#allocation12 + $0x928] sm:$0xff] }
 0x1a2   :  { %1120 = vmatpush.msrb.mxu1 %v1046_v38  ;;  %1143 = vmatpush.msrb.mxu2 %v1072_v39  ;;  %v1199_v38 = vld [vmem:[#allocation12 + $0x840] sm:$0xff]  ;;  %v1225_v39 = vld [vmem:[#allocation12 + $0x910] sm:$0xff] }
 0x1a3   :  { %1160 = vmatpush.msrb.mxu3 %v1047_v40  ;;  %1183 = vmatpush.msra.mxu0 %v1073_v41  ;;  %v1200_v40 = vld [vmem:[#allocation12 + $0x848] sm:$0xff]  ;;  %v1226_v41 = vld [vmem:[#allocation12 + $0x918] sm:$0xff] }
 0x1a4   :  { %1144 = vmatmul.f32.vlgmr.msrb.gmra.mxu2 %v1105_v42  ;;  %1184 = vmatmul.f32.vlgmr.msra.gmra.mxu0 %v1105_v42  ;;  %v1197_v42 = vld [vmem:[#allocation12 + $0x830] sm:$0xff] }
 0x1a5   :  { %1275 = vmatpush.msra.mxu2 %v1253_v43  ;;  %1315 = vmatpush.msrb.mxu0 %v1254_v44  ;;  %v1223_v43 = vld [vmem:[#allocation12 + $0x900] sm:$0xff]  ;;  %v1198_v44 = vld [vmem:[#allocation12 + $0x838] sm:$0xff] }
 0x1a6   :  { %1121 = vmatpush.msrb.mxu1 %v1044_v45  ;;  %1161 = vmatpush.msrb.mxu3 %v1045_v46  ;;  %v1224_v45 = vld [vmem:[#allocation12 + $0x908] sm:$0xff]  ;;  %v2721_v46 = vmax.f32 %v2707_v37, 0.0  ;;  %v1396_v37 = vld [vmem:[#allocation12 + $0xbd0] sm:$0xff] }
 0x1a7   :  { %1276 = vmatpush.msra.mxu2 %v1251_v47  ;;  %1316 = vmatpush.msrb.mxu0 %v1252_v48  ;;  %v1400_v47 = vld [vmem:[#allocation12 + $0xbf0] sm:$0xff]  ;;  %v1401_v48 = vld [vmem:[#allocation12 + $0xbf8] sm:$0xff] }
 0x1a8   :  { %1122 = vmatpush.msrb.mxu1 %v1042_v49  ;;  %1162 = vmatpush.msrb.mxu3 %v1043_v51  ;;  %v1195_v49 = vld [vmem:[#allocation12 + $0x820] sm:$0xff]  ;;  %v1196_v51 = vld [vmem:[#allocation12 + $0x828] sm:$0xff] }
 0x1a9   :  { %1277 = vmatpush.msra.mxu2 %v1249_v52  ;;  %1317 = vmatpush.msrb.mxu0 %v1250_v53  ;;  %v1398_v52 = vld [vmem:[#allocation12 + $0xbe0] sm:$0xff]  ;;  %v1399_v53 = vld [vmem:[#allocation12 + $0xbe8] sm:$0xff] }
 0x1aa   :  { %1123 = vmatpush.msrb.mxu1 %v1040_v22  ;;  %1163 = vmatpush.msrb.mxu3 %v1041_v54  ;;  %v1193_v22 = vld [vmem:[#allocation12 + $0x810] sm:$0xff]  ;;  %v1194_v54 = vld [vmem:[#allocation12 + $0x818] sm:$0xff] }
 0x1ab   :  { %1124 = vmatmul.f32.vlgmr.msrb.gmra.mxu1 %v1104_v55  ;;  %1164 = vmatmul.f32.vlgmr.msrb.gmra.mxu3 %v1104_v55  ;;  %v1397_v55 = vld [vmem:[#allocation12 + $0xbd8] sm:$0xff] }
 0x1ac   :  { %1255 = vmatpush.msra.mxu1 %v1221_v56  ;;  %1278 = vmatpush.msra.mxu2 %v1247_v57  ;;  %v1191_v56 = vld [vmem:[#allocation12 + $0x800] sm:$0xff]  ;;  %v1192_v57 = vld [vmem:[#allocation12 + $0x808] sm:$0xff] }
 0x1ad   :  { %1295 = vmatpush.msra.mxu3 %v1222_v58  ;;  %1318 = vmatpush.msrb.mxu0 %v1248_v59  ;;  %v2726_v58 = vmax.f32 %v2710_v50, 0.0  ;;  %v1368_v59 = vld [vmem:[#allocation12 + $0xaf0] sm:$0xff] }
 0x1ae   :  { %1256 = vmatpush.msra.mxu1 %v1219_v60  ;;  %1279 = vmatpush.msra.mxu2 %v1245_v61  ;;  %v1394_v60 = vld [vmem:[#allocation12 + $0xbc0] sm:$0xff]  ;;  %v1369_v61 = vld [vmem:[#allocation12 + $0xaf8] sm:$0xff]  ;;  %v1364_v50 = vld [vmem:[#allocation12 + $0xad0] sm:$0xff] }
 0x1af   :  { %1296 = vmatpush.msra.mxu3 %v1220_v62  ;;  %1319 = vmatpush.msrb.mxu0 %v1246_v63  ;;  %v1395_v62 = vld [vmem:[#allocation12 + $0xbc8] sm:$0xff]  ;;  %v1366_v63 = vld [vmem:[#allocation12 + $0xae0] sm:$0xff] }
 0x1b0   :  { %1257 = vmatpush.msra.mxu1 %v1217_v0  ;;  %1280 = vmatpush.msra.mxu2 %v1243_v1  ;;  %v1392_v0 = vld [vmem:[#allocation12 + $0xbb0] sm:$0xff]  ;;  %v1367_v1 = vld [vmem:[#allocation12 + $0xae8] sm:$0xff] }
 0x1b1   :  { %1297 = vmatpush.msra.mxu3 %v1218_v36  ;;  %1320 = vmatpush.msrb.mxu0 %v1244_v2  ;;  %v1393_v36 = vld [vmem:[#allocation12 + $0xbb8] sm:$0xff]  ;;  %v1390_v2 = vld [vmem:[#allocation12 + $0xba0] sm:$0xff] }
 0x1b2   :  { %1258 = vmatpush.msra.mxu1 %v1215_v3  ;;  %1281 = vmatpush.msra.mxu2 %v1241_v4  ;;  %v1365_v3 = vld [vmem:[#allocation12 + $0xad8] sm:$0xff]  ;;  %v1391_v4 = vld [vmem:[#allocation12 + $0xba8] sm:$0xff] }
 0x1b3   :  { %1298 = vmatpush.msra.mxu3 %v1216_v5  ;;  %1321 = vmatpush.msrb.mxu0 %v1242_v6  ;;  %v1362_v5 = vld [vmem:[#allocation12 + $0xac0] sm:$0xff]  ;;  %v1388_v6 = vld [vmem:[#allocation12 + $0xb90] sm:$0xff] }
 0x1b4   :  { %1259 = vmatpush.msra.mxu1 %v1213_v7  ;;  %1282 = vmatpush.msra.mxu2 %v1239_v8  ;;  %v1363_v7 = vld [vmem:[#allocation12 + $0xac8] sm:$0xff]  ;;  %v1389_v8 = vld [vmem:[#allocation12 + $0xb98] sm:$0xff] }
 0x1b5   :  { %1299 = vmatpush.msra.mxu3 %v1214_v9  ;;  %1322 = vmatpush.msrb.mxu0 %v1240_v10  ;;  %v1360_v9 = vld [vmem:[#allocation12 + $0xab0] sm:$0xff]  ;;  %v1386_v10 = vld [vmem:[#allocation12 + $0xb80] sm:$0xff] }
 0x1b6   :  { %1260 = vmatpush.msra.mxu1 %v1211_v11  ;;  %1283 = vmatpush.msra.mxu2 %v1237_v12  ;;  %v1361_v11 = vld [vmem:[#allocation12 + $0xab8] sm:$0xff]  ;;  %v1387_v12 = vld [vmem:[#allocation12 + $0xb88] sm:$0xff] }
 0x1b7   :  { %1300 = vmatpush.msra.mxu3 %v1212_v13  ;;  %1323 = vmatpush.msrb.mxu0 %v1238_v14  ;;  %v1358_v13 = vld [vmem:[#allocation12 + $0xaa0] sm:$0xff]  ;;  %v1384_v14 = vld [vmem:[#allocation12 + $0xb70] sm:$0xff] }
 0x1b8   :  { %1261 = vmatpush.msra.mxu1 %v1209_v15  ;;  %1284 = vmatpush.msra.mxu2 %v1235_v16  ;;  %v1359_v15 = vld [vmem:[#allocation12 + $0xaa8] sm:$0xff]  ;;  %v1385_v16 = vld [vmem:[#allocation12 + $0xb78] sm:$0xff] }
 0x1b9   :  { %1301 = vmatpush.msra.mxu3 %v1210_v17  ;;  %1324 = vmatpush.msrb.mxu0 %v1236_v18  ;;  %v1356_v17 = vld [vmem:[#allocation12 + $0xa90] sm:$0xff]  ;;  %v1382_v18 = vld [vmem:[#allocation12 + $0xb60] sm:$0xff] }
 0x1ba   :  { %1262 = vmatpush.msra.mxu1 %v1207_v19  ;;  %1285 = vmatpush.msra.mxu2 %v1233_v20  ;;  %v1357_v19 = vld [vmem:[#allocation12 + $0xa98] sm:$0xff]  ;;  %v1383_v20 = vld [vmem:[#allocation12 + $0xb68] sm:$0xff] }
 0x1bb   :  { %1302 = vmatpush.msra.mxu3 %v1208_v21  ;;  %1325 = vmatpush.msrb.mxu0 %v1234_v23  ;;  %v1354_v21 = vld [vmem:[#allocation12 + $0xa80] sm:$0xff]  ;;  %v1380_v23 = vld [vmem:[#allocation12 + $0xb50] sm:$0xff] }
 0x1bc   :  { %1263 = vmatpush.msra.mxu1 %v1205_v24  ;;  %1286 = vmatpush.msra.mxu2 %v1231_v25  ;;  %v1355_v24 = vld [vmem:[#allocation12 + $0xa88] sm:$0xff]  ;;  %v1381_v25 = vld [vmem:[#allocation12 + $0xb58] sm:$0xff] }
 0x1bd   :  { %1303 = vmatpush.msra.mxu3 %v1206_v26  ;;  %1326 = vmatpush.msrb.mxu0 %v1232_v27  ;;  %v1352_v26 = vld [vmem:[#allocation12 + $0xa70] sm:$0xff]  ;;  %v1378_v27 = vld [vmem:[#allocation12 + $0xb40] sm:$0xff] }
 0x1be   :  { %1264 = vmatpush.msra.mxu1 %v1203_v28  ;;  %1287 = vmatpush.msra.mxu2 %v1229_v29  ;;  %v1353_v28 = vld [vmem:[#allocation12 + $0xa78] sm:$0xff]  ;;  %v1379_v29 = vld [vmem:[#allocation12 + $0xb48] sm:$0xff] }
 0x1bf   :  { %1304 = vmatpush.msra.mxu3 %v1204_v30  ;;  %1327 = vmatpush.msrb.mxu0 %v1230_v31  ;;  %v1350_v30 = vld [vmem:[#allocation12 + $0xa60] sm:$0xff]  ;;  %v1376_v31 = vld [vmem:[#allocation12 + $0xb30] sm:$0xff] }
 0x1c0   :  { %1265 = vmatpush.msra.mxu1 %v1201_v32  ;;  %1288 = vmatpush.msra.mxu2 %v1227_v33  ;;  %v1351_v32 = vld [vmem:[#allocation12 + $0xa68] sm:$0xff]  ;;  %v1377_v33 = vld [vmem:[#allocation12 + $0xb38] sm:$0xff] }
 0x1c1   :  { %1305 = vmatpush.msra.mxu3 %v1202_v34  ;;  %1328 = vmatpush.msrb.mxu0 %v1228_v35  ;;  %v1348_v34 = vld [vmem:[#allocation12 + $0xa50] sm:$0xff]  ;;  %v1374_v35 = vld [vmem:[#allocation12 + $0xb20] sm:$0xff] }
 0x1c2   :  { %1266 = vmatpush.msra.mxu1 %v1199_v38  ;;  %1289 = vmatpush.msra.mxu2 %v1225_v39  ;;  %v1349_v38 = vld [vmem:[#allocation12 + $0xa58] sm:$0xff]  ;;  %v1375_v39 = vld [vmem:[#allocation12 + $0xb28] sm:$0xff] }
 0x1c3   :  { %1306 = vmatpush.msra.mxu3 %v1200_v40  ;;  %1329 = vmatpush.msrb.mxu0 %v1226_v41  ;;  %v1346_v40 = vld [vmem:[#allocation12 + $0xa40] sm:$0xff]  ;;  %v1372_v41 = vld [vmem:[#allocation12 + $0xb10] sm:$0xff] }
 0x1c4   :  { %1267 = vmatpush.msra.mxu1 %v1197_v42  ;;  %1290 = vmatpush.msra.mxu2 %v1223_v43  ;;  %v1347_v42 = vld [vmem:[#allocation12 + $0xa48] sm:$0xff]  ;;  %v1373_v43 = vld [vmem:[#allocation12 + $0xb18] sm:$0xff] }
 0x1c5   :  { %1307 = vmatpush.msra.mxu3 %v1198_v44  ;;  %1330 = vmatpush.msrb.mxu0 %v1224_v45  ;;  %v1344_v44 = vld [vmem:[#allocation12 + $0xa30] sm:$0xff]  ;;  %v1370_v45 = vld [vmem:[#allocation12 + $0xb00] sm:$0xff] }
 0x1c6   :  { %1291 = vmatmul.f32.vlgmr.msra.gmra.mxu2 %v2721_v46  ;;  %1331 = vmatmul.f32.vlgmr.msrb.gmra.mxu0 %v2721_v46 }
 0x1c7   :  { %1428 = vmatpush.msrb.mxu2 %v1400_v47  ;;  %1468 = vmatpush.msra.mxu0 %v1401_v48  ;;  %v1345_v47 = vld [vmem:[#allocation12 + $0xa38] sm:$0xff]  ;;  %v1371_v48 = vld [vmem:[#allocation12 + $0xb08] sm:$0xff] }
 0x1c8   :  { %1268 = vmatpush.msra.mxu1 %v1195_v49  ;;  %1308 = vmatpush.msra.mxu3 %v1196_v51  ;;  %v1405_v49 = vrot.slane %v2721_v46, 2  ;;  %v1553_v51 = vld [vmem:[#allocation12 + $0xdf0] sm:$0xff] }
 0x1c9   :  { %1429 = vmatpush.msrb.mxu2 %v1398_v52  ;;  %1469 = vmatpush.msra.mxu0 %v1399_v53  ;;  %v1554_v52 = vld [vmem:[#allocation12 + $0xdf8] sm:$0xff]  ;;  %v1342_v53 = vld [vmem:[#allocation12 + $0xa20] sm:$0xff] }
 0x1ca   :  { %1269 = vmatpush.msra.mxu1 %v1193_v22  ;;  %1309 = vmatpush.msra.mxu3 %v1194_v54  ;;  %v1343_v22 = vld [vmem:[#allocation12 + $0xa28] sm:$0xff]  ;;  %v1551_v54 = vld [vmem:[#allocation12 + $0xde0] sm:$0xff] }
 0x1cb   :  { %1430 = vmatpush.msrb.mxu2 %v1396_v37  ;;  %1470 = vmatpush.msra.mxu0 %v1397_v55  ;;  %v1552_v37 = vld [vmem:[#allocation12 + $0xde8] sm:$0xff]  ;;  %v1340_v55 = vld [vmem:[#allocation12 + $0xa10] sm:$0xff] }
 0x1cc   :  { %1270 = vmatpush.msra.mxu1 %v1191_v56  ;;  %1310 = vmatpush.msra.mxu3 %v1192_v57  ;;  %v1341_v56 = vld [vmem:[#allocation12 + $0xa18] sm:$0xff]  ;;  %v1549_v57 = vld [vmem:[#allocation12 + $0xdd0] sm:$0xff] }
 0x1cd   :  { %1271 = vmatmul.f32.vlgmr.msra.gmra.mxu1 %v2726_v58  ;;  %1311 = vmatmul.f32.vlgmr.msra.gmra.mxu3 %v2726_v58 }
 0x1ce   :  { %1408 = vmatpush.msrb.mxu1 %v1368_v59  ;;  %1431 = vmatpush.msrb.mxu2 %v1394_v60  ;;  %v1550_v59 = vld [vmem:[#allocation12 + $0xdd8] sm:$0xff]  ;;  %v1338_v60 = vld [vmem:[#allocation12 + $0xa00] sm:$0xff] }
 0x1cf   :  { %1448 = vmatpush.msrb.mxu3 %v1369_v61  ;;  %1471 = vmatpush.msra.mxu0 %v1395_v62  ;;  %v1339_v61 = vld [vmem:[#allocation12 + $0xa08] sm:$0xff]  ;;  %v1404_v62 = vrot.slane %v2726_v58, 2 }
 0x1d0   :  { %1409 = vmatpush.msrb.mxu1 %v1366_v63  ;;  %1432 = vmatpush.msrb.mxu2 %v1392_v0  ;;  %v1521_v63 = vld [vmem:[#allocation12 + $0xcf0] sm:$0xff]  ;;  %v1547_v0 = vld [vmem:[#allocation12 + $0xdc0] sm:$0xff] }
 0x1d1   :  { %1449 = vmatpush.msrb.mxu3 %v1367_v1  ;;  %1472 = vmatpush.msra.mxu0 %v1393_v36  ;;  %v1522_v1 = vld [vmem:[#allocation12 + $0xcf8] sm:$0xff]  ;;  %v1548_v36 = vld [vmem:[#allocation12 + $0xdc8] sm:$0xff] }
 0x1d2   :  { %1410 = vmatpush.msrb.mxu1 %v1364_v50  ;;  %1433 = vmatpush.msrb.mxu2 %v1390_v2  ;;  %v1519_v50 = vld [vmem:[#allocation12 + $0xce0] sm:$0xff]  ;;  %v1545_v2 = vld [vmem:[#allocation12 + $0xdb0] sm:$0xff] }
 0x1d3   :  { %1450 = vmatpush.msrb.mxu3 %v1365_v3  ;;  %1473 = vmatpush.msra.mxu0 %v1391_v4  ;;  %v1520_v3 = vld [vmem:[#allocation12 + $0xce8] sm:$0xff]  ;;  %v1546_v4 = vld [vmem:[#allocation12 + $0xdb8] sm:$0xff] }
 0x1d4   :  { %1411 = vmatpush.msrb.mxu1 %v1362_v5  ;;  %1434 = vmatpush.msrb.mxu2 %v1388_v6  ;;  %v1517_v5 = vld [vmem:[#allocation12 + $0xcd0] sm:$0xff]  ;;  %v1543_v6 = vld [vmem:[#allocation12 + $0xda0] sm:$0xff] }
 0x1d5   :  { %1451 = vmatpush.msrb.mxu3 %v1363_v7  ;;  %1474 = vmatpush.msra.mxu0 %v1389_v8  ;;  %v1518_v7 = vld [vmem:[#allocation12 + $0xcd8] sm:$0xff]  ;;  %v1544_v8 = vld [vmem:[#allocation12 + $0xda8] sm:$0xff] }
 0x1d6   :  { %1412 = vmatpush.msrb.mxu1 %v1360_v9  ;;  %1435 = vmatpush.msrb.mxu2 %v1386_v10  ;;  %v1515_v9 = vld [vmem:[#allocation12 + $0xcc0] sm:$0xff]  ;;  %v1541_v10 = vld [vmem:[#allocation12 + $0xd90] sm:$0xff] }
 0x1d7   :  { %1452 = vmatpush.msrb.mxu3 %v1361_v11  ;;  %1475 = vmatpush.msra.mxu0 %v1387_v12  ;;  %v1516_v11 = vld [vmem:[#allocation12 + $0xcc8] sm:$0xff]  ;;  %v1542_v12 = vld [vmem:[#allocation12 + $0xd98] sm:$0xff] }
 0x1d8   :  { %1413 = vmatpush.msrb.mxu1 %v1358_v13  ;;  %1436 = vmatpush.msrb.mxu2 %v1384_v14  ;;  %v1513_v13 = vld [vmem:[#allocation12 + $0xcb0] sm:$0xff]  ;;  %v1539_v14 = vld [vmem:[#allocation12 + $0xd80] sm:$0xff] }
 0x1d9   :  { %1453 = vmatpush.msrb.mxu3 %v1359_v15  ;;  %1476 = vmatpush.msra.mxu0 %v1385_v16  ;;  %v1514_v15 = vld [vmem:[#allocation12 + $0xcb8] sm:$0xff]  ;;  %v1540_v16 = vld [vmem:[#allocation12 + $0xd88] sm:$0xff] }
 0x1da   :  { %1414 = vmatpush.msrb.mxu1 %v1356_v17  ;;  %1437 = vmatpush.msrb.mxu2 %v1382_v18  ;;  %v1511_v17 = vld [vmem:[#allocation12 + $0xca0] sm:$0xff]  ;;  %v1537_v18 = vld [vmem:[#allocation12 + $0xd70] sm:$0xff] }
 0x1db   :  { %1454 = vmatpush.msrb.mxu3 %v1357_v19  ;;  %1477 = vmatpush.msra.mxu0 %v1383_v20  ;;  %v1512_v19 = vld [vmem:[#allocation12 + $0xca8] sm:$0xff]  ;;  %v1538_v20 = vld [vmem:[#allocation12 + $0xd78] sm:$0xff] }
 0x1dc   :  { %1415 = vmatpush.msrb.mxu1 %v1354_v21  ;;  %1438 = vmatpush.msrb.mxu2 %v1380_v23  ;;  %v1509_v21 = vld [vmem:[#allocation12 + $0xc90] sm:$0xff]  ;;  %v1535_v23 = vld [vmem:[#allocation12 + $0xd60] sm:$0xff] }
 0x1dd   :  { %1455 = vmatpush.msrb.mxu3 %v1355_v24  ;;  %1478 = vmatpush.msra.mxu0 %v1381_v25  ;;  %v1510_v24 = vld [vmem:[#allocation12 + $0xc98] sm:$0xff]  ;;  %v1536_v25 = vld [vmem:[#allocation12 + $0xd68] sm:$0xff] }
 0x1de   :  { %1416 = vmatpush.msrb.mxu1 %v1352_v26  ;;  %1439 = vmatpush.msrb.mxu2 %v1378_v27  ;;  %v1507_v26 = vld [vmem:[#allocation12 + $0xc80] sm:$0xff]  ;;  %v1533_v27 = vld [vmem:[#allocation12 + $0xd50] sm:$0xff] }
 0x1df   :  { %1456 = vmatpush.msrb.mxu3 %v1353_v28  ;;  %1479 = vmatpush.msra.mxu0 %v1379_v29  ;;  %v1508_v28 = vld [vmem:[#allocation12 + $0xc88] sm:$0xff]  ;;  %v1534_v29 = vld [vmem:[#allocation12 + $0xd58] sm:$0xff] }
 0x1e0   :  { %1417 = vmatpush.msrb.mxu1 %v1350_v30  ;;  %1440 = vmatpush.msrb.mxu2 %v1376_v31  ;;  %v1505_v30 = vld [vmem:[#allocation12 + $0xc70] sm:$0xff]  ;;  %v1531_v31 = vld [vmem:[#allocation12 + $0xd40] sm:$0xff] }
 0x1e1   :  { %1457 = vmatpush.msrb.mxu3 %v1351_v32  ;;  %1480 = vmatpush.msra.mxu0 %v1377_v33  ;;  %v1506_v32 = vld [vmem:[#allocation12 + $0xc78] sm:$0xff]  ;;  %v1532_v33 = vld [vmem:[#allocation12 + $0xd48] sm:$0xff] }
 0x1e2   :  { %1418 = vmatpush.msrb.mxu1 %v1348_v34  ;;  %1441 = vmatpush.msrb.mxu2 %v1374_v35  ;;  %v1503_v34 = vld [vmem:[#allocation12 + $0xc60] sm:$0xff]  ;;  %v1529_v35 = vld [vmem:[#allocation12 + $0xd30] sm:$0xff] }
 0x1e3   :  { %1458 = vmatpush.msrb.mxu3 %v1349_v38  ;;  %1481 = vmatpush.msra.mxu0 %v1375_v39  ;;  %v1504_v38 = vld [vmem:[#allocation12 + $0xc68] sm:$0xff]  ;;  %v1530_v39 = vld [vmem:[#allocation12 + $0xd38] sm:$0xff] }
 0x1e4   :  { %1419 = vmatpush.msrb.mxu1 %v1346_v40  ;;  %1442 = vmatpush.msrb.mxu2 %v1372_v41  ;;  %v1501_v40 = vld [vmem:[#allocation12 + $0xc50] sm:$0xff]  ;;  %v1527_v41 = vld [vmem:[#allocation12 + $0xd20] sm:$0xff] }
 0x1e5   :  { %1459 = vmatpush.msrb.mxu3 %v1347_v42  ;;  %1482 = vmatpush.msra.mxu0 %v1373_v43  ;;  %v1502_v42 = vld [vmem:[#allocation12 + $0xc58] sm:$0xff]  ;;  %v1528_v43 = vld [vmem:[#allocation12 + $0xd28] sm:$0xff] }
 0x1e6   :  { %1420 = vmatpush.msrb.mxu1 %v1344_v44  ;;  %1443 = vmatpush.msrb.mxu2 %v1370_v45  ;;  %v1499_v44 = vld [vmem:[#allocation12 + $0xc40] sm:$0xff]  ;;  %v1525_v45 = vld [vmem:[#allocation12 + $0xd10] sm:$0xff] }
 0x1e7   :  { %1460 = vmatpush.msrb.mxu3 %v1345_v47  ;;  %1483 = vmatpush.msra.mxu0 %v1371_v48  ;;  %v1500_v47 = vld [vmem:[#allocation12 + $0xc48] sm:$0xff]  ;;  %v1526_v48 = vld [vmem:[#allocation12 + $0xd18] sm:$0xff] }
 0x1e8   :  { %1444 = vmatmul.f32.vlgmr.msrb.gmra.mxu2 %v1405_v49  ;;  %1484 = vmatmul.f32.vlgmr.msra.gmra.mxu0 %v1405_v49  ;;  %v1497_v49 = vld [vmem:[#allocation12 + $0xc30] sm:$0xff] }
 0x1e9   :  { %1579 = vmatpush.msra.mxu2 %v1553_v51  ;;  %1619 = vmatpush.msrb.mxu0 %v1554_v52  ;;  %v1523_v51 = vld [vmem:[#allocation12 + $0xd00] sm:$0xff]  ;;  %v1498_v52 = vld [vmem:[#allocation12 + $0xc38] sm:$0xff] }
 0x1ea   :  { %1421 = vmatpush.msrb.mxu1 %v1342_v53  ;;  %1461 = vmatpush.msrb.mxu3 %v1343_v22  ;;  %v1524_v53 = vld [vmem:[#allocation12 + $0xd08] sm:$0xff]  ;;  %v1556_v22 = vrot.slane %v2721_v46, 4 }
 0x1eb   :  { %1580 = vmatpush.msra.mxu2 %v1551_v54  ;;  %1620 = vmatpush.msrb.mxu0 %v1552_v37  ;;  %v1704_v54 = vld [vmem:[#allocation12 + $0xff0] sm:$0xff]  ;;  %v1705_v37 = vld [vmem:[#allocation12 + $0xff8] sm:$0xff] }
 0x1ec   :  { %1422 = vmatpush.msrb.mxu1 %v1340_v55  ;;  %1462 = vmatpush.msrb.mxu3 %v1341_v56  ;;  %v1495_v55 = vld [vmem:[#allocation12 + $0xc20] sm:$0xff]  ;;  %v1496_v56 = vld [vmem:[#allocation12 + $0xc28] sm:$0xff] }
 0x1ed   :  { %1581 = vmatpush.msra.mxu2 %v1549_v57  ;;  %1621 = vmatpush.msrb.mxu0 %v1550_v59  ;;  %v1702_v57 = vld [vmem:[#allocation12 + $0xfe0] sm:$0xff]  ;;  %v1703_v59 = vld [vmem:[#allocation12 + $0xfe8] sm:$0xff] }
 0x1ee   :  { %1423 = vmatpush.msrb.mxu1 %v1338_v60  ;;  %1463 = vmatpush.msrb.mxu3 %v1339_v61  ;;  %v1493_v60 = vld [vmem:[#allocation12 + $0xc10] sm:$0xff]  ;;  %v1494_v61 = vld [vmem:[#allocation12 + $0xc18] sm:$0xff] }
 0x1ef   :  { %1424 = vmatmul.f32.vlgmr.msrb.gmra.mxu1 %v1404_v62  ;;  %1464 = vmatmul.f32.vlgmr.msrb.gmra.mxu3 %v1404_v62  ;;  %v1700_v62 = vld [vmem:[#allocation12 + $0xfd0] sm:$0xff] }
 0x1f0   :  { %1559 = vmatpush.msra.mxu1 %v1521_v63  ;;  %1582 = vmatpush.msra.mxu2 %v1547_v0  ;;  %v1701_v63 = vld [vmem:[#allocation12 + $0xfd8] sm:$0xff]  ;;  %v1491_v0 = vld [vmem:[#allocation12 + $0xc00] sm:$0xff] }
 0x1f1   :  { %1599 = vmatpush.msra.mxu3 %v1522_v1  ;;  %1622 = vmatpush.msrb.mxu0 %v1548_v36  ;;  %v1492_v1 = vld [vmem:[#allocation12 + $0xc08] sm:$0xff]  ;;  %v1555_v36 = vrot.slane %v2726_v58, 4 }
 0x1f2   :  { %1560 = vmatpush.msra.mxu1 %v1519_v50  ;;  %1583 = vmatpush.msra.mxu2 %v1545_v2  ;;  %v1672_v50 = vld [vmem:[#allocation12 + $0xef0] sm:$0xff]  ;;  %v1698_v2 = vld [vmem:[#allocation12 + $0xfc0] sm:$0xff] }
 0x1f3   :  { %1600 = vmatpush.msra.mxu3 %v1520_v3  ;;  %1623 = vmatpush.msrb.mxu0 %v1546_v4  ;;  %v1673_v3 = vld [vmem:[#allocation12 + $0xef8] sm:$0xff]  ;;  %v1699_v4 = vld [vmem:[#allocation12 + $0xfc8] sm:$0xff] }
 0x1f4   :  { %1561 = vmatpush.msra.mxu1 %v1517_v5  ;;  %1584 = vmatpush.msra.mxu2 %v1543_v6  ;;  %v1670_v5 = vld [vmem:[#allocation12 + $0xee0] sm:$0xff]  ;;  %v1696_v6 = vld [vmem:[#allocation12 + $0xfb0] sm:$0xff] }
 0x1f5   :  { %1601 = vmatpush.msra.mxu3 %v1518_v7  ;;  %1624 = vmatpush.msrb.mxu0 %v1544_v8  ;;  %v1671_v7 = vld [vmem:[#allocation12 + $0xee8] sm:$0xff]  ;;  %v1697_v8 = vld [vmem:[#allocation12 + $0xfb8] sm:$0xff] }
 0x1f6   :  { %1562 = vmatpush.msra.mxu1 %v1515_v9  ;;  %1585 = vmatpush.msra.mxu2 %v1541_v10  ;;  %v1668_v9 = vld [vmem:[#allocation12 + $0xed0] sm:$0xff]  ;;  %v1694_v10 = vld [vmem:[#allocation12 + $0xfa0] sm:$0xff] }
 0x1f7   :  { %1602 = vmatpush.msra.mxu3 %v1516_v11  ;;  %1625 = vmatpush.msrb.mxu0 %v1542_v12  ;;  %v1669_v11 = vld [vmem:[#allocation12 + $0xed8] sm:$0xff]  ;;  %v1695_v12 = vld [vmem:[#allocation12 + $0xfa8] sm:$0xff] }
 0x1f8   :  { %1563 = vmatpush.msra.mxu1 %v1513_v13  ;;  %1586 = vmatpush.msra.mxu2 %v1539_v14  ;;  %v1666_v13 = vld [vmem:[#allocation12 + $0xec0] sm:$0xff]  ;;  %v1692_v14 = vld [vmem:[#allocation12 + $0xf90] sm:$0xff] }
 0x1f9   :  { %1603 = vmatpush.msra.mxu3 %v1514_v15  ;;  %1626 = vmatpush.msrb.mxu0 %v1540_v16  ;;  %v1667_v15 = vld [vmem:[#allocation12 + $0xec8] sm:$0xff]  ;;  %v1693_v16 = vld [vmem:[#allocation12 + $0xf98] sm:$0xff] }
 0x1fa   :  { %1564 = vmatpush.msra.mxu1 %v1511_v17  ;;  %1587 = vmatpush.msra.mxu2 %v1537_v18  ;;  %v1664_v17 = vld [vmem:[#allocation12 + $0xeb0] sm:$0xff]  ;;  %v1690_v18 = vld [vmem:[#allocation12 + $0xf80] sm:$0xff] }
 0x1fb   :  { %1604 = vmatpush.msra.mxu3 %v1512_v19  ;;  %1627 = vmatpush.msrb.mxu0 %v1538_v20  ;;  %v1665_v19 = vld [vmem:[#allocation12 + $0xeb8] sm:$0xff]  ;;  %v1691_v20 = vld [vmem:[#allocation12 + $0xf88] sm:$0xff] }
 0x1fc   :  { %1565 = vmatpush.msra.mxu1 %v1509_v21  ;;  %1588 = vmatpush.msra.mxu2 %v1535_v23  ;;  %v1662_v21 = vld [vmem:[#allocation12 + $0xea0] sm:$0xff]  ;;  %v1688_v23 = vld [vmem:[#allocation12 + $0xf70] sm:$0xff] }
 0x1fd   :  { %1605 = vmatpush.msra.mxu3 %v1510_v24  ;;  %1628 = vmatpush.msrb.mxu0 %v1536_v25  ;;  %v1663_v24 = vld [vmem:[#allocation12 + $0xea8] sm:$0xff]  ;;  %v1689_v25 = vld [vmem:[#allocation12 + $0xf78] sm:$0xff] }
 0x1fe   :  { %1566 = vmatpush.msra.mxu1 %v1507_v26  ;;  %1589 = vmatpush.msra.mxu2 %v1533_v27  ;;  %v1660_v26 = vld [vmem:[#allocation12 + $0xe90] sm:$0xff]  ;;  %v1686_v27 = vld [vmem:[#allocation12 + $0xf60] sm:$0xff] }
 0x1ff   :  { %1606 = vmatpush.msra.mxu3 %v1508_v28  ;;  %1629 = vmatpush.msrb.mxu0 %v1534_v29  ;;  %v1661_v28 = vld [vmem:[#allocation12 + $0xe98] sm:$0xff]  ;;  %v1687_v29 = vld [vmem:[#allocation12 + $0xf68] sm:$0xff] }
 0x200   :  { %1567 = vmatpush.msra.mxu1 %v1505_v30  ;;  %1590 = vmatpush.msra.mxu2 %v1531_v31  ;;  %v1658_v30 = vld [vmem:[#allocation12 + $0xe80] sm:$0xff]  ;;  %v1684_v31 = vld [vmem:[#allocation12 + $0xf50] sm:$0xff] }
 0x201   :  { %1607 = vmatpush.msra.mxu3 %v1506_v32  ;;  %1630 = vmatpush.msrb.mxu0 %v1532_v33  ;;  %v1659_v32 = vld [vmem:[#allocation12 + $0xe88] sm:$0xff]  ;;  %v1685_v33 = vld [vmem:[#allocation12 + $0xf58] sm:$0xff] }
 0x202   :  { %1568 = vmatpush.msra.mxu1 %v1503_v34  ;;  %1591 = vmatpush.msra.mxu2 %v1529_v35  ;;  %v1656_v34 = vld [vmem:[#allocation12 + $0xe70] sm:$0xff]  ;;  %v1682_v35 = vld [vmem:[#allocation12 + $0xf40] sm:$0xff] }
 0x203   :  { %1608 = vmatpush.msra.mxu3 %v1504_v38  ;;  %1631 = vmatpush.msrb.mxu0 %v1530_v39  ;;  %v1657_v38 = vld [vmem:[#allocation12 + $0xe78] sm:$0xff]  ;;  %v1683_v39 = vld [vmem:[#allocation12 + $0xf48] sm:$0xff] }
 0x204   :  { %1569 = vmatpush.msra.mxu1 %v1501_v40  ;;  %1592 = vmatpush.msra.mxu2 %v1527_v41  ;;  %v1654_v40 = vld [vmem:[#allocation12 + $0xe60] sm:$0xff]  ;;  %v1680_v41 = vld [vmem:[#allocation12 + $0xf30] sm:$0xff] }
 0x205   :  { %1609 = vmatpush.msra.mxu3 %v1502_v42  ;;  %1632 = vmatpush.msrb.mxu0 %v1528_v43  ;;  %v1655_v42 = vld [vmem:[#allocation12 + $0xe68] sm:$0xff]  ;;  %v1681_v43 = vld [vmem:[#allocation12 + $0xf38] sm:$0xff] }
 0x206   :  { %1570 = vmatpush.msra.mxu1 %v1499_v44  ;;  %1593 = vmatpush.msra.mxu2 %v1525_v45  ;;  %v1652_v44 = vld [vmem:[#allocation12 + $0xe50] sm:$0xff]  ;;  %v1678_v45 = vld [vmem:[#allocation12 + $0xf20] sm:$0xff] }
 0x207   :  { %1610 = vmatpush.msra.mxu3 %v1500_v47  ;;  %1633 = vmatpush.msrb.mxu0 %v1526_v48  ;;  %v1653_v47 = vld [vmem:[#allocation12 + $0xe58] sm:$0xff]  ;;  %v1679_v48 = vld [vmem:[#allocation12 + $0xf28] sm:$0xff] }
 0x208   :  { %1571 = vmatpush.msra.mxu1 %v1497_v49  ;;  %1594 = vmatpush.msra.mxu2 %v1523_v51  ;;  %v1650_v49 = vld [vmem:[#allocation12 + $0xe40] sm:$0xff]  ;;  %v1676_v51 = vld [vmem:[#allocation12 + $0xf10] sm:$0xff] }
 0x209   :  { %1611 = vmatpush.msra.mxu3 %v1498_v52  ;;  %1634 = vmatpush.msrb.mxu0 %v1524_v53  ;;  %v1651_v52 = vld [vmem:[#allocation12 + $0xe48] sm:$0xff]  ;;  %v1677_v53 = vld [vmem:[#allocation12 + $0xf18] sm:$0xff] }
 0x20a   :  { %1595 = vmatmul.f32.vlgmr.msra.gmra.mxu2 %v1556_v22  ;;  %1635 = vmatmul.f32.vlgmr.msrb.gmra.mxu0 %v1556_v22  ;;  %v1648_v22 = vld [vmem:[#allocation12 + $0xe30] sm:$0xff] }
 0x20b   :  { %1730 = vmatpush.msrb.mxu2 %v1704_v54  ;;  %1770 = vmatpush.msra.mxu0 %v1705_v37  ;;  %v1674_v54 = vld [vmem:[#allocation12 + $0xf00] sm:$0xff]  ;;  %v1649_v37 = vld [vmem:[#allocation12 + $0xe38] sm:$0xff] }
 0x20c   :  { %1572 = vmatpush.msra.mxu1 %v1495_v55  ;;  %1612 = vmatpush.msra.mxu3 %v1496_v56  ;;  %v1675_v55 = vld [vmem:[#allocation12 + $0xf08] sm:$0xff]  ;;  %v1707_v56 = vrot.slane %v2721_v46, 6  ;;  %v2736_v46 = vpop.f32.mrf.mxu1 }
 0x20d   :  { %1731 = vmatpush.msrb.mxu2 %v1702_v57  ;;  %1771 = vmatpush.msra.mxu0 %v1703_v59  ;;  %v1646_v57 = vld [vmem:[#allocation12 + $0xe20] sm:$0xff]  ;;  %v1647_v59 = vld [vmem:[#allocation12 + $0xe28] sm:$0xff] }
 0x20e   :  { %1573 = vmatpush.msra.mxu1 %v1493_v60  ;;  %1613 = vmatpush.msra.mxu3 %v1494_v61  ;;  %v1644_v60 = vld [vmem:[#allocation12 + $0xe10] sm:$0xff]  ;;  %v1645_v61 = vld [vmem:[#allocation12 + $0xe18] sm:$0xff] }
 0x20f   :  { %1732 = vmatpush.msrb.mxu2 %v1700_v62  ;;  %1772 = vmatpush.msra.mxu0 %v1701_v63  ;;  %v1642_v62 = vld [vmem:[#allocation12 + $0xe00] sm:$0xff]  ;;  %v1643_v63 = vld [vmem:[#allocation12 + $0xe08] sm:$0xff] }
 0x210   :  { %1574 = vmatpush.msra.mxu1 %v1491_v0  ;;  %1614 = vmatpush.msra.mxu3 %v1492_v1  ;;  %v1706_v0 = vrot.slane %v2726_v58, 6  ;;  %v2738_v1 = vpop.f32.mrf.mxu2  ;;  %v1865_v58 = vld [vmem:[#allocation15 + $0x1f8] sm:$0xff] }
 0x211   :  { %1575 = vmatmul.f32.vlgmr.msra.gmra.mxu1 %v1555_v36  ;;  %1615 = vmatmul.f32.vlgmr.msra.gmra.mxu3 %v1555_v36  ;;  %v1832_v36 = vld [vmem:[#allocation15 + $0xf0] sm:$0xff] }
 0x212   :  { %1710 = vmatpush.msrb.mxu1 %v1672_v50  ;;  %1733 = vmatpush.msrb.mxu2 %v1698_v2  ;;  %v1833_v50 = vld [vmem:[#allocation15 + $0xf8] sm:$0xff]  ;;  %v1830_v2 = vld [vmem:[#allocation15 + $0xe0] sm:$0xff] }
 0x213   :  { %1750 = vmatpush.msrb.mxu3 %v1673_v3  ;;  %1773 = vmatpush.msra.mxu0 %v1699_v4  ;;  %v1831_v3 = vld [vmem:[#allocation15 + $0xe8] sm:$0xff]  ;;  %v1828_v4 = vld [vmem:[#allocation15 + $0xd0] sm:$0xff] }
 0x214   :  { %1711 = vmatpush.msrb.mxu1 %v1670_v5  ;;  %1734 = vmatpush.msrb.mxu2 %v1696_v6  ;;  %v1829_v5 = vld [vmem:[#allocation15 + $0xd8] sm:$0xff]  ;;  %v1864_v6 = vld [vmem:[#allocation15 + $0x1f0] sm:$0xff] }
 0x215   :  { %1751 = vmatpush.msrb.mxu3 %v1671_v7  ;;  %1774 = vmatpush.msra.mxu0 %v1697_v8  ;;  %v1862_v7 = vld [vmem:[#allocation15 + $0x1e0] sm:$0xff]  ;;  %v2740_v8 = vpop.f32.mrf.mxu0 }
 0x216   :  { %1712 = vmatpush.msrb.mxu1 %v1668_v9  ;;  %1735 = vmatpush.msrb.mxu2 %v1694_v10  ;;  %v2742_v9 = vpop.f32.mrf.mxu3  ;;  %v1826_v10 = vld [vmem:[#allocation15 + $0xc0] sm:$0xff] }
 0x217   :  { %1752 = vmatpush.msrb.mxu3 %v1669_v11  ;;  %1775 = vmatpush.msra.mxu0 %v1695_v12  ;;  %v1827_v11 = vld [vmem:[#allocation15 + $0xc8] sm:$0xff] }
 0x218   :  { %1713 = vmatpush.msrb.mxu1 %v1666_v13  ;;  %1736 = vmatpush.msrb.mxu2 %v1692_v14  ;;  %v1863_v12 = vld [vmem:[#allocation15 + $0x1e8] sm:$0xff]  ;;  %v1860_v13 = vld [vmem:[#allocation15 + $0x1d0] sm:$0xff]  ;;  %v1861_v14 = vld [vmem:[#allocation15 + $0x1d8] sm:$0xff] }
 0x219   :  { %1753 = vmatpush.msrb.mxu3 %v1667_v15  ;;  %1776 = vmatpush.msra.mxu0 %v1693_v16  ;;  %v1824_v15 = vld [vmem:[#allocation15 + $0xb0] sm:$0xff]  ;;  %v1825_v16 = vld [vmem:[#allocation15 + $0xb8] sm:$0xff] }
 0x21a   :  { %1714 = vmatpush.msrb.mxu1 %v1664_v17  ;;  %1737 = vmatpush.msrb.mxu2 %v1690_v18  ;;  %v1858_v17 = vld [vmem:[#allocation15 + $0x1c0] sm:$0xff]  ;;  %v1859_v18 = vld [vmem:[#allocation15 + $0x1c8] sm:$0xff] }
 0x21b   :  { %1754 = vmatpush.msrb.mxu3 %v1665_v19  ;;  %1777 = vmatpush.msra.mxu0 %v1691_v20  ;;  %v2744_v19 = vpop.f32.mrf.mxu1  ;;  %v2746_v20 = vpop.f32.mrf.mxu2 }
 0x21c   :  { %1715 = vmatpush.msrb.mxu1 %v1662_v21  ;;  %1738 = vmatpush.msrb.mxu2 %v1688_v23  ;;  %v1822_v21 = vld [vmem:[#allocation15 + $0xa0] sm:$0xff]  ;;  %v1823_v23 = vld [vmem:[#allocation15 + $0xa8] sm:$0xff] }
 0x21d   :  { %1755 = vmatpush.msrb.mxu3 %v1663_v24  ;;  %1778 = vmatpush.msra.mxu0 %v1689_v25  ;;  %v1856_v24 = vld [vmem:[#allocation15 + $0x1b0] sm:$0xff]  ;;  %v1857_v25 = vld [vmem:[#allocation15 + $0x1b8] sm:$0xff] }
 0x21e   :  { %1716 = vmatpush.msrb.mxu1 %v1660_v26  ;;  %1739 = vmatpush.msrb.mxu2 %v1686_v27  ;;  %v1820_v26 = vld [vmem:[#allocation15 + $0x90] sm:$0xff]  ;;  %v1821_v27 = vld [vmem:[#allocation15 + $0x98] sm:$0xff] }
 0x21f   :  { %1756 = vmatpush.msrb.mxu3 %v1661_v28  ;;  %1779 = vmatpush.msra.mxu0 %v1687_v29  ;;  %v1818_v28 = vld [vmem:[#allocation15 + $0x80] sm:$0xff]  ;;  %v1819_v29 = vld [vmem:[#allocation15 + $0x88] sm:$0xff] }
 0x220   :  { %1717 = vmatpush.msrb.mxu1 %v1658_v30  ;;  %1740 = vmatpush.msrb.mxu2 %v1684_v31  ;;  %v2748_v30 = vpop.f32.mrf.mxu0  ;;  %v2750_v31 = vpop.f32.mrf.mxu3 }
 0x221   :  { %1757 = vmatpush.msrb.mxu3 %v1659_v32  ;;  %1780 = vmatpush.msra.mxu0 %v1685_v33 }
 0x222   :  { %1718 = vmatpush.msrb.mxu1 %v1656_v34  ;;  %1741 = vmatpush.msrb.mxu2 %v1682_v35  ;;  %v1816_v34 = vld [vmem:[#allocation15 + $0x70] sm:$0xff]  ;;  %v1854_v35 = vld [vmem:[#allocation15 + $0x1a0] sm:$0xff] }
 0x223   :  { %1758 = vmatpush.msrb.mxu3 %v1657_v38  ;;  %1781 = vmatpush.msra.mxu0 %v1683_v39  ;;  %v2752_v32 = vpop.f32.mrf.mxu1  ;;  %v2754_v33 = vpop.f32.mrf.mxu2  ;;  %v1817_v38 = vld [vmem:[#allocation15 + $0x78] sm:$0xff]  ;;  %v1855_v39 = vld [vmem:[#allocation15 + $0x1a8] sm:$0xff] }
 0x224   :  { %1719 = vmatpush.msrb.mxu1 %v1654_v40  ;;  %1742 = vmatpush.msrb.mxu2 %v1680_v41  ;;  %v1814_v40 = vld [vmem:[#allocation15 + $0x60] sm:$0xff]  ;;  %v1852_v41 = vld [vmem:[#allocation15 + $0x190] sm:$0xff] }
 0x225   :  { %1759 = vmatpush.msrb.mxu3 %v1655_v42  ;;  %1782 = vmatpush.msra.mxu0 %v1681_v43  ;;  %v1815_v42 = vld [vmem:[#allocation15 + $0x68] sm:$0xff]  ;;  %v1853_v43 = vld [vmem:[#allocation15 + $0x198] sm:$0xff] }
 0x226   :  { %1720 = vmatpush.msrb.mxu1 %v1652_v44  ;;  %1743 = vmatpush.msrb.mxu2 %v1678_v45  ;;  %v1812_v44 = vld [vmem:[#allocation15 + $0x50] sm:$0xff]  ;;  %v1850_v45 = vld [vmem:[#allocation15 + $0x180] sm:$0xff] }
 0x227   :  { %1760 = vmatpush.msrb.mxu3 %v1653_v47  ;;  %1783 = vmatpush.msra.mxu0 %v1679_v48  ;;  %v1813_v47 = vld [vmem:[#allocation15 + $0x58] sm:$0xff]  ;;  %v1851_v48 = vld [vmem:[#allocation15 + $0x188] sm:$0xff] }
 0x228   :  { %1721 = vmatpush.msrb.mxu1 %v1650_v49  ;;  %1744 = vmatpush.msrb.mxu2 %v1676_v51  ;;  %v2756_v49 = vpop.f32.mrf.mxu0  ;;  %v2758_v51 = vpop.f32.mrf.mxu3 }
 0x229   :  { %1761 = vmatpush.msrb.mxu3 %v1651_v52  ;;  %1784 = vmatpush.msra.mxu0 %v1677_v53  ;;  %v1810_v52 = vld [vmem:[#allocation15 + $0x40] sm:$0xff]  ;;  %v1848_v53 = vld [vmem:[#allocation15 + $0x170] sm:$0xff] }
 0x22a   :  { %1722 = vmatpush.msrb.mxu1 %v1648_v22  ;;  %1745 = vmatpush.msrb.mxu2 %v1674_v54  ;;  %v1811_v22 = vld [vmem:[#allocation15 + $0x48] sm:$0xff] }
 0x22b   :  { %1762 = vmatpush.msrb.mxu3 %v1649_v37  ;;  %1785 = vmatpush.msra.mxu0 %v1675_v55  ;;  %v2760_v54 = vpop.f32.mrf.mxu1  ;;  %v2762_v37 = vpop.f32.mrf.mxu2  ;;  %v1849_v55 = vld [vmem:[#allocation15 + $0x178] sm:$0xff] }
 0x22c   :  { %1746 = vmatmul.f32.vlgmr.msrb.gmra.mxu2 %v1707_v56  ;;  %1786 = vmatmul.f32.vlgmr.msra.gmra.mxu0 %v1707_v56  ;;  %v1808_v56 = vld [vmem:[#allocation15 + $0x30] sm:$0xff] }
 0x22d   :  { %1723 = vmatpush.msrb.mxu1 %v1646_v57  ;;  %1763 = vmatpush.msrb.mxu3 %v1647_v59  ;;  %v1846_v57 = vld [vmem:[#allocation15 + $0x160] sm:$0xff]  ;;  %v1809_v59 = vld [vmem:[#allocation15 + $0x38] sm:$0xff] }
 0x22e   :  { %1892 = vmatpush.msra.mxu2 %v1864_v6  ;;  %1932 = vmatpush.msrb.mxu0 %v1865_v58  ;;  %v1802_v6 = vld [vmem:[#allocation15] sm:$0xff]  ;;  %v1840_v58 = vld [vmem:[#allocation15 + $0x130] sm:$0xff] }
 0x22f   :  { %1724 = vmatpush.msrb.mxu1 %v1644_v60  ;;  %1764 = vmatpush.msrb.mxu3 %v1645_v61  ;;  %v1847_v60 = vld [vmem:[#allocation15 + $0x168] sm:$0xff]  ;;  %v1806_v61 = vld [vmem:[#allocation15 + $0x20] sm:$0xff] }
 0x230   :  { %1893 = vmatpush.msra.mxu2 %v1862_v7  ;;  %1933 = vmatpush.msrb.mxu0 %v1863_v12  ;;  %v1803_v7 = vld [vmem:[#allocation15 + $0x8] sm:$0xff]  ;;  %v1841_v12 = vld [vmem:[#allocation15 + $0x138] sm:$0xff] }
 0x231   :  { %1725 = vmatpush.msrb.mxu1 %v1642_v62  ;;  %1765 = vmatpush.msrb.mxu3 %v1643_v63  ;;  %v1844_v62 = vld [vmem:[#allocation15 + $0x150] sm:$0xff]  ;;  %v1807_v63 = vld [vmem:[#allocation15 + $0x28] sm:$0xff] }
 0x232   :  { %1726 = vmatmul.f32.vlgmr.msrb.gmra.mxu1 %v1706_v0  ;;  %1766 = vmatmul.f32.vlgmr.msrb.gmra.mxu3 %v1706_v0  ;;  %v1845_v0 = vld [vmem:[#allocation15 + $0x158] sm:$0xff] }
 0x233   :  { %1872 = vmatpush.msra.mxu1 %v1832_v36  ;;  %1912 = vmatpush.msra.mxu3 %v1833_v50  ;;  %v1804_v36 = vld [vmem:[#allocation15 + $0x10] sm:$0xff]  ;;  %v1842_v50 = vld [vmem:[#allocation15 + $0x140] sm:$0xff] }
 0x234   :  { %1894 = vmatpush.msra.mxu2 %v1860_v13  ;;  %1934 = vmatpush.msrb.mxu0 %v1861_v14  ;;  %v1838_v13 = vld [vmem:[#allocation15 + $0x120] sm:$0xff]  ;;  %v1839_v14 = vld [vmem:[#allocation15 + $0x128] sm:$0xff] }
 0x235   :  { %1873 = vmatpush.msra.mxu1 %v1830_v2  ;;  %1913 = vmatpush.msra.mxu3 %v1831_v3  ;;  %v1805_v2 = vld [vmem:[#allocation15 + $0x18] sm:$0xff]  ;;  %v2764_v3 = vpop.f32.mrf.mxu0 }
 0x236   :  { %1895 = vmatpush.msra.mxu2 %v1858_v17  ;;  %1935 = vmatpush.msrb.mxu0 %v1859_v18  ;;  %v1834_v17 = vld [vmem:[#allocation15 + $0x100] sm:$0xff]  ;;  %v1835_v18 = vld [vmem:[#allocation15 + $0x108] sm:$0xff] }
 0x237   :  { %1874 = vmatpush.msra.mxu1 %v1828_v4  ;;  %1914 = vmatpush.msra.mxu3 %v1829_v5  ;;  %v2766_v4 = vpop.f32.mrf.mxu3  ;;  %v1843_v5 = vld [vmem:[#allocation15 + $0x148] sm:$0xff] }
 0x238   :  { %1896 = vmatpush.msra.mxu2 %v1856_v24  ;;  %1936 = vmatpush.msrb.mxu0 %v1857_v25  ;;  %v2016_v24 = vld [vmem:[#allocation18 + $0x1f0] sm:$0xff]  ;;  %v2017_v25 = vld [vmem:[#allocation18 + $0x1f8] sm:$0xff] }
 0x239   :  { %1875 = vmatpush.msra.mxu1 %v1826_v10  ;;  %1915 = vmatpush.msra.mxu3 %v1827_v11 }
 0x23a   :  { %1897 = vmatpush.msra.mxu2 %v1854_v35  ;;  %1937 = vmatpush.msrb.mxu0 %v1855_v39  ;;  %v2012_v35 = vld [vmem:[#allocation18 + $0x1d0] sm:$0xff]  ;;  %v1985_v39 = vld [vmem:[#allocation18 + $0xf8] sm:$0xff] }
 0x23b   :  { %1876 = vmatpush.msra.mxu1 %v1824_v15  ;;  %1916 = vmatpush.msra.mxu3 %v1825_v16  ;;  %v1836_v15 = vld [vmem:[#allocation15 + $0x110] sm:$0xff]  ;;  %v1837_v16 = vld [vmem:[#allocation15 + $0x118] sm:$0xff] }
 0x23c   :  { %1898 = vmatpush.msra.mxu2 %v1852_v41  ;;  %1938 = vmatpush.msrb.mxu0 %v1853_v43  ;;  %v1982_v41 = vld [vmem:[#allocation18 + $0xe0] sm:$0xff] }
 0x23d   :  { %1877 = vmatpush.msra.mxu1 %v1822_v21  ;;  %1917 = vmatpush.msra.mxu3 %v1823_v23 }
 0x23e   :  { %1899 = vmatpush.msra.mxu2 %v1850_v45  ;;  %1939 = vmatpush.msrb.mxu0 %v1851_v48  ;;  %v2011_v45 = vld [vmem:[#allocation18 + $0x1c8] sm:$0xff]  ;;  %v1981_v48 = vld [vmem:[#allocation18 + $0xd8] sm:$0xff] }
 0x23f   :  { %1878 = vmatpush.msra.mxu1 %v1820_v26  ;;  %1918 = vmatpush.msra.mxu3 %v1821_v27  ;;  %v2014_v26 = vld [vmem:[#allocation18 + $0x1e0] sm:$0xff] }
 0x240   :  { %1900 = vmatpush.msra.mxu2 %v1848_v53  ;;  %1940 = vmatpush.msrb.mxu0 %v1849_v55  ;;  %v2009_v53 = vld [vmem:[#allocation18 + $0x1b8] sm:$0xff] }
 0x241   :  { %1879 = vmatpush.msra.mxu1 %v1818_v28  ;;  %1919 = vmatpush.msra.mxu3 %v1819_v29  ;;  %v2015_v29 = vld [vmem:[#allocation18 + $0x1e8] sm:$0xff] }
 0x242   :  { %1901 = vmatpush.msra.mxu2 %v1846_v57  ;;  %1941 = vmatpush.msrb.mxu0 %v1847_v60  ;;  %v1976_v57 = vld [vmem:[#allocation18 + $0xb0] sm:$0xff]  ;;  %v1146_v60 = vadd.f32 %v2762_v37, %v2760_v54  ;;  %v2005_v54 = vld [vmem:[#allocation18 + $0x198] sm:$0xff]  ;;  %v1035_v37 = vadd.f32 %v2756_v49, %v2758_v51 }
 0x243   :  { %1880 = vmatpush.msra.mxu1 %v1816_v34  ;;  %1920 = vmatpush.msra.mxu3 %v1817_v38  ;;  %v2772_v21 = vpop.f32.mrf.mxu0  ;;  %v1984_v34 = vld [vmem:[#allocation18 + $0xf0] sm:$0xff]  ;;  %v766_v38 = vadd.f32 %v2738_v1, %v2736_v46  ;;  %v995_v46 = vadd.f32 %v2754_v33, %v2752_v32  ;;  %v2006_v32 = vld [vmem:[#allocation18 + $0x1a0] sm:$0xff]  ;;  %v2007_v33 = vld [vmem:[#allocation18 + $0x1a8] sm:$0xff] }
 0x244   :  { %1902 = vmatpush.msra.mxu2 %v1844_v62  ;;  %1942 = vmatpush.msrb.mxu0 %v1845_v0  ;;  %v2008_v1 = vld [vmem:[#allocation18 + $0x1b0] sm:$0xff] }
 0x245   :  { %1881 = vmatpush.msra.mxu1 %v1814_v40  ;;  %1921 = vmatpush.msra.mxu3 %v1815_v42  ;;  %v2013_v40 = vld [vmem:[#allocation18 + $0x1d8] sm:$0xff]  ;;  %v1983_v42 = vld [vmem:[#allocation18 + $0xe8] sm:$0xff]  ;;  %v826_v43 = vadd.f32 %v2744_v19, %v766_v38  ;;  %v2000_v51 = vld [vmem:[#allocation18 + $0x170] sm:$0xff] }
 0x246   :  { %1903 = vmatpush.msra.mxu2 %v1842_v50  ;;  %1943 = vmatpush.msrb.mxu0 %v1843_v5  ;;  %v1972_v50 = vld [vmem:[#allocation18 + $0x90] sm:$0xff] }
 0x247   :  { %1882 = vmatpush.msra.mxu1 %v1812_v44  ;;  %1922 = vmatpush.msra.mxu3 %v1813_v47  ;;  %v2010_v44 = vld [vmem:[#allocation18 + $0x1c0] sm:$0xff]  ;;  %v1980_v47 = vld [vmem:[#allocation18 + $0xd0] sm:$0xff] }
 0x248   :  { %1904 = vmatpush.msra.mxu2 %v1840_v58  ;;  %1944 = vmatpush.msrb.mxu0 %v1841_v12  ;;  %v2003_v58 = vld [vmem:[#allocation18 + $0x188] sm:$0xff] }
 0x249   :  { %1883 = vmatpush.msra.mxu1 %v1810_v52  ;;  %1923 = vmatpush.msra.mxu3 %v1811_v22  ;;  %v2770_v11 = vpop.f32.mrf.mxu2  ;;  %v1978_v52 = vld [vmem:[#allocation18 + $0xc0] sm:$0xff]  ;;  %v806_v22 = vadd.f32 %v2740_v8, %v2742_v9  ;;  %v1977_v8 = vld [vmem:[#allocation18 + $0xb8] sm:$0xff] }
 0x24a   :  { %v2768_v10 = vpop.f32.mrf.mxu1  ;;  %1905 = vmatpush.msra.mxu2 %v1838_v13  ;;  %1945 = vmatpush.msrb.mxu0 %v1839_v14  ;;  %v1974_v9 = vld [vmem:[#allocation18 + $0xa0] sm:$0xff]  ;;  %v2001_v13 = vld [vmem:[#allocation18 + $0x178] sm:$0xff] }
 0x24b   :  { %1884 = vmatpush.msra.mxu1 %v1808_v56  ;;  %1924 = vmatpush.msra.mxu3 %v1809_v59  ;;  %v1979_v56 = vld [vmem:[#allocation18 + $0xc8] sm:$0xff]  ;;  %v846_v59 = vadd.f32 %v2746_v20, %v826_v43  ;;  %v2004_v20 = vld [vmem:[#allocation18 + $0x190] sm:$0xff] }
 0x24c   :  { %1906 = vmatpush.msra.mxu2 %v1836_v15  ;;  %1946 = vmatpush.msrb.mxu0 %v1837_v16 }
 0x24d   :  { %1885 = vmatpush.msra.mxu1 %v1806_v61  ;;  %1925 = vmatpush.msra.mxu3 %v1807_v63  ;;  %v866_v61 = vadd.f32 %v2750_v31, %v806_v22  ;;  %v1037_v0 = vadd.f32 %v995_v46, %v846_v59  ;;  %v1975_v31 = vld [vmem:[#allocation18 + $0xa8] sm:$0xff]  ;;  %v1996_v22 = vld [vmem:[#allocation18 + $0x150] sm:$0xff] }
 0x24e   :  { %1907 = vmatpush.msra.mxu2 %v1834_v17  ;;  %1947 = vmatpush.msrb.mxu0 %v1835_v18  ;;  %v1792_v17 = vld [vmem:[#allocation13] sm:$0x3]  ;;  %v1971_v46 = vld [vmem:[#allocation18 + $0x88] sm:$0xff] }
 0x24f   :  { %1886 = vmatpush.msra.mxu1 %v1804_v36  ;;  %1926 = vmatpush.msra.mxu3 %v1805_v2  ;;  %v1293_v36 = vadd.f32 %v2770_v11, %v2768_v10  ;;  %v1188_v2 = vadd.f32 %v1146_v60, %v1037_v0  ;;  %v1186_v10 = vadd.f32 %v2764_v3, %v2766_v4  ;;  %v1973_v11 = vld [vmem:[#allocation18 + $0x98] sm:$0xff]  ;;  %v1795_v43 = vperm.slane %v1792_v17, 1  ;;  %v1967_v59 = vld [vmem:[#allocation18 + $0x68] sm:$0xff] }
 0x250   :  { %v2774_v23 = vpop.f32.mrf.mxu3  ;;  %2044 = vmatpush.msrb.mxu2 %v2016_v24  ;;  %2084 = vmatpush.msra.mxu0 %v2017_v25  ;;  %v1995_v60 = vld [vmem:[#allocation18 + $0x148] sm:$0xff] }
 0x251   :  { %1887 = vmatpush.msra.mxu1 %v1802_v6  ;;  %1927 = vmatpush.msra.mxu3 %v1803_v7  ;;  %v2002_v6 = vld [vmem:[#allocation18 + $0x180] sm:$0xff]  ;;  %v886_v7 = vadd.f32 %v2748_v30, %v866_v61  ;;  %v1335_v12 = vadd.f32 %v1293_v36, %v1188_v2  ;;  %v1333_v30 = vadd.f32 %v2772_v21, %v2774_v23  ;;  %v1965_v61 = vld [vmem:[#allocation18 + $0x58] sm:$0xff]  ;;  %v1991_v0 = vld [vmem:[#allocation18 + $0x128] sm:$0xff] }
 0x252   :  { %2045 = vmatpush.msrb.mxu2 %v2014_v26  ;;  %2085 = vmatpush.msra.mxu0 %v2015_v29  ;;  %v1960_v36 = vld [vmem:[#allocation18 + $0x30] sm:$0xff]  ;;  %v1959_v2 = vld [vmem:[#allocation18 + $0x28] sm:$0xff] }
 0x253   :  { %2024 = vmatpush.msrb.mxu1 %v1984_v34  ;;  %2064 = vmatpush.msrb.mxu3 %v1985_v39  ;;  %v1038_v14 = vadd.f32 %v1035_v37, %v886_v7  ;;  %v1989_v37 = vld [vmem:[#allocation18 + $0x118] sm:$0xff]  ;;  %v1954_v7 = vld [vmem:[#allocation18] sm:$0xff] }
 0x254   :  { %2046 = vmatpush.msrb.mxu2 %v2012_v35  ;;  %2086 = vmatpush.msra.mxu0 %v2013_v40 }
 0x255   :  { %2025 = vmatpush.msrb.mxu1 %v1982_v41  ;;  %2065 = vmatpush.msrb.mxu3 %v1983_v42  ;;  %v1189_v3 = vadd.f32 %v1186_v10, %v1038_v14  ;;  %v1955_v10 = vld [vmem:[#allocation18 + $0x8] sm:$0xff]  ;;  %v2135_v14 = vld [vmem:[%s2908_s11 + $0xe8] sm:$0xff] }
 0x256   :  { %2047 = vmatpush.msrb.mxu2 %v2010_v44  ;;  %2087 = vmatpush.msra.mxu0 %v2011_v45 }
 0x257   :  { %2026 = vmatpush.msrb.mxu1 %v1980_v47  ;;  %2066 = vmatpush.msrb.mxu3 %v1981_v48  ;;  %v1336_v29 = vadd.f32 %v1333_v30, %v1189_v3  ;;  %v1970_v48 = vld [vmem:[#allocation18 + $0x80] sm:$0xff]  ;;  %v2132_v3 = vld [vmem:[%s2908_s11 + $0xd0] sm:$0xff] }
 0x258   :  { %2048 = vmatpush.msrb.mxu2 %v2008_v1  ;;  %2088 = vmatpush.msra.mxu0 %v2009_v53  ;;  %v1999_v1 = vld [vmem:[#allocation18 + $0x168] sm:$0xff]  ;;  %v1968_v53 = vld [vmem:[#allocation18 + $0x70] sm:$0xff]  ;;  %v2133_v30 = vld [vmem:[%s2908_s11 + $0xd8] sm:$0xff] }
 0x259   :  { %2027 = vmatpush.msrb.mxu1 %v1978_v52  ;;  %2067 = vmatpush.msrb.mxu3 %v1979_v56  ;;  %v1998_v52 = vld [vmem:[#allocation18 + $0x160] sm:$0xff] }
 0x25a   :  { %2049 = vmatpush.msrb.mxu2 %v2006_v32  ;;  %2089 = vmatpush.msra.mxu0 %v2007_v33  ;;  %v1966_v56 = vld [vmem:[#allocation18 + $0x60] sm:$0xff]  ;;  %v1964_v32 = vld [vmem:[#allocation18 + $0x50] sm:$0xff] }
 0x25b   :  { %2028 = vmatpush.msrb.mxu1 %v1976_v57  ;;  %2068 = vmatpush.msrb.mxu3 %v1977_v8  ;;  %v1994_v57 = vld [vmem:[#allocation18 + $0x140] sm:$0xff]  ;;  %v1992_v33 = vld [vmem:[#allocation18 + $0x130] sm:$0xff] }
 0x25c   :  { %2050 = vmatpush.msrb.mxu2 %v2004_v20  ;;  %2090 = vmatpush.msra.mxu0 %v2005_v54  ;;  %v1990_v8 = vld [vmem:[#allocation18 + $0x120] sm:$0xff]  ;;  %v1988_v20 = vld [vmem:[#allocation18 + $0x110] sm:$0xff]  ;;  %v1961_v54 = vld [vmem:[#allocation18 + $0x38] sm:$0xff] }
 0x25d   :  { %2029 = vmatpush.msrb.mxu1 %v1974_v9  ;;  %2069 = vmatpush.msrb.mxu3 %v1975_v31  ;;  %v1963_v9 = vld [vmem:[#allocation18 + $0x48] sm:$0xff]  ;;  %v1958_v31 = vld [vmem:[#allocation18 + $0x20] sm:$0xff] }
 0x25e   :  { %2051 = vmatpush.msrb.mxu2 %v2002_v6  ;;  %2091 = vmatpush.msra.mxu0 %v2003_v58  ;;  %v1956_v6 = vld [vmem:[#allocation18 + $0x10] sm:$0xff]  ;;  %v1957_v58 = vld [vmem:[#allocation18 + $0x18] sm:$0xff] }
 0x25f   :  { %2030 = vmatpush.msrb.mxu1 %v1972_v50  ;;  %2070 = vmatpush.msrb.mxu3 %v1973_v11  ;;  %v1986_v50 = vld [vmem:[#allocation18 + $0x100] sm:$0xff] }
 0x260   :  { %2052 = vmatpush.msrb.mxu2 %v2000_v51  ;;  %2092 = vmatpush.msra.mxu0 %v2001_v13  ;;  %v2121_v11 = vld [vmem:[%s2908_s11 + $0x78] sm:$0xff]  ;;  %v2119_v51 = vld [vmem:[%s2908_s11 + $0x68] sm:$0xff]  ;;  %v2136_v13 = vld [vmem:[%s2908_s11 + $0xf0] sm:$0xff] }
 0x261   :  { %2031 = vmatpush.msrb.mxu1 %v1970_v48  ;;  %2071 = vmatpush.msrb.mxu3 %v1971_v46  ;;  %v2110_v48 = vld [vmem:[%s2908_s11 + $0x20] sm:$0xff]  ;;  %v2109_v46 = vld [vmem:[%s2908_s11 + $0x18] sm:$0xff] }
 0x262   :  { %2053 = vmatpush.msrb.mxu2 %v1998_v52  ;;  %2093 = vmatpush.msra.mxu0 %v1999_v1  ;;  %v2129_v52 = vld [vmem:[%s2908_s11 + $0xb8] sm:$0xff]  ;;  %v2128_v1 = vld [vmem:[%s2908_s11 + $0xb0] sm:$0xff] }
 0x263   :  { %2032 = vmatpush.msrb.mxu1 %v1968_v53  ;;  %v2108_v53 = vld [vmem:[%s2908_s11 + $0x10] sm:$0xff] }
 0x264   :  { %2054 = vmatpush.msrb.mxu2 %v1996_v22  ;;  %v2127_v22 = vld [vmem:[%s2908_s11 + $0xa8] sm:$0xff] }
 0x265   :  { %v1485_v19 = vpop.f32.mrf.mxu0  ;;  %2033 = vmatpush.msrb.mxu1 %v1966_v56  ;;  %v2106_v56 = vld [vmem:[%s2908_s11] sm:$0xff] }
 0x266   :  { %2055 = vmatpush.msrb.mxu2 %v1994_v57  ;;  %v2125_v57 = vld [vmem:[%s2908_s11 + $0x98] sm:$0xff] }
 0x267   :  { %2034 = vmatpush.msrb.mxu1 %v1964_v32  ;;  %v2122_v32 = vld [vmem:[%s2908_s11 + $0x80] sm:$0xff] }
 0x268   :  { %2056 = vmatpush.msrb.mxu2 %v1992_v33  ;;  %v2018_v33 = vld [vmem:[#allocation19] sm:$0x3] }
 0x26a   :  { %2057 = vmatpush.msrb.mxu2 %v1990_v8 }
 0x26b   :  { %v1445_v28 = vpop.f32.mrf.mxu2 }
 0x26c   :  { %v1425_v27 = vpop.f32.mrf.mxu1  ;;  %2058 = vmatpush.msrb.mxu2 %v1988_v20 }
 0x26d   :  { %v1446_v5 = vadd.f32 %v1445_v28, %v1425_v27  ;;  %v1794_v28 = vperm.slane %v1792_v17, 0  ;;  %v2117_v17 = vld [vmem:[%s2908_s11 + $0x58] sm:$0xff] }
 0x26e   :  { %2059 = vmatpush.msrb.mxu2 %v1986_v50 }
 0x26f   :  { %v1488_v18 = vadd.f32 %v1446_v5, %v1335_v12  ;;  %v1987_v5 = vld [vmem:[#allocation18 + $0x108] sm:$0xff]  ;;  %v2120_v12 = vld [vmem:[%s2908_s11 + $0x70] sm:$0xff] }
 0x272   :  { %v1465_v55 = vpop.f32.mrf.mxu3 }
 0x273   :  { %v1486_v25 = vadd.f32 %v1485_v19, %v1465_v55  ;;  %v1969_v19 = vld [vmem:[#allocation18 + $0x78] sm:$0xff] }
 0x274   :  { %v1997_v55 = vld [vmem:[#allocation18 + $0x158] sm:$0xff]  ;;  %2072 = vmatpush.msrb.mxu3 %v1969_v19  ;;  %v2107_v19 = vld [vmem:[%s2908_s11 + $0x8] sm:$0xff] }
 0x275   :  { %v1489_v38 = vadd.f32 %v1486_v25, %v1336_v29  ;;  %2094 = vmatpush.msra.mxu0 %v1997_v55  ;;  %v2114_v25 = vld [vmem:[%s2908_s11 + $0x40] sm:$0xff] }
 0x276   :  { %2073 = vmatpush.msrb.mxu3 %v1967_v59  ;;  %v2126_v55 = vld [vmem:[%s2908_s11 + $0xa0] sm:$0xff]  ;;  %v2124_v59 = vld [vmem:[%s2908_s11 + $0x90] sm:$0xff] }
 0x277   :  { %2095 = vmatpush.msra.mxu0 %v1995_v60  ;;  %v2123_v60 = vld [vmem:[%s2908_s11 + $0x88] sm:$0xff] }
 0x278   :  { %2074 = vmatpush.msrb.mxu3 %v1965_v61  ;;  %v2020_v61 = vperm.slane %v2018_v33, 0 }
 0x27a   :  { %2075 = vmatpush.msrb.mxu3 %v1963_v9 }
 0x27c   :  { %2076 = vmatpush.msrb.mxu3 %v1961_v54 }
 0x27e   :  { %2077 = vmatpush.msrb.mxu3 %v1959_v2  ;;  %v2581_v2 = vmov 0  }
 0x27f   :  { %2257 = vset.pattern.permute.xlu1 %v2581_v2  ;;  %2258 = vset.pattern.permute.xlu0 %v2581_v2 }
 0x280   :  { %2078 = vmatpush.msrb.mxu3 %v1957_v58 }
 0x282   :  { %2079 = vmatpush.msrb.mxu3 %v1955_v10 }
 0x287   :  { %v1636_v15 = vpop.f32.mrf.mxu0 }
 0x28d   :  { %v1596_v63 = vpop.f32.mrf.mxu2 }
 0x28e   :  { %v1576_v62 = vpop.f32.mrf.mxu1 }
 0x28f   :  { %v1597_v49 = vadd.f32 %v1596_v63, %v1576_v62  ;;  %v1993_v62 = vld [vmem:[#allocation18 + $0x138] sm:$0xff]  ;;  %v1962_v63 = vld [vmem:[#allocation18 + $0x40] sm:$0xff] }
 0x290   :  { %2096 = vmatpush.msra.mxu0 %v1993_v62  ;;  %2035 = vmatpush.msrb.mxu1 %v1962_v63 }
 0x291   :  { %v1639_v26 = vadd.f32 %v1597_v49, %v1488_v18  ;;  %v2137_v49 = vld [vmem:[%s2908_s11 + $0xf8] sm:$0xff]  ;;  %v2116_v18 = vld [vmem:[%s2908_s11 + $0x50] sm:$0xff] }
 0x292   :  { %2097 = vmatpush.msra.mxu0 %v1991_v0  ;;  %2036 = vmatpush.msrb.mxu1 %v1960_v36  ;;  %v2021_v0 = vperm.slane %v2018_v33, 1 }
 0x294   :  { %v1616_v16 = vpop.f32.mrf.mxu3  ;;  %2098 = vmatpush.msra.mxu0 %v1989_v37  ;;  %2037 = vmatpush.msrb.mxu1 %v1958_v31 }
 0x295   :  { %v1637_v34 = vadd.f32 %v1636_v15, %v1616_v16  ;;  %v2118_v15 = vld [vmem:[%s2908_s11 + $0x60] sm:$0xff] }
 0x296   :  { %2099 = vmatpush.msra.mxu0 %v1987_v5  ;;  %2038 = vmatpush.msrb.mxu1 %v1956_v6  ;;  %v2134_v16 = vld [vmem:[%s2908_s11 + $0xe0] sm:$0xff]  ;;  %v2260_v5 = vld [vmem:[#allocation21] ss:$0 sm:$0xff] }
 0x297   :  { %v1640_v42 = vadd.f32 %v1637_v34, %v1489_v38 }
 0x298   :  { %2039 = vmatpush.msrb.mxu1 %v1954_v7 }
 0x2a9   :  { %v1787_v40 = vpop.f32.mrf.mxu0 }
 0x2af   :  { %v1727_v4 = vpop.f32.mrf.mxu1  ;;  %v1747_v24 = vpop.f32.mrf.mxu2 }
 0x2b0   :  { %v1748_v27 = vadd.f32 %v1747_v24, %v1727_v4  ;;  %v2115_v4 = vld [vmem:[%s2908_s11 + $0x48] sm:$0xff] }
 0x2b1   :  { %v2131_v24 = vld [vmem:[%s2908_s11 + $0xc8] sm:$0xff] }
 0x2b2   :  { %v1790_v35 = vadd.f32 %v1748_v27, %v1639_v26  ;;  %v2113_v26 = vld [vmem:[%s2908_s11 + $0x38] sm:$0xff]  ;;  %v2112_v27 = vld [vmem:[%s2908_s11 + $0x30] sm:$0xff] }
 0x2b4   :  { %v1798_v39 = vadd.f32 %v1794_v28, %v1790_v35  ;;  %v1866_v28 = vld [vmem:[#allocation16] sm:$0x3] }
 0x2b5   :  { %v1767_v41 = vpop.f32.mrf.mxu3  ;;  %v1869_v29 = vperm.slane %v1866_v28, 1  ;;  %v1868_v35 = vperm.slane %v1866_v28, 0 }
 0x2b6   :  { %v1800_v21 = vmax.f32 %v1798_v39, 0.0  ;;  %v1788_v23 = vadd.f32 %v1787_v40, %v1767_v41 }
 0x2b8   :  { %v1791_v44 = vadd.f32 %v1788_v23, %v1640_v42  ;;  %1888 = vmatmul.f32.vlgmr.msra.gmra.mxu1 %v1800_v21  ;;  %1928 = vmatmul.f32.vlgmr.msra.gmra.mxu3 %v1800_v21 }
 0x2b9   :  { %2142 = vmatpush.msra.mxu1 %v2121_v11 }
 0x2ba   :  { %v1799_v45 = vadd.f32 %v1795_v43, %v1791_v44 }
 0x2bb   :  { %2143 = vmatpush.msra.mxu1 %v2120_v12 }
 0x2bc   :  { %v1801_v47 = vmax.f32 %v1799_v45, 0.0  ;;  %v2111_v45 = vld [vmem:[%s2908_s11 + $0x28] sm:$0xff] }
 0x2bd   :  { %2144 = vmatpush.msra.mxu1 %v2119_v51 }
 0x2be   :  { %1908 = vmatmul.f32.vlgmr.msra.gmra.mxu2 %v1801_v47  ;;  %1948 = vmatmul.f32.vlgmr.msrb.gmra.mxu0 %v1801_v47  ;;  %v2130_v47 = vld [vmem:[%s2908_s11 + $0xc0] sm:$0xff]  ;;  %s2582_s11 = smov 127  }
 0x2bf   :  { %2162 = vmatpush.msra.mxu2 %v2137_v49  ;;  %2145 = vmatpush.msra.mxu1 %v2118_v15  ;;  %v2583_v49 = vmov 6.0  }
 0x2c0   :  { %2261 = vrcp.f32 %v2583_v49 }
 0x2c1   :  { %2163 = vmatpush.msra.mxu2 %v2136_v13  ;;  %2146 = vmatpush.msra.mxu1 %v2117_v17 }
 0x2c3   :  { %2164 = vmatpush.msra.mxu2 %v2135_v14  ;;  %2147 = vmatpush.msra.mxu1 %v2116_v18 }
 0x2c5   :  { %2165 = vmatpush.msra.mxu2 %v2134_v16  ;;  %2148 = vmatpush.msra.mxu1 %v2115_v4 }
 0x2c6   :  { %v2262_v51 = vpop.eup %2261 }
 0x2c7   :  { %2166 = vmatpush.msra.mxu2 %v2133_v30  ;;  %2149 = vmatpush.msra.mxu1 %v2114_v25  ;;  %v2191_v13 = vmul.f32 6.0, %v2262_v51  ;;  %vm2195_vm3 = vweird.f32 %v2262_v51 }
 0x2c9   :  { %2167 = vmatpush.msra.mxu2 %v2132_v3  ;;  %2150 = vmatpush.msra.mxu1 %v2113_v26  ;;  %v2192_v14 = vsub.f32 1.0, %v2191_v13 }
 0x2cb   :  { %2168 = vmatpush.msra.mxu2 %v2131_v24  ;;  %2151 = vmatpush.msra.mxu1 %v2112_v27  ;;  %v2193_v15 = vmul.f32 %v2262_v51, %v2192_v14 }
 0x2cd   :  { %2152 = vmatpush.msra.mxu1 %v2111_v45  ;;  %2169 = vmatpush.msra.mxu2 %v2130_v47  ;;  %v2194_v16 = vadd.f32 %v2262_v51, %v2193_v15 }
 0x2cf   :  { %2153 = vmatpush.msra.mxu1 %v2110_v48  ;;  %2170 = vmatpush.msra.mxu2 %v2129_v52  ;;  %v2196_v17 = vsel %vm2195_vm3, %v2262_v51, %v2194_v16 }
 0x2d1   :  { %2154 = vmatpush.msra.mxu1 %v2109_v46  ;;  %2171 = vmatpush.msra.mxu2 %v2128_v1 }
 0x2d3   :  { %2155 = vmatpush.msra.mxu1 %v2108_v53  ;;  %2172 = vmatpush.msra.mxu2 %v2127_v22 }
 0x2d5   :  { %2156 = vmatpush.msra.mxu1 %v2107_v19  ;;  %2173 = vmatpush.msra.mxu2 %v2126_v55 }
 0x2d7   :  { %2157 = vmatpush.msra.mxu1 %v2106_v56  ;;  %2174 = vmatpush.msra.mxu2 %v2125_v57 }
 0x2d9   :  { %2175 = vmatpush.msra.mxu2 %v2124_v59 }
 0x2db   :  { %2176 = vmatpush.msra.mxu2 %v2123_v60 }
 0x2dd   :  { %2177 = vmatpush.msra.mxu2 %v2122_v32 }
 0x335   :  { %v1889_v39 = vpop.f32.mrf.mxu1 }
 0x336   :  { %v1890_v42 = vadd.f32 %v1889_v39, %v1868_v35 }
 0x33b   :  { %v1929_v34 = vpop.f32.mrf.mxu3  ;;  %v1949_v40 = vpop.f32.mrf.mxu0 }
 0x33c   :  { %v1930_v38 = vadd.f32 %v1929_v34, %v1869_v29 }
 0x33e   :  { %v1950_v41 = vadd.f32 %v1949_v40, %v1930_v38 }
 0x340   :  { %v1953_v21 = vmax.f32 %v1950_v41, 0.0 }
 0x341   :  { %v1909_v23 = vpop.f32.mrf.mxu2 }
 0x342   :  { %v1910_v43 = vadd.f32 %v1909_v23, %v1890_v42  ;;  %2060 = vmatmul.f32.vlgmr.msrb.gmra.mxu2 %v1953_v21  ;;  %2100 = vmatmul.f32.vlgmr.msra.gmra.mxu0 %v1953_v21 }
 0x344   :  { %v1952_v44 = vmax.f32 %v1910_v43, 0.0 }
 0x346   :  { %2040 = vmatmul.f32.vlgmr.msrb.gmra.mxu1 %v1952_v44  ;;  %2080 = vmatmul.f32.vlgmr.msrb.gmra.mxu3 %v1952_v44 }
 0x3bf   :  { %v2101_v37 = vpop.f32.mrf.mxu0 }
 0x3c3   :  { %v2041_v62 = vpop.f32.mrf.mxu1 }
 0x3c4   :  { %v2042_v63 = vadd.f32 %v2041_v62, %v2020_v61 }
 0x3c5   :  { %v2061_v8 = vpop.f32.mrf.mxu2 }
 0x3c6   :  { %v2062_v9 = vadd.f32 %v2061_v8, %v2042_v63 }
 0x3c8   :  { %v2104_v36 = vmax.f32 %v2062_v9, 0.0 }
 0x3c9   :  { %v2081_v20 = vpop.f32.mrf.mxu3 }
 0x3ca   :  { %v2082_v54 = vadd.f32 %v2081_v20, %v2021_v0  ;;  %2158 = vmatmul.f32.vlgmr.msra.gmra.mxu1 %v2104_v36 }
 0x3cc   :  { %v2102_v31 = vadd.f32 %v2101_v37, %v2082_v54 }
 0x3ce   :  { %v2105_v50 = vmax.f32 %v2102_v31, 0.0 }
 0x3d0   :  { %2178 = vmatmul.f32.vlgmr.msra.gmra.mxu2 %v2105_v50 }
 0x447   :  { %v2159_v6 = vpop.f32.mrf.mxu1 }
 0x448   :  { %v2160_v58 = vadd.f32 %v2260_v5, %v2159_v6 }
 0x453   :  { %v2179_v7 = vpop.f32.mrf.mxu2 }
 0x454   :  { %v2180_v10 = vadd.f32 %v2179_v7, %v2160_v58 }
 0x456   :  { %2200 = vperm.xlu1 %2257, %v2180_v10   ;;  %2183 = vrot.lane.b32.xlu0 %v2180_v10, %s2582_s11 }
 0x4c8   :  { %v2184_v11 = vpop.permute.xlu0 %2183  ;;  %v2201_v4 = vpop.permute.xlu1 %2200 }
 0x4c9   :  { %v2187_v12 = vsel %vm2186_vm2, %v2184_v11, 0.0 }
 0x4ca   :  { %2188 = vadd.xlane.f32.xlu0 %v2187_v12 }
 0x53d   :  { %v2189_v30 = vpop.xlane.xlu0 %2188 }
 0x53e   :  { %v2197_v18 = vmul.f32 %v2196_v17, %v2189_v30 }
 0x540   :  { %v2198_v3 = vsub.f32 %v2180_v10, %v2197_v18 }
 0x542   :  { %v2203_v24 = vadd.f32 %v2201_v4, %v2198_v3 }
 0x544   :  { %2205 = vrot.lane.b32.xlu1 %v2203_v24, %s2582_s11 }
 0x5b6   :  { %v2206_v25 = vpop.permute.xlu1 %2205 }
 0x5b7   :  { %2208 = vst.msk [vmem:[#allocation22] sm:$0x3] %vm2186_vm2, %v2206_v25 }
 0x5b8   :  { %2219 = dma.vmem_to_hbm [thread:$0]  %s2215_s4, 32, %s2217_s27, [#allocation6]  }
 0x5b9   :  { %2563 = dma.done.wait [#allocation6], 32  }
 0x5ba   :  { %2564 = vsyncadd [#allocation6], 4294967264 }
 0x5bb   :  { %2224 = vsyncpa [#allocation5], 1 }
 0x5bc   :  { %2225 = vsyncpa [#allocation8], 1 }
 0x5bd   :  { %2226 = vsyncpa [#allocation11], 1 }
 0x5be   :  { %2227 = vsyncpa [#allocation14], 1 }
 0x5bf   :  { %2228 = vsyncpa [#allocation17], 1 }
 0x5c0   :  { %2229 = vsyncpa [#allocation20], 1 }
 0x5c1   :  { %2230 = vsyncpa [#allocation6], 1 }

</bundles_post_ra>
